<compile_context>
chip_gen: v7x
topology: tpu7x:2x2x1
jax: 0.10.0
libtpu: 0.0.40
codegen_flags: <defaults>
</compile_context>

<pallas_src>
import jax
import jax.numpy as jnp
from jax import lax
from jax.experimental import pallas as pl
from jax.experimental.pallas import tpu as pltpu


# ----------------------------------------------------------------------------
# In-kernel helpers (traced into the single fused kernel).
# ----------------------------------------------------------------------------
def _lstm_cell(gates, c_prev, H):
    """PyTorch gate order i, f, g, o. gates: (B, 4H)."""
    i = jax.nn.sigmoid(gates[:, 0 * H:1 * H])
    f = jax.nn.sigmoid(gates[:, 1 * H:2 * H])
    g = jnp.tanh(gates[:, 2 * H:3 * H])
    o = jax.nn.sigmoid(gates[:, 3 * H:4 * H])
    c = f * c_prev + i * g
    h = o * jnp.tanh(c)
    return h, c


def _bilstm_layer(gx_flat, whh, T, B, H):
    """One bidirectional LSTM layer, both directions interleaved in one unrolled loop.

    gx_flat: (T*B, 8H) precomputed input-projection gates, columns [fwd 4H | bwd 4H].
    whh:     (2H, 8H) block-diagonal [Whh_f^T ; Whh_b^T].
    Returns a list of T value blocks of shape (B, 2H) = [h_fwd | h_bwd] in time order.
    """
    h_f = jnp.zeros((B, H), jnp.float32)
    c_f = jnp.zeros((B, H), jnp.float32)
    h_b = jnp.zeros((B, H), jnp.float32)
    c_b = jnp.zeros((B, H), jnp.float32)
    fwd = [None] * T
    bwd = [None] * T
    for t in range(T):  # static unroll: T is small & fixed
        tb = T - 1 - t
        # One 256-wide MXU push covers both directions' recurrent projections.
        h_cat = jnp.concatenate([h_f, h_b], axis=1)                       # (B, 2H)
        gh = jnp.dot(h_cat, whh, preferred_element_type=jnp.float32)      # (B, 8H)
        g_f = gx_flat[t * B:(t + 1) * B, :4 * H] + gh[:, :4 * H]
        g_b = gx_flat[tb * B:(tb + 1) * B, 4 * H:] + gh[:, 4 * H:]
        h_f, c_f = _lstm_cell(g_f, c_f, H)
        h_b, c_b = _lstm_cell(g_b, c_b, H)
        fwd[t] = h_f
        bwd[tb] = h_b
    return [jnp.concatenate([fwd[t], bwd[t]], axis=1) for t in range(T)]   # T x (B, 2H)


def bilstm_acceptor_kernel(lens_ref, x_ref,
                           wih0_ref, whh0_ref, b0_ref,
                           wih1_ref, whh1_ref, b1_ref,
                           out_ref, seq_buf):
    """Fused 2-layer bidirectional LSTM + final output[lens-1, arange(B)] gather."""
    B = lens_ref.shape[0]
    T = x_ref.shape[0] // B
    H = whh0_ref.shape[0] // 2

    # ---- Layer 0: input projection hoisted out of the recurrence (one big MXU matmul) ----
    gx0 = jnp.dot(x_ref[...], wih0_ref[...],
                  preferred_element_type=jnp.float32) + b0_ref[...]        # (T*B, 8H)
    l0 = _bilstm_layer(gx0, whh0_ref[...], T, B, H)                        # T x (B, 2H)

    # ---- Layer 1 ----
    l0_flat = jnp.concatenate(l0, axis=0)                                  # (T*B, 2H)
    gx1 = jnp.dot(l0_flat, wih1_ref[...],
                  preferred_element_type=jnp.float32) + b1_ref[...]        # (T*B, 8H)
    l1 = _bilstm_layer(gx1, whh1_ref[...], T, B, H)                        # T x (B, 2H)

    # ---- In-kernel gather: output[lens - 1, arange(B)]  (lens lives in SMEM) ----
    for t in range(T):
        seq_buf[t] = l1[t]                                                 # (B, 2H) per step
    rows = []
    for b in range(B):
        t_b = lens_ref[b] - 1                                              # dynamic scalar
        rows.append(seq_buf[t_b][b:b + 1, :])                              # (1, 2H)
    out_ref[...] = jnp.concatenate(rows, axis=0)                           # (B, 2H)


# ----------------------------------------------------------------------------
# Wrapper: one pallas_call for the whole forward pass.
# ----------------------------------------------------------------------------
def lstm_acceptor_pallas(fused_params, padded_seqs, lens):
    T, B, D = padded_seqs.shape
    H = fused_params["whh0"].shape[0] // 2
    x2d = padded_seqs.astype(jnp.float32).reshape(T * B, D)   # free reshape outside the kernel
    return pl.pallas_call(
        bilstm_acceptor_kernel,
        out_shape=jax.ShapeDtypeStruct((B, 2 * H), jnp.float32),
        in_specs=[
            pl.BlockSpec(memory_space=pltpu.MemorySpace.SMEM),   # lens (scalars)
            pl.BlockSpec(memory_space=pltpu.MemorySpace.VMEM),   # x (T*B, D)
            pl.BlockSpec(memory_space=pltpu.MemorySpace.VMEM),   # wih0 (D, 8H)
            pl.BlockSpec(memory_space=pltpu.MemorySpace.VMEM),   # whh0 (2H, 8H) block-diag
            pl.BlockSpec(memory_space=pltpu.MemorySpace.VMEM),   # b0   (1, 8H)
            pl.BlockSpec(memory_space=pltpu.MemorySpace.VMEM),   # wih1 (2H, 8H)
            pl.BlockSpec(memory_space=pltpu.MemorySpace.VMEM),   # whh1 (2H, 8H) block-diag
            pl.BlockSpec(memory_space=pltpu.MemorySpace.VMEM),   # b1   (1, 8H)
        ],
        out_specs=pl.BlockSpec(memory_space=pltpu.MemorySpace.VMEM),
        scratch_shapes=[pltpu.VMEM((T, B, 2 * H), jnp.float32)],  # layer-1 seq for the gather
    )(lens.astype(jnp.int32), x2d,
      fused_params["wih0"], fused_params["whh0"], fused_params["b0"],
      fused_params["wih1"], fused_params["whh1"], fused_params["b1"])


# ----------------------------------------------------------------------------
# One-time parameter preparation (pre-transpose, direction-concat, block-diag, bias pre-add).
# ----------------------------------------------------------------------------
def prepare_fused_params(params):
    fused = {}
    for idx, p in enumerate(params):
        H4 = p["w_hh_f"].shape[0]
        H = H4 // 4
        # Input projection: columns [fwd 4H | bwd 4H]  -> (D_in, 8H)
        fused[f"wih{idx}"] = jnp.concatenate([p["w_ih_f"].T, p["w_ih_b"].T], axis=1)
        # Recurrent projection: block-diag([Whh_f^T, Whh_b^T]) -> (2H, 8H)
        whh = jnp.zeros((2 * H, 2 * H4), jnp.float32)
        whh = whh.at[:H, :H4].set(p["w_hh_f"].T)
        whh = whh.at[H:, H4:].set(p["w_hh_b"].T)
        fused[f"whh{idx}"] = whh
        # Bias: ih + hh pre-added, [fwd 4H | bwd 4H] -> (1, 8H)
        fused[f"b{idx}"] = jnp.concatenate(
            [p["b_ih_f"] + p["b_hh_f"], p["b_ih_b"] + p["b_hh_b"]]).reshape(1, -1)
    return fused


# ----------------------------------------------------------------------------
# Pure-JAX reference (lax.scan) — matches PyTorch nn.LSTM fed with padded_seqs (no packing):
# both directions run over padded timesteps, same as the original module's forward.
# ----------------------------------------------------------------------------
def _ref_lstm_direction(x_seq, w_ih, w_hh, b_ih, b_hh, hidden_size):
    T, B, _ = x_seq.shape
    b = b_ih + b_hh

    def step(carry, x_t):
        h, c = carry
        gates = x_t @ w_ih.T + h @ w_hh.T + b
        i = jax.nn.sigmoid(gates[:, 0 * hidden_size:1 * hidden_size])
        f = jax.nn.sigmoid(gates[:, 1 * hidden_size:2 * hidden_size])
        g = jnp.tanh(gates[:, 2 * hidden_size:3 * hidden_size])
        o = jax.nn.sigmoid(gates[:, 3 * hidden_size:4 * hidden_size])
        c = f * c + i * g
        h = o * jnp.tanh(c)
        return (h, c), h

    h0 = jnp.zeros((B, hidden_size), jnp.float32)
    c0 = jnp.zeros((B, hidden_size), jnp.float32)
    _, hs = lax.scan(step, (h0, c0), x_seq)
    return hs


def _ref_forward(params, padded_seqs, lens, hidden_size):
    x = padded_seqs.astype(jnp.float32)
    for p in params:
        fwd = _ref_lstm_direction(x, p["w_ih_f"], p["w_hh_f"], p["b_ih_f"], p["b_hh_f"], hidden_size)
        bwd = _ref_lstm_direction(x[::-1], p["w_ih_b"], p["w_hh_b"], p["b_ih_b"], p["b_hh_b"], hidden_size)[::-1]
        x = jnp.concatenate([fwd, bwd], axis=-1)
    return x[lens - 1, jnp.arange(x.shape[1])]


# ----------------------------------------------------------------------------
# Deterministic parameter init (PyTorch-style uniform(-1/sqrt(H), 1/sqrt(H))).
# ----------------------------------------------------------------------------
def init_params(key, input_size, hidden_size, num_layers):
    k = 1.0 / jnp.sqrt(hidden_size)
    params = []
    for layer in range(num_layers):
        d_in = input_size if layer == 0 else 2 * hidden_size
        layer_p = {}
        for suffix in ("f", "b"):  # forward / backward direction
            key, k1, k2, k3, k4 = jax.random.split(key, 5)
            layer_p[f"w_ih_{suffix}"] = jax.random.uniform(
                k1, (4 * hidden_size, d_in), jnp.float32, -k, k)
            layer_p[f"w_hh_{suffix}"] = jax.random.uniform(
                k2, (4 * hidden_size, hidden_size), jnp.float32, -k, k)
            layer_p[f"b_ih_{suffix}"] = jax.random.uniform(
                k3, (4 * hidden_size,), jnp.float32, -k, k)
            layer_p[f"b_hh_{suffix}"] = jax.random.uniform(
                k4, (4 * hidden_size,), jnp.float32, -k, k)
        params.append(layer_p)
    return params


if __name__ == "__main__":
    T, B = 8, 2
    INPUT_SIZE, HIDDEN_SIZE, NUM_LAYERS = 16, 32, 2  # kernel is specialized to 2 layers

    key = jax.random.PRNGKey(0)
    key, pkey, xkey = jax.random.split(key, 3)
    params = init_params(pkey, INPUT_SIZE, HIDDEN_SIZE, NUM_LAYERS)
    fused = prepare_fused_params(params)   # done once, outside the hot path

    padded_seqs = jax.random.normal(xkey, (T, B, INPUT_SIZE), jnp.float32)
    lens = jnp.array([5, 8], dtype=jnp.int32)

    fwd_fn = jax.jit(lstm_acceptor_pallas)
    out = jax.block_until_ready(fwd_fn(fused, padded_seqs, lens))

    ref = _ref_forward(params, padded_seqs, lens, HIDDEN_SIZE)
    assert out.shape == (B, 2 * HIDDEN_SIZE), out.shape
    assert jnp.allclose(out, ref, rtol=1e-4, atol=1e-4), "mismatch vs JAX reference"

    print("KERNEL_OK")
</pallas_src>

<mosaic_0001>
module attributes {stable_mosaic.version = 11 : i64} {
  func.func @bilstm_acceptor_kernel(%arg0: memref<2xi32, #tpu.memory_space<smem>>, %arg1: memref<16x16xf32, #tpu.memory_space<vmem>>, %arg2: memref<16x256xf32, #tpu.memory_space<vmem>>, %arg3: memref<64x256xf32, #tpu.memory_space<vmem>>, %arg4: memref<1x256xf32, #tpu.memory_space<vmem>>, %arg5: memref<64x256xf32, #tpu.memory_space<vmem>>, %arg6: memref<64x256xf32, #tpu.memory_space<vmem>>, %arg7: memref<1x256xf32, #tpu.memory_space<vmem>>, %arg8: memref<2x64xf32, #tpu.memory_space<vmem>>, %arg9: memref<8x2x64xf32, #tpu.memory_space<vmem>>) attributes {dimension_semantics = [], scalar_prefetch = 0 : i64, scratch_operands = 1 : i64, tpu.core_type = #tpu.core_type<tc>} {
    %c0 = arith.constant 0 : index
    %c0_0 = arith.constant 0 : index
    %0 = vector.load %arg1[%c0, %c0_0] : memref<16x16xf32, #tpu.memory_space<vmem>>, vector<16x16xf32>
    %c0_1 = arith.constant 0 : index
    %c0_2 = arith.constant 0 : index
    %1 = vector.load %arg2[%c0_1, %c0_2] : memref<16x256xf32, #tpu.memory_space<vmem>>, vector<16x256xf32>
    %cst = arith.constant dense<0.000000e+00> : vector<16x256xf32>
    %2 = tpu.matmul %0, %1, %cst {dimension_numbers = #tpu.dot_dimension_numbers<[1], [0], [0], [1], [0, 0, 1, 1], [], []>} : vector<16x16xf32>, vector<16x256xf32>, vector<16x256xf32> -> vector<16x256xf32>
    %c0_3 = arith.constant 0 : index
    %c0_4 = arith.constant 0 : index
    %3 = vector.load %arg4[%c0_3, %c0_4] : memref<1x256xf32, #tpu.memory_space<vmem>>, vector<1x256xf32>
    %4 = vector.broadcast %3 : vector<1x256xf32> to vector<16x256xf32>
    %5 = arith.addf %2, %4 : vector<16x256xf32>
    %c0_5 = arith.constant 0 : index
    %c0_6 = arith.constant 0 : index
    %6 = vector.load %arg3[%c0_5, %c0_6] : memref<64x256xf32, #tpu.memory_space<vmem>>, vector<64x256xf32>
    %cst_7 = arith.constant 0.000000e+00 : f32
    %7 = vector.broadcast %cst_7 : f32 to vector<2x32xf32>
    %cst_8 = arith.constant 0.000000e+00 : f32
    %8 = vector.broadcast %cst_8 : f32 to vector<2x32xf32>
    %cst_9 = arith.constant 0.000000e+00 : f32
    %9 = vector.broadcast %cst_9 : f32 to vector<2x32xf32>
    %cst_10 = arith.constant 0.000000e+00 : f32
    %10 = vector.broadcast %cst_10 : f32 to vector<2x32xf32>
    %11 = tpu.concatenate %7, %9 in 1 : vector<2x32xf32>, vector<2x32xf32> -> vector<2x64xf32>
    %cst_11 = arith.constant dense<0.000000e+00> : vector<2x256xf32>
    %12 = tpu.matmul %11, %6, %cst_11 {dimension_numbers = #tpu.dot_dimension_numbers<[1], [0], [0], [1], [0, 0, 1, 1], [], []>} : vector<2x64xf32>, vector<64x256xf32>, vector<2x256xf32> -> vector<2x256xf32>
    %13 = vector.extract_strided_slice %5 {offsets = [0, 0], sizes = [2, 128], strides = [1, 1]} : vector<16x256xf32> to vector<2x128xf32>
    %14 = vector.extract_strided_slice %12 {offsets = [0, 0], sizes = [2, 128], strides = [1, 1]} : vector<2x256xf32> to vector<2x128xf32>
    %15 = arith.addf %13, %14 : vector<2x128xf32>
    %16 = vector.extract_strided_slice %5 {offsets = [14, 128], sizes = [2, 128], strides = [1, 1]} : vector<16x256xf32> to vector<2x128xf32>
    %17 = vector.extract_strided_slice %12 {offsets = [0, 128], sizes = [2, 128], strides = [1, 1]} : vector<2x256xf32> to vector<2x128xf32>
    %18 = arith.addf %16, %17 : vector<2x128xf32>
    %19 = vector.extract_strided_slice %15 {offsets = [0, 0], sizes = [2, 32], strides = [1, 1]} : vector<2x128xf32> to vector<2x32xf32>
    %20 = arith.negf %19 : vector<2x32xf32>
    %21 = math.exp %20 : vector<2x32xf32>
    %cst_12 = arith.constant 1.000000e+00 : f32
    %22 = vector.broadcast %cst_12 : f32 to vector<2x32xf32>
    %23 = arith.addf %22, %21 : vector<2x32xf32>
    %24 = arith.divf %22, %23 : vector<2x32xf32>
    %25 = vector.extract_strided_slice %15 {offsets = [0, 32], sizes = [2, 32], strides = [1, 1]} : vector<2x128xf32> to vector<2x32xf32>
    %26 = arith.negf %25 : vector<2x32xf32>
    %27 = math.exp %26 : vector<2x32xf32>
    %cst_13 = arith.constant 1.000000e+00 : f32
    %28 = vector.broadcast %cst_13 : f32 to vector<2x32xf32>
    %29 = arith.addf %28, %27 : vector<2x32xf32>
    %30 = arith.divf %28, %29 : vector<2x32xf32>
    %31 = vector.extract_strided_slice %15 {offsets = [0, 64], sizes = [2, 32], strides = [1, 1]} : vector<2x128xf32> to vector<2x32xf32>
    %32 = math.tanh %31 : vector<2x32xf32>
    %33 = vector.extract_strided_slice %15 {offsets = [0, 96], sizes = [2, 32], strides = [1, 1]} : vector<2x128xf32> to vector<2x32xf32>
    %34 = arith.negf %33 : vector<2x32xf32>
    %35 = math.exp %34 : vector<2x32xf32>
    %cst_14 = arith.constant 1.000000e+00 : f32
    %36 = vector.broadcast %cst_14 : f32 to vector<2x32xf32>
    %37 = arith.addf %36, %35 : vector<2x32xf32>
    %38 = arith.divf %36, %37 : vector<2x32xf32>
    %39 = arith.mulf %30, %8 : vector<2x32xf32>
    %40 = arith.mulf %24, %32 : vector<2x32xf32>
    %41 = arith.addf %39, %40 : vector<2x32xf32>
    %42 = math.tanh %41 : vector<2x32xf32>
    %43 = arith.mulf %38, %42 : vector<2x32xf32>
    %44 = vector.extract_strided_slice %18 {offsets = [0, 0], sizes = [2, 32], strides = [1, 1]} : vector<2x128xf32> to vector<2x32xf32>
    %45 = arith.negf %44 : vector<2x32xf32>
    %46 = math.exp %45 : vector<2x32xf32>
    %cst_15 = arith.constant 1.000000e+00 : f32
    %47 = vector.broadcast %cst_15 : f32 to vector<2x32xf32>
    %48 = arith.addf %47, %46 : vector<2x32xf32>
    %49 = arith.divf %47, %48 : vector<2x32xf32>
    %50 = vector.extract_strided_slice %18 {offsets = [0, 32], sizes = [2, 32], strides = [1, 1]} : vector<2x128xf32> to vector<2x32xf32>
    %51 = arith.negf %50 : vector<2x32xf32>
    %52 = math.exp %51 : vector<2x32xf32>
    %cst_16 = arith.constant 1.000000e+00 : f32
    %53 = vector.broadcast %cst_16 : f32 to vector<2x32xf32>
    %54 = arith.addf %53, %52 : vector<2x32xf32>
    %55 = arith.divf %53, %54 : vector<2x32xf32>
    %56 = vector.extract_strided_slice %18 {offsets = [0, 64], sizes = [2, 32], strides = [1, 1]} : vector<2x128xf32> to vector<2x32xf32>
    %57 = math.tanh %56 : vector<2x32xf32>
    %58 = vector.extract_strided_slice %18 {offsets = [0, 96], sizes = [2, 32], strides = [1, 1]} : vector<2x128xf32> to vector<2x32xf32>
    %59 = arith.negf %58 : vector<2x32xf32>
    %60 = math.exp %59 : vector<2x32xf32>
    %cst_17 = arith.constant 1.000000e+00 : f32
    %61 = vector.broadcast %cst_17 : f32 to vector<2x32xf32>
    %62 = arith.addf %61, %60 : vector<2x32xf32>
    %63 = arith.divf %61, %62 : vector<2x32xf32>
    %64 = arith.mulf %55, %10 : vector<2x32xf32>
    %65 = arith.mulf %49, %57 : vector<2x32xf32>
    %66 = arith.addf %64, %65 : vector<2x32xf32>
    %67 = math.tanh %66 : vector<2x32xf32>
    %68 = arith.mulf %63, %67 : vector<2x32xf32>
    %69 = tpu.concatenate %43, %68 in 1 : vector<2x32xf32>, vector<2x32xf32> -> vector<2x64xf32>
    %cst_18 = arith.constant dense<0.000000e+00> : vector<2x256xf32>
    %70 = tpu.matmul %69, %6, %cst_18 {dimension_numbers = #tpu.dot_dimension_numbers<[1], [0], [0], [1], [0, 0, 1, 1], [], []>} : vector<2x64xf32>, vector<64x256xf32>, vector<2x256xf32> -> vector<2x256xf32>
    %71 = vector.extract_strided_slice %5 {offsets = [2, 0], sizes = [2, 128], strides = [1, 1]} : vector<16x256xf32> to vector<2x128xf32>
    %72 = vector.extract_strided_slice %70 {offsets = [0, 0], sizes = [2, 128], strides = [1, 1]} : vector<2x256xf32> to vector<2x128xf32>
    %73 = arith.addf %71, %72 : vector<2x128xf32>
    %74 = vector.extract_strided_slice %5 {offsets = [12, 128], sizes = [2, 128], strides = [1, 1]} : vector<16x256xf32> to vector<2x128xf32>
    %75 = vector.extract_strided_slice %70 {offsets = [0, 128], sizes = [2, 128], strides = [1, 1]} : vector<2x256xf32> to vector<2x128xf32>
    %76 = arith.addf %74, %75 : vector<2x128xf32>
    %77 = vector.extract_strided_slice %73 {offsets = [0, 0], sizes = [2, 32], strides = [1, 1]} : vector<2x128xf32> to vector<2x32xf32>
    %78 = arith.negf %77 : vector<2x32xf32>
    %79 = math.exp %78 : vector<2x32xf32>
    %cst_19 = arith.constant 1.000000e+00 : f32
    %80 = vector.broadcast %cst_19 : f32 to vector<2x32xf32>
    %81 = arith.addf %80, %79 : vector<2x32xf32>
    %82 = arith.divf %80, %81 : vector<2x32xf32>
    %83 = vector.extract_strided_slice %73 {offsets = [0, 32], sizes = [2, 32], strides = [1, 1]} : vector<2x128xf32> to vector<2x32xf32>
    %84 = arith.negf %83 : vector<2x32xf32>
    %85 = math.exp %84 : vector<2x32xf32>
    %cst_20 = arith.constant 1.000000e+00 : f32
    %86 = vector.broadcast %cst_20 : f32 to vector<2x32xf32>
    %87 = arith.addf %86, %85 : vector<2x32xf32>
    %88 = arith.divf %86, %87 : vector<2x32xf32>
    %89 = vector.extract_strided_slice %73 {offsets = [0, 64], sizes = [2, 32], strides = [1, 1]} : vector<2x128xf32> to vector<2x32xf32>
    %90 = math.tanh %89 : vector<2x32xf32>
    %91 = vector.extract_strided_slice %73 {offsets = [0, 96], sizes = [2, 32], strides = [1, 1]} : vector<2x128xf32> to vector<2x32xf32>
    %92 = arith.negf %91 : vector<2x32xf32>
    %93 = math.exp %92 : vector<2x32xf32>
    %cst_21 = arith.constant 1.000000e+00 : f32
    %94 = vector.broadcast %cst_21 : f32 to vector<2x32xf32>
    %95 = arith.addf %94, %93 : vector<2x32xf32>
    %96 = arith.divf %94, %95 : vector<2x32xf32>
    %97 = arith.mulf %88, %41 : vector<2x32xf32>
    %98 = arith.mulf %82, %90 : vector<2x32xf32>
    %99 = arith.addf %97, %98 : vector<2x32xf32>
    %100 = math.tanh %99 : vector<2x32xf32>
    %101 = arith.mulf %96, %100 : vector<2x32xf32>
    %102 = vector.extract_strided_slice %76 {offsets = [0, 0], sizes = [2, 32], strides = [1, 1]} : vector<2x128xf32> to vector<2x32xf32>
    %103 = arith.negf %102 : vector<2x32xf32>
    %104 = math.exp %103 : vector<2x32xf32>
    %cst_22 = arith.constant 1.000000e+00 : f32
    %105 = vector.broadcast %cst_22 : f32 to vector<2x32xf32>
    %106 = arith.addf %105, %104 : vector<2x32xf32>
    %107 = arith.divf %105, %106 : vector<2x32xf32>
    %108 = vector.extract_strided_slice %76 {offsets = [0, 32], sizes = [2, 32], strides = [1, 1]} : vector<2x128xf32> to vector<2x32xf32>
    %109 = arith.negf %108 : vector<2x32xf32>
    %110 = math.exp %109 : vector<2x32xf32>
    %cst_23 = arith.constant 1.000000e+00 : f32
    %111 = vector.broadcast %cst_23 : f32 to vector<2x32xf32>
    %112 = arith.addf %111, %110 : vector<2x32xf32>
    %113 = arith.divf %111, %112 : vector<2x32xf32>
    %114 = vector.extract_strided_slice %76 {offsets = [0, 64], sizes = [2, 32], strides = [1, 1]} : vector<2x128xf32> to vector<2x32xf32>
    %115 = math.tanh %114 : vector<2x32xf32>
    %116 = vector.extract_strided_slice %76 {offsets = [0, 96], sizes = [2, 32], strides = [1, 1]} : vector<2x128xf32> to vector<2x32xf32>
    %117 = arith.negf %116 : vector<2x32xf32>
    %118 = math.exp %117 : vector<2x32xf32>
    %cst_24 = arith.constant 1.000000e+00 : f32
    %119 = vector.broadcast %cst_24 : f32 to vector<2x32xf32>
    %120 = arith.addf %119, %118 : vector<2x32xf32>
    %121 = arith.divf %119, %120 : vector<2x32xf32>
    %122 = arith.mulf %113, %66 : vector<2x32xf32>
    %123 = arith.mulf %107, %115 : vector<2x32xf32>
    %124 = arith.addf %122, %123 : vector<2x32xf32>
    %125 = math.tanh %124 : vector<2x32xf32>
    %126 = arith.mulf %121, %125 : vector<2x32xf32>
    %127 = tpu.concatenate %101, %126 in 1 : vector<2x32xf32>, vector<2x32xf32> -> vector<2x64xf32>
    %cst_25 = arith.constant dense<0.000000e+00> : vector<2x256xf32>
    %128 = tpu.matmul %127, %6, %cst_25 {dimension_numbers = #tpu.dot_dimension_numbers<[1], [0], [0], [1], [0, 0, 1, 1], [], []>} : vector<2x64xf32>, vector<64x256xf32>, vector<2x256xf32> -> vector<2x256xf32>
    %129 = vector.extract_strided_slice %5 {offsets = [4, 0], sizes = [2, 128], strides = [1, 1]} : vector<16x256xf32> to vector<2x128xf32>
    %130 = vector.extract_strided_slice %128 {offsets = [0, 0], sizes = [2, 128], strides = [1, 1]} : vector<2x256xf32> to vector<2x128xf32>
    %131 = arith.addf %129, %130 : vector<2x128xf32>
    %132 = vector.extract_strided_slice %5 {offsets = [10, 128], sizes = [2, 128], strides = [1, 1]} : vector<16x256xf32> to vector<2x128xf32>
    %133 = vector.extract_strided_slice %128 {offsets = [0, 128], sizes = [2, 128], strides = [1, 1]} : vector<2x256xf32> to vector<2x128xf32>
    %134 = arith.addf %132, %133 : vector<2x128xf32>
    %135 = vector.extract_strided_slice %131 {offsets = [0, 0], sizes = [2, 32], strides = [1, 1]} : vector<2x128xf32> to vector<2x32xf32>
    %136 = arith.negf %135 : vector<2x32xf32>
    %137 = math.exp %136 : vector<2x32xf32>
    %cst_26 = arith.constant 1.000000e+00 : f32
    %138 = vector.broadcast %cst_26 : f32 to vector<2x32xf32>
    %139 = arith.addf %138, %137 : vector<2x32xf32>
    %140 = arith.divf %138, %139 : vector<2x32xf32>
    %141 = vector.extract_strided_slice %131 {offsets = [0, 32], sizes = [2, 32], strides = [1, 1]} : vector<2x128xf32> to vector<2x32xf32>
    %142 = arith.negf %141 : vector<2x32xf32>
    %143 = math.exp %142 : vector<2x32xf32>
    %cst_27 = arith.constant 1.000000e+00 : f32
    %144 = vector.broadcast %cst_27 : f32 to vector<2x32xf32>
    %145 = arith.addf %144, %143 : vector<2x32xf32>
    %146 = arith.divf %144, %145 : vector<2x32xf32>
    %147 = vector.extract_strided_slice %131 {offsets = [0, 64], sizes = [2, 32], strides = [1, 1]} : vector<2x128xf32> to vector<2x32xf32>
    %148 = math.tanh %147 : vector<2x32xf32>
    %149 = vector.extract_strided_slice %131 {offsets = [0, 96], sizes = [2, 32], strides = [1, 1]} : vector<2x128xf32> to vector<2x32xf32>
    %150 = arith.negf %149 : vector<2x32xf32>
    %151 = math.exp %150 : vector<2x32xf32>
    %cst_28 = arith.constant 1.000000e+00 : f32
    %152 = vector.broadcast %cst_28 : f32 to vector<2x32xf32>
    %153 = arith.addf %152, %151 : vector<2x32xf32>
    %154 = arith.divf %152, %153 : vector<2x32xf32>
    %155 = arith.mulf %146, %99 : vector<2x32xf32>
    %156 = arith.mulf %140, %148 : vector<2x32xf32>
    %157 = arith.addf %155, %156 : vector<2x32xf32>
    %158 = math.tanh %157 : vector<2x32xf32>
    %159 = arith.mulf %154, %158 : vector<2x32xf32>
    %160 = vector.extract_strided_slice %134 {offsets = [0, 0], sizes = [2, 32], strides = [1, 1]} : vector<2x128xf32> to vector<2x32xf32>
    %161 = arith.negf %160 : vector<2x32xf32>
    %162 = math.exp %161 : vector<2x32xf32>
    %cst_29 = arith.constant 1.000000e+00 : f32
    %163 = vector.broadcast %cst_29 : f32 to vector<2x32xf32>
    %164 = arith.addf %163, %162 : vector<2x32xf32>
    %165 = arith.divf %163, %164 : vector<2x32xf32>
    %166 = vector.extract_strided_slice %134 {offsets = [0, 32], sizes = [2, 32], strides = [1, 1]} : vector<2x128xf32> to vector<2x32xf32>
    %167 = arith.negf %166 : vector<2x32xf32>
    %168 = math.exp %167 : vector<2x32xf32>
    %cst_30 = arith.constant 1.000000e+00 : f32
    %169 = vector.broadcast %cst_30 : f32 to vector<2x32xf32>
    %170 = arith.addf %169, %168 : vector<2x32xf32>
    %171 = arith.divf %169, %170 : vector<2x32xf32>
    %172 = vector.extract_strided_slice %134 {offsets = [0, 64], sizes = [2, 32], strides = [1, 1]} : vector<2x128xf32> to vector<2x32xf32>
    %173 = math.tanh %172 : vector<2x32xf32>
    %174 = vector.extract_strided_slice %134 {offsets = [0, 96], sizes = [2, 32], strides = [1, 1]} : vector<2x128xf32> to vector<2x32xf32>
    %175 = arith.negf %174 : vector<2x32xf32>
    %176 = math.exp %175 : vector<2x32xf32>
    %cst_31 = arith.constant 1.000000e+00 : f32
    %177 = vector.broadcast %cst_31 : f32 to vector<2x32xf32>
    %178 = arith.addf %177, %176 : vector<2x32xf32>
    %179 = arith.divf %177, %178 : vector<2x32xf32>
    %180 = arith.mulf %171, %124 : vector<2x32xf32>
    %181 = arith.mulf %165, %173 : vector<2x32xf32>
    %182 = arith.addf %180, %181 : vector<2x32xf32>
    %183 = math.tanh %182 : vector<2x32xf32>
    %184 = arith.mulf %179, %183 : vector<2x32xf32>
    %185 = tpu.concatenate %159, %184 in 1 : vector<2x32xf32>, vector<2x32xf32> -> vector<2x64xf32>
    %cst_32 = arith.constant dense<0.000000e+00> : vector<2x256xf32>
    %186 = tpu.matmul %185, %6, %cst_32 {dimension_numbers = #tpu.dot_dimension_numbers<[1], [0], [0], [1], [0, 0, 1, 1], [], []>} : vector<2x64xf32>, vector<64x256xf32>, vector<2x256xf32> -> vector<2x256xf32>
    %187 = vector.extract_strided_slice %5 {offsets = [6, 0], sizes = [2, 128], strides = [1, 1]} : vector<16x256xf32> to vector<2x128xf32>
    %188 = vector.extract_strided_slice %186 {offsets = [0, 0], sizes = [2, 128], strides = [1, 1]} : vector<2x256xf32> to vector<2x128xf32>
    %189 = arith.addf %187, %188 : vector<2x128xf32>
    %190 = vector.extract_strided_slice %5 {offsets = [8, 128], sizes = [2, 128], strides = [1, 1]} : vector<16x256xf32> to vector<2x128xf32>
    %191 = vector.extract_strided_slice %186 {offsets = [0, 128], sizes = [2, 128], strides = [1, 1]} : vector<2x256xf32> to vector<2x128xf32>
    %192 = arith.addf %190, %191 : vector<2x128xf32>
    %193 = vector.extract_strided_slice %189 {offsets = [0, 0], sizes = [2, 32], strides = [1, 1]} : vector<2x128xf32> to vector<2x32xf32>
    %194 = arith.negf %193 : vector<2x32xf32>
    %195 = math.exp %194 : vector<2x32xf32>
    %cst_33 = arith.constant 1.000000e+00 : f32
    %196 = vector.broadcast %cst_33 : f32 to vector<2x32xf32>
    %197 = arith.addf %196, %195 : vector<2x32xf32>
    %198 = arith.divf %196, %197 : vector<2x32xf32>
    %199 = vector.extract_strided_slice %189 {offsets = [0, 32], sizes = [2, 32], strides = [1, 1]} : vector<2x128xf32> to vector<2x32xf32>
    %200 = arith.negf %199 : vector<2x32xf32>
    %201 = math.exp %200 : vector<2x32xf32>
    %cst_34 = arith.constant 1.000000e+00 : f32
    %202 = vector.broadcast %cst_34 : f32 to vector<2x32xf32>
    %203 = arith.addf %202, %201 : vector<2x32xf32>
    %204 = arith.divf %202, %203 : vector<2x32xf32>
    %205 = vector.extract_strided_slice %189 {offsets = [0, 64], sizes = [2, 32], strides = [1, 1]} : vector<2x128xf32> to vector<2x32xf32>
    %206 = math.tanh %205 : vector<2x32xf32>
    %207 = vector.extract_strided_slice %189 {offsets = [0, 96], sizes = [2, 32], strides = [1, 1]} : vector<2x128xf32> to vector<2x32xf32>
    %208 = arith.negf %207 : vector<2x32xf32>
    %209 = math.exp %208 : vector<2x32xf32>
    %cst_35 = arith.constant 1.000000e+00 : f32
    %210 = vector.broadcast %cst_35 : f32 to vector<2x32xf32>
    %211 = arith.addf %210, %209 : vector<2x32xf32>
    %212 = arith.divf %210, %211 : vector<2x32xf32>
    %213 = arith.mulf %204, %157 : vector<2x32xf32>
    %214 = arith.mulf %198, %206 : vector<2x32xf32>
    %215 = arith.addf %213, %214 : vector<2x32xf32>
    %216 = math.tanh %215 : vector<2x32xf32>
    %217 = arith.mulf %212, %216 : vector<2x32xf32>
    %218 = vector.extract_strided_slice %192 {offsets = [0, 0], sizes = [2, 32], strides = [1, 1]} : vector<2x128xf32> to vector<2x32xf32>
    %219 = arith.negf %218 : vector<2x32xf32>
    %220 = math.exp %219 : vector<2x32xf32>
    %cst_36 = arith.constant 1.000000e+00 : f32
    %221 = vector.broadcast %cst_36 : f32 to vector<2x32xf32>
    %222 = arith.addf %221, %220 : vector<2x32xf32>
    %223 = arith.divf %221, %222 : vector<2x32xf32>
    %224 = vector.extract_strided_slice %192 {offsets = [0, 32], sizes = [2, 32], strides = [1, 1]} : vector<2x128xf32> to vector<2x32xf32>
    %225 = arith.negf %224 : vector<2x32xf32>
    %226 = math.exp %225 : vector<2x32xf32>
    %cst_37 = arith.constant 1.000000e+00 : f32
    %227 = vector.broadcast %cst_37 : f32 to vector<2x32xf32>
    %228 = arith.addf %227, %226 : vector<2x32xf32>
    %229 = arith.divf %227, %228 : vector<2x32xf32>
    %230 = vector.extract_strided_slice %192 {offsets = [0, 64], sizes = [2, 32], strides = [1, 1]} : vector<2x128xf32> to vector<2x32xf32>
    %231 = math.tanh %230 : vector<2x32xf32>
    %232 = vector.extract_strided_slice %192 {offsets = [0, 96], sizes = [2, 32], strides = [1, 1]} : vector<2x128xf32> to vector<2x32xf32>
    %233 = arith.negf %232 : vector<2x32xf32>
    %234 = math.exp %233 : vector<2x32xf32>
    %cst_38 = arith.constant 1.000000e+00 : f32
    %235 = vector.broadcast %cst_38 : f32 to vector<2x32xf32>
    %236 = arith.addf %235, %234 : vector<2x32xf32>
    %237 = arith.divf %235, %236 : vector<2x32xf32>
    %238 = arith.mulf %229, %182 : vector<2x32xf32>
    %239 = arith.mulf %223, %231 : vector<2x32xf32>
    %240 = arith.addf %238, %239 : vector<2x32xf32>
    %241 = math.tanh %240 : vector<2x32xf32>
    %242 = arith.mulf %237, %241 : vector<2x32xf32>
    %243 = tpu.concatenate %217, %242 in 1 : vector<2x32xf32>, vector<2x32xf32> -> vector<2x64xf32>
    %cst_39 = arith.constant dense<0.000000e+00> : vector<2x256xf32>
    %244 = tpu.matmul %243, %6, %cst_39 {dimension_numbers = #tpu.dot_dimension_numbers<[1], [0], [0], [1], [0, 0, 1, 1], [], []>} : vector<2x64xf32>, vector<64x256xf32>, vector<2x256xf32> -> vector<2x256xf32>
    %245 = vector.extract_strided_slice %5 {offsets = [8, 0], sizes = [2, 128], strides = [1, 1]} : vector<16x256xf32> to vector<2x128xf32>
    %246 = vector.extract_strided_slice %244 {offsets = [0, 0], sizes = [2, 128], strides = [1, 1]} : vector<2x256xf32> to vector<2x128xf32>
    %247 = arith.addf %245, %246 : vector<2x128xf32>
    %248 = vector.extract_strided_slice %5 {offsets = [6, 128], sizes = [2, 128], strides = [1, 1]} : vector<16x256xf32> to vector<2x128xf32>
    %249 = vector.extract_strided_slice %244 {offsets = [0, 128], sizes = [2, 128], strides = [1, 1]} : vector<2x256xf32> to vector<2x128xf32>
    %250 = arith.addf %248, %249 : vector<2x128xf32>
    %251 = vector.extract_strided_slice %247 {offsets = [0, 0], sizes = [2, 32], strides = [1, 1]} : vector<2x128xf32> to vector<2x32xf32>
    %252 = arith.negf %251 : vector<2x32xf32>
    %253 = math.exp %252 : vector<2x32xf32>
    %cst_40 = arith.constant 1.000000e+00 : f32
    %254 = vector.broadcast %cst_40 : f32 to vector<2x32xf32>
    %255 = arith.addf %254, %253 : vector<2x32xf32>
    %256 = arith.divf %254, %255 : vector<2x32xf32>
    %257 = vector.extract_strided_slice %247 {offsets = [0, 32], sizes = [2, 32], strides = [1, 1]} : vector<2x128xf32> to vector<2x32xf32>
    %258 = arith.negf %257 : vector<2x32xf32>
    %259 = math.exp %258 : vector<2x32xf32>
    %cst_41 = arith.constant 1.000000e+00 : f32
    %260 = vector.broadcast %cst_41 : f32 to vector<2x32xf32>
    %261 = arith.addf %260, %259 : vector<2x32xf32>
    %262 = arith.divf %260, %261 : vector<2x32xf32>
    %263 = vector.extract_strided_slice %247 {offsets = [0, 64], sizes = [2, 32], strides = [1, 1]} : vector<2x128xf32> to vector<2x32xf32>
    %264 = math.tanh %263 : vector<2x32xf32>
    %265 = vector.extract_strided_slice %247 {offsets = [0, 96], sizes = [2, 32], strides = [1, 1]} : vector<2x128xf32> to vector<2x32xf32>
    %266 = arith.negf %265 : vector<2x32xf32>
    %267 = math.exp %266 : vector<2x32xf32>
    %cst_42 = arith.constant 1.000000e+00 : f32
    %268 = vector.broadcast %cst_42 : f32 to vector<2x32xf32>
    %269 = arith.addf %268, %267 : vector<2x32xf32>
    %270 = arith.divf %268, %269 : vector<2x32xf32>
    %271 = arith.mulf %262, %215 : vector<2x32xf32>
    %272 = arith.mulf %256, %264 : vector<2x32xf32>
    %273 = arith.addf %271, %272 : vector<2x32xf32>
    %274 = math.tanh %273 : vector<2x32xf32>
    %275 = arith.mulf %270, %274 : vector<2x32xf32>
    %276 = vector.extract_strided_slice %250 {offsets = [0, 0], sizes = [2, 32], strides = [1, 1]} : vector<2x128xf32> to vector<2x32xf32>
    %277 = arith.negf %276 : vector<2x32xf32>
    %278 = math.exp %277 : vector<2x32xf32>
    %cst_43 = arith.constant 1.000000e+00 : f32
    %279 = vector.broadcast %cst_43 : f32 to vector<2x32xf32>
    %280 = arith.addf %279, %278 : vector<2x32xf32>
    %281 = arith.divf %279, %280 : vector<2x32xf32>
    %282 = vector.extract_strided_slice %250 {offsets = [0, 32], sizes = [2, 32], strides = [1, 1]} : vector<2x128xf32> to vector<2x32xf32>
    %283 = arith.negf %282 : vector<2x32xf32>
    %284 = math.exp %283 : vector<2x32xf32>
    %cst_44 = arith.constant 1.000000e+00 : f32
    %285 = vector.broadcast %cst_44 : f32 to vector<2x32xf32>
    %286 = arith.addf %285, %284 : vector<2x32xf32>
    %287 = arith.divf %285, %286 : vector<2x32xf32>
    %288 = vector.extract_strided_slice %250 {offsets = [0, 64], sizes = [2, 32], strides = [1, 1]} : vector<2x128xf32> to vector<2x32xf32>
    %289 = math.tanh %288 : vector<2x32xf32>
    %290 = vector.extract_strided_slice %250 {offsets = [0, 96], sizes = [2, 32], strides = [1, 1]} : vector<2x128xf32> to vector<2x32xf32>
    %291 = arith.negf %290 : vector<2x32xf32>
    %292 = math.exp %291 : vector<2x32xf32>
    %cst_45 = arith.constant 1.000000e+00 : f32
    %293 = vector.broadcast %cst_45 : f32 to vector<2x32xf32>
    %294 = arith.addf %293, %292 : vector<2x32xf32>
    %295 = arith.divf %293, %294 : vector<2x32xf32>
    %296 = arith.mulf %287, %240 : vector<2x32xf32>
    %297 = arith.mulf %281, %289 : vector<2x32xf32>
    %298 = arith.addf %296, %297 : vector<2x32xf32>
    %299 = math.tanh %298 : vector<2x32xf32>
    %300 = arith.mulf %295, %299 : vector<2x32xf32>
    %301 = tpu.concatenate %275, %300 in 1 : vector<2x32xf32>, vector<2x32xf32> -> vector<2x64xf32>
    %cst_46 = arith.constant dense<0.000000e+00> : vector<2x256xf32>
    %302 = tpu.matmul %301, %6, %cst_46 {dimension_numbers = #tpu.dot_dimension_numbers<[1], [0], [0], [1], [0, 0, 1, 1], [], []>} : vector<2x64xf32>, vector<64x256xf32>, vector<2x256xf32> -> vector<2x256xf32>
    %303 = vector.extract_strided_slice %5 {offsets = [10, 0], sizes = [2, 128], strides = [1, 1]} : vector<16x256xf32> to vector<2x128xf32>
    %304 = vector.extract_strided_slice %302 {offsets = [0, 0], sizes = [2, 128], strides = [1, 1]} : vector<2x256xf32> to vector<2x128xf32>
    %305 = arith.addf %303, %304 : vector<2x128xf32>
    %306 = vector.extract_strided_slice %5 {offsets = [4, 128], sizes = [2, 128], strides = [1, 1]} : vector<16x256xf32> to vector<2x128xf32>
    %307 = vector.extract_strided_slice %302 {offsets = [0, 128], sizes = [2, 128], strides = [1, 1]} : vector<2x256xf32> to vector<2x128xf32>
    %308 = arith.addf %306, %307 : vector<2x128xf32>
    %309 = vector.extract_strided_slice %305 {offsets = [0, 0], sizes = [2, 32], strides = [1, 1]} : vector<2x128xf32> to vector<2x32xf32>
    %310 = arith.negf %309 : vector<2x32xf32>
    %311 = math.exp %310 : vector<2x32xf32>
    %cst_47 = arith.constant 1.000000e+00 : f32
    %312 = vector.broadcast %cst_47 : f32 to vector<2x32xf32>
    %313 = arith.addf %312, %311 : vector<2x32xf32>
    %314 = arith.divf %312, %313 : vector<2x32xf32>
    %315 = vector.extract_strided_slice %305 {offsets = [0, 32], sizes = [2, 32], strides = [1, 1]} : vector<2x128xf32> to vector<2x32xf32>
    %316 = arith.negf %315 : vector<2x32xf32>
    %317 = math.exp %316 : vector<2x32xf32>
    %cst_48 = arith.constant 1.000000e+00 : f32
    %318 = vector.broadcast %cst_48 : f32 to vector<2x32xf32>
    %319 = arith.addf %318, %317 : vector<2x32xf32>
    %320 = arith.divf %318, %319 : vector<2x32xf32>
    %321 = vector.extract_strided_slice %305 {offsets = [0, 64], sizes = [2, 32], strides = [1, 1]} : vector<2x128xf32> to vector<2x32xf32>
    %322 = math.tanh %321 : vector<2x32xf32>
    %323 = vector.extract_strided_slice %305 {offsets = [0, 96], sizes = [2, 32], strides = [1, 1]} : vector<2x128xf32> to vector<2x32xf32>
    %324 = arith.negf %323 : vector<2x32xf32>
    %325 = math.exp %324 : vector<2x32xf32>
    %cst_49 = arith.constant 1.000000e+00 : f32
    %326 = vector.broadcast %cst_49 : f32 to vector<2x32xf32>
    %327 = arith.addf %326, %325 : vector<2x32xf32>
    %328 = arith.divf %326, %327 : vector<2x32xf32>
    %329 = arith.mulf %320, %273 : vector<2x32xf32>
    %330 = arith.mulf %314, %322 : vector<2x32xf32>
    %331 = arith.addf %329, %330 : vector<2x32xf32>
    %332 = math.tanh %331 : vector<2x32xf32>
    %333 = arith.mulf %328, %332 : vector<2x32xf32>
    %334 = vector.extract_strided_slice %308 {offsets = [0, 0], sizes = [2, 32], strides = [1, 1]} : vector<2x128xf32> to vector<2x32xf32>
    %335 = arith.negf %334 : vector<2x32xf32>
    %336 = math.exp %335 : vector<2x32xf32>
    %cst_50 = arith.constant 1.000000e+00 : f32
    %337 = vector.broadcast %cst_50 : f32 to vector<2x32xf32>
    %338 = arith.addf %337, %336 : vector<2x32xf32>
    %339 = arith.divf %337, %338 : vector<2x32xf32>
    %340 = vector.extract_strided_slice %308 {offsets = [0, 32], sizes = [2, 32], strides = [1, 1]} : vector<2x128xf32> to vector<2x32xf32>
    %341 = arith.negf %340 : vector<2x32xf32>
    %342 = math.exp %341 : vector<2x32xf32>
    %cst_51 = arith.constant 1.000000e+00 : f32
    %343 = vector.broadcast %cst_51 : f32 to vector<2x32xf32>
    %344 = arith.addf %343, %342 : vector<2x32xf32>
    %345 = arith.divf %343, %344 : vector<2x32xf32>
    %346 = vector.extract_strided_slice %308 {offsets = [0, 64], sizes = [2, 32], strides = [1, 1]} : vector<2x128xf32> to vector<2x32xf32>
    %347 = math.tanh %346 : vector<2x32xf32>
    %348 = vector.extract_strided_slice %308 {offsets = [0, 96], sizes = [2, 32], strides = [1, 1]} : vector<2x128xf32> to vector<2x32xf32>
    %349 = arith.negf %348 : vector<2x32xf32>
    %350 = math.exp %349 : vector<2x32xf32>
    %cst_52 = arith.constant 1.000000e+00 : f32
    %351 = vector.broadcast %cst_52 : f32 to vector<2x32xf32>
    %352 = arith.addf %351, %350 : vector<2x32xf32>
    %353 = arith.divf %351, %352 : vector<2x32xf32>
    %354 = arith.mulf %345, %298 : vector<2x32xf32>
    %355 = arith.mulf %339, %347 : vector<2x32xf32>
    %356 = arith.addf %354, %355 : vector<2x32xf32>
    %357 = math.tanh %356 : vector<2x32xf32>
    %358 = arith.mulf %353, %357 : vector<2x32xf32>
    %359 = tpu.concatenate %333, %358 in 1 : vector<2x32xf32>, vector<2x32xf32> -> vector<2x64xf32>
    %cst_53 = arith.constant dense<0.000000e+00> : vector<2x256xf32>
    %360 = tpu.matmul %359, %6, %cst_53 {dimension_numbers = #tpu.dot_dimension_numbers<[1], [0], [0], [1], [0, 0, 1, 1], [], []>} : vector<2x64xf32>, vector<64x256xf32>, vector<2x256xf32> -> vector<2x256xf32>
    %361 = vector.extract_strided_slice %5 {offsets = [12, 0], sizes = [2, 128], strides = [1, 1]} : vector<16x256xf32> to vector<2x128xf32>
    %362 = vector.extract_strided_slice %360 {offsets = [0, 0], sizes = [2, 128], strides = [1, 1]} : vector<2x256xf32> to vector<2x128xf32>
    %363 = arith.addf %361, %362 : vector<2x128xf32>
    %364 = vector.extract_strided_slice %5 {offsets = [2, 128], sizes = [2, 128], strides = [1, 1]} : vector<16x256xf32> to vector<2x128xf32>
    %365 = vector.extract_strided_slice %360 {offsets = [0, 128], sizes = [2, 128], strides = [1, 1]} : vector<2x256xf32> to vector<2x128xf32>
    %366 = arith.addf %364, %365 : vector<2x128xf32>
    %367 = vector.extract_strided_slice %363 {offsets = [0, 0], sizes = [2, 32], strides = [1, 1]} : vector<2x128xf32> to vector<2x32xf32>
    %368 = arith.negf %367 : vector<2x32xf32>
    %369 = math.exp %368 : vector<2x32xf32>
    %cst_54 = arith.constant 1.000000e+00 : f32
    %370 = vector.broadcast %cst_54 : f32 to vector<2x32xf32>
    %371 = arith.addf %370, %369 : vector<2x32xf32>
    %372 = arith.divf %370, %371 : vector<2x32xf32>
    %373 = vector.extract_strided_slice %363 {offsets = [0, 32], sizes = [2, 32], strides = [1, 1]} : vector<2x128xf32> to vector<2x32xf32>
    %374 = arith.negf %373 : vector<2x32xf32>
    %375 = math.exp %374 : vector<2x32xf32>
    %cst_55 = arith.constant 1.000000e+00 : f32
    %376 = vector.broadcast %cst_55 : f32 to vector<2x32xf32>
    %377 = arith.addf %376, %375 : vector<2x32xf32>
    %378 = arith.divf %376, %377 : vector<2x32xf32>
    %379 = vector.extract_strided_slice %363 {offsets = [0, 64], sizes = [2, 32], strides = [1, 1]} : vector<2x128xf32> to vector<2x32xf32>
    %380 = math.tanh %379 : vector<2x32xf32>
    %381 = vector.extract_strided_slice %363 {offsets = [0, 96], sizes = [2, 32], strides = [1, 1]} : vector<2x128xf32> to vector<2x32xf32>
    %382 = arith.negf %381 : vector<2x32xf32>
    %383 = math.exp %382 : vector<2x32xf32>
    %cst_56 = arith.constant 1.000000e+00 : f32
    %384 = vector.broadcast %cst_56 : f32 to vector<2x32xf32>
    %385 = arith.addf %384, %383 : vector<2x32xf32>
    %386 = arith.divf %384, %385 : vector<2x32xf32>
    %387 = arith.mulf %378, %331 : vector<2x32xf32>
    %388 = arith.mulf %372, %380 : vector<2x32xf32>
    %389 = arith.addf %387, %388 : vector<2x32xf32>
    %390 = math.tanh %389 : vector<2x32xf32>
    %391 = arith.mulf %386, %390 : vector<2x32xf32>
    %392 = vector.extract_strided_slice %366 {offsets = [0, 0], sizes = [2, 32], strides = [1, 1]} : vector<2x128xf32> to vector<2x32xf32>
    %393 = arith.negf %392 : vector<2x32xf32>
    %394 = math.exp %393 : vector<2x32xf32>
    %cst_57 = arith.constant 1.000000e+00 : f32
    %395 = vector.broadcast %cst_57 : f32 to vector<2x32xf32>
    %396 = arith.addf %395, %394 : vector<2x32xf32>
    %397 = arith.divf %395, %396 : vector<2x32xf32>
    %398 = vector.extract_strided_slice %366 {offsets = [0, 32], sizes = [2, 32], strides = [1, 1]} : vector<2x128xf32> to vector<2x32xf32>
    %399 = arith.negf %398 : vector<2x32xf32>
    %400 = math.exp %399 : vector<2x32xf32>
    %cst_58 = arith.constant 1.000000e+00 : f32
    %401 = vector.broadcast %cst_58 : f32 to vector<2x32xf32>
    %402 = arith.addf %401, %400 : vector<2x32xf32>
    %403 = arith.divf %401, %402 : vector<2x32xf32>
    %404 = vector.extract_strided_slice %366 {offsets = [0, 64], sizes = [2, 32], strides = [1, 1]} : vector<2x128xf32> to vector<2x32xf32>
    %405 = math.tanh %404 : vector<2x32xf32>
    %406 = vector.extract_strided_slice %366 {offsets = [0, 96], sizes = [2, 32], strides = [1, 1]} : vector<2x128xf32> to vector<2x32xf32>
    %407 = arith.negf %406 : vector<2x32xf32>
    %408 = math.exp %407 : vector<2x32xf32>
    %cst_59 = arith.constant 1.000000e+00 : f32
    %409 = vector.broadcast %cst_59 : f32 to vector<2x32xf32>
    %410 = arith.addf %409, %408 : vector<2x32xf32>
    %411 = arith.divf %409, %410 : vector<2x32xf32>
    %412 = arith.mulf %403, %356 : vector<2x32xf32>
    %413 = arith.mulf %397, %405 : vector<2x32xf32>
    %414 = arith.addf %412, %413 : vector<2x32xf32>
    %415 = math.tanh %414 : vector<2x32xf32>
    %416 = arith.mulf %411, %415 : vector<2x32xf32>
    %417 = tpu.concatenate %391, %416 in 1 : vector<2x32xf32>, vector<2x32xf32> -> vector<2x64xf32>
    %cst_60 = arith.constant dense<0.000000e+00> : vector<2x256xf32>
    %418 = tpu.matmul %417, %6, %cst_60 {dimension_numbers = #tpu.dot_dimension_numbers<[1], [0], [0], [1], [0, 0, 1, 1], [], []>} : vector<2x64xf32>, vector<64x256xf32>, vector<2x256xf32> -> vector<2x256xf32>
    %419 = vector.extract_strided_slice %5 {offsets = [14, 0], sizes = [2, 128], strides = [1, 1]} : vector<16x256xf32> to vector<2x128xf32>
    %420 = vector.extract_strided_slice %418 {offsets = [0, 0], sizes = [2, 128], strides = [1, 1]} : vector<2x256xf32> to vector<2x128xf32>
    %421 = arith.addf %419, %420 : vector<2x128xf32>
    %422 = vector.extract_strided_slice %5 {offsets = [0, 128], sizes = [2, 128], strides = [1, 1]} : vector<16x256xf32> to vector<2x128xf32>
    %423 = vector.extract_strided_slice %418 {offsets = [0, 128], sizes = [2, 128], strides = [1, 1]} : vector<2x256xf32> to vector<2x128xf32>
    %424 = arith.addf %422, %423 : vector<2x128xf32>
    %425 = vector.extract_strided_slice %421 {offsets = [0, 0], sizes = [2, 32], strides = [1, 1]} : vector<2x128xf32> to vector<2x32xf32>
    %426 = arith.negf %425 : vector<2x32xf32>
    %427 = math.exp %426 : vector<2x32xf32>
    %cst_61 = arith.constant 1.000000e+00 : f32
    %428 = vector.broadcast %cst_61 : f32 to vector<2x32xf32>
    %429 = arith.addf %428, %427 : vector<2x32xf32>
    %430 = arith.divf %428, %429 : vector<2x32xf32>
    %431 = vector.extract_strided_slice %421 {offsets = [0, 32], sizes = [2, 32], strides = [1, 1]} : vector<2x128xf32> to vector<2x32xf32>
    %432 = arith.negf %431 : vector<2x32xf32>
    %433 = math.exp %432 : vector<2x32xf32>
    %cst_62 = arith.constant 1.000000e+00 : f32
    %434 = vector.broadcast %cst_62 : f32 to vector<2x32xf32>
    %435 = arith.addf %434, %433 : vector<2x32xf32>
    %436 = arith.divf %434, %435 : vector<2x32xf32>
    %437 = vector.extract_strided_slice %421 {offsets = [0, 64], sizes = [2, 32], strides = [1, 1]} : vector<2x128xf32> to vector<2x32xf32>
    %438 = math.tanh %437 : vector<2x32xf32>
    %439 = vector.extract_strided_slice %421 {offsets = [0, 96], sizes = [2, 32], strides = [1, 1]} : vector<2x128xf32> to vector<2x32xf32>
    %440 = arith.negf %439 : vector<2x32xf32>
    %441 = math.exp %440 : vector<2x32xf32>
    %cst_63 = arith.constant 1.000000e+00 : f32
    %442 = vector.broadcast %cst_63 : f32 to vector<2x32xf32>
    %443 = arith.addf %442, %441 : vector<2x32xf32>
    %444 = arith.divf %442, %443 : vector<2x32xf32>
    %445 = arith.mulf %436, %389 : vector<2x32xf32>
    %446 = arith.mulf %430, %438 : vector<2x32xf32>
    %447 = arith.addf %445, %446 : vector<2x32xf32>
    %448 = math.tanh %447 : vector<2x32xf32>
    %449 = arith.mulf %444, %448 : vector<2x32xf32>
    %450 = vector.extract_strided_slice %424 {offsets = [0, 0], sizes = [2, 32], strides = [1, 1]} : vector<2x128xf32> to vector<2x32xf32>
    %451 = arith.negf %450 : vector<2x32xf32>
    %452 = math.exp %451 : vector<2x32xf32>
    %cst_64 = arith.constant 1.000000e+00 : f32
    %453 = vector.broadcast %cst_64 : f32 to vector<2x32xf32>
    %454 = arith.addf %453, %452 : vector<2x32xf32>
    %455 = arith.divf %453, %454 : vector<2x32xf32>
    %456 = vector.extract_strided_slice %424 {offsets = [0, 32], sizes = [2, 32], strides = [1, 1]} : vector<2x128xf32> to vector<2x32xf32>
    %457 = arith.negf %456 : vector<2x32xf32>
    %458 = math.exp %457 : vector<2x32xf32>
    %cst_65 = arith.constant 1.000000e+00 : f32
    %459 = vector.broadcast %cst_65 : f32 to vector<2x32xf32>
    %460 = arith.addf %459, %458 : vector<2x32xf32>
    %461 = arith.divf %459, %460 : vector<2x32xf32>
    %462 = vector.extract_strided_slice %424 {offsets = [0, 64], sizes = [2, 32], strides = [1, 1]} : vector<2x128xf32> to vector<2x32xf32>
    %463 = math.tanh %462 : vector<2x32xf32>
    %464 = vector.extract_strided_slice %424 {offsets = [0, 96], sizes = [2, 32], strides = [1, 1]} : vector<2x128xf32> to vector<2x32xf32>
    %465 = arith.negf %464 : vector<2x32xf32>
    %466 = math.exp %465 : vector<2x32xf32>
    %cst_66 = arith.constant 1.000000e+00 : f32
    %467 = vector.broadcast %cst_66 : f32 to vector<2x32xf32>
    %468 = arith.addf %467, %466 : vector<2x32xf32>
    %469 = arith.divf %467, %468 : vector<2x32xf32>
    %470 = arith.mulf %461, %414 : vector<2x32xf32>
    %471 = arith.mulf %455, %463 : vector<2x32xf32>
    %472 = arith.addf %470, %471 : vector<2x32xf32>
    %473 = math.tanh %472 : vector<2x32xf32>
    %474 = arith.mulf %469, %473 : vector<2x32xf32>
    %475 = tpu.concatenate %43, %474 in 1 : vector<2x32xf32>, vector<2x32xf32> -> vector<2x64xf32>
    %476 = tpu.concatenate %101, %416 in 1 : vector<2x32xf32>, vector<2x32xf32> -> vector<2x64xf32>
    %477 = tpu.concatenate %159, %358 in 1 : vector<2x32xf32>, vector<2x32xf32> -> vector<2x64xf32>
    %478 = tpu.concatenate %217, %300 in 1 : vector<2x32xf32>, vector<2x32xf32> -> vector<2x64xf32>
    %479 = tpu.concatenate %275, %242 in 1 : vector<2x32xf32>, vector<2x32xf32> -> vector<2x64xf32>
    %480 = tpu.concatenate %333, %184 in 1 : vector<2x32xf32>, vector<2x32xf32> -> vector<2x64xf32>
    %481 = tpu.concatenate %391, %126 in 1 : vector<2x32xf32>, vector<2x32xf32> -> vector<2x64xf32>
    %482 = tpu.concatenate %449, %68 in 1 : vector<2x32xf32>, vector<2x32xf32> -> vector<2x64xf32>
    %483 = tpu.concatenate %475, %476, %477, %478, %479, %480, %481, %482 in 0 : vector<2x64xf32>, vector<2x64xf32>, vector<2x64xf32>, vector<2x64xf32>, vector<2x64xf32>, vector<2x64xf32>, vector<2x64xf32>, vector<2x64xf32> -> vector<16x64xf32>
    %c0_67 = arith.constant 0 : index
    %c0_68 = arith.constant 0 : index
    %484 = vector.load %arg5[%c0_67, %c0_68] : memref<64x256xf32, #tpu.memory_space<vmem>>, vector<64x256xf32>
    %cst_69 = arith.constant dense<0.000000e+00> : vector<16x256xf32>
    %485 = tpu.matmul %483, %484, %cst_69 {dimension_numbers = #tpu.dot_dimension_numbers<[1], [0], [0], [1], [0, 0, 1, 1], [], []>} : vector<16x64xf32>, vector<64x256xf32>, vector<16x256xf32> -> vector<16x256xf32>
    %c0_70 = arith.constant 0 : index
    %c0_71 = arith.constant 0 : index
    %486 = vector.load %arg7[%c0_70, %c0_71] : memref<1x256xf32, #tpu.memory_space<vmem>>, vector<1x256xf32>
    %487 = vector.broadcast %486 : vector<1x256xf32> to vector<16x256xf32>
    %488 = arith.addf %485, %487 : vector<16x256xf32>
    %c0_72 = arith.constant 0 : index
    %c0_73 = arith.constant 0 : index
    %489 = vector.load %arg6[%c0_72, %c0_73] : memref<64x256xf32, #tpu.memory_space<vmem>>, vector<64x256xf32>
    %cst_74 = arith.constant 0.000000e+00 : f32
    %490 = vector.broadcast %cst_74 : f32 to vector<2x32xf32>
    %cst_75 = arith.constant 0.000000e+00 : f32
    %491 = vector.broadcast %cst_75 : f32 to vector<2x32xf32>
    %cst_76 = arith.constant 0.000000e+00 : f32
    %492 = vector.broadcast %cst_76 : f32 to vector<2x32xf32>
    %cst_77 = arith.constant 0.000000e+00 : f32
    %493 = vector.broadcast %cst_77 : f32 to vector<2x32xf32>
    %494 = tpu.concatenate %490, %492 in 1 : vector<2x32xf32>, vector<2x32xf32> -> vector<2x64xf32>
    %cst_78 = arith.constant dense<0.000000e+00> : vector<2x256xf32>
    %495 = tpu.matmul %494, %489, %cst_78 {dimension_numbers = #tpu.dot_dimension_numbers<[1], [0], [0], [1], [0, 0, 1, 1], [], []>} : vector<2x64xf32>, vector<64x256xf32>, vector<2x256xf32> -> vector<2x256xf32>
    %496 = vector.extract_strided_slice %488 {offsets = [0, 0], sizes = [2, 128], strides = [1, 1]} : vector<16x256xf32> to vector<2x128xf32>
    %497 = vector.extract_strided_slice %495 {offsets = [0, 0], sizes = [2, 128], strides = [1, 1]} : vector<2x256xf32> to vector<2x128xf32>
    %498 = arith.addf %496, %497 : vector<2x128xf32>
    %499 = vector.extract_strided_slice %488 {offsets = [14, 128], sizes = [2, 128], strides = [1, 1]} : vector<16x256xf32> to vector<2x128xf32>
    %500 = vector.extract_strided_slice %495 {offsets = [0, 128], sizes = [2, 128], strides = [1, 1]} : vector<2x256xf32> to vector<2x128xf32>
    %501 = arith.addf %499, %500 : vector<2x128xf32>
    %502 = vector.extract_strided_slice %498 {offsets = [0, 0], sizes = [2, 32], strides = [1, 1]} : vector<2x128xf32> to vector<2x32xf32>
    %503 = arith.negf %502 : vector<2x32xf32>
    %504 = math.exp %503 : vector<2x32xf32>
    %cst_79 = arith.constant 1.000000e+00 : f32
    %505 = vector.broadcast %cst_79 : f32 to vector<2x32xf32>
    %506 = arith.addf %505, %504 : vector<2x32xf32>
    %507 = arith.divf %505, %506 : vector<2x32xf32>
    %508 = vector.extract_strided_slice %498 {offsets = [0, 32], sizes = [2, 32], strides = [1, 1]} : vector<2x128xf32> to vector<2x32xf32>
    %509 = arith.negf %508 : vector<2x32xf32>
    %510 = math.exp %509 : vector<2x32xf32>
    %cst_80 = arith.constant 1.000000e+00 : f32
    %511 = vector.broadcast %cst_80 : f32 to vector<2x32xf32>
    %512 = arith.addf %511, %510 : vector<2x32xf32>
    %513 = arith.divf %511, %512 : vector<2x32xf32>
    %514 = vector.extract_strided_slice %498 {offsets = [0, 64], sizes = [2, 32], strides = [1, 1]} : vector<2x128xf32> to vector<2x32xf32>
    %515 = math.tanh %514 : vector<2x32xf32>
    %516 = vector.extract_strided_slice %498 {offsets = [0, 96], sizes = [2, 32], strides = [1, 1]} : vector<2x128xf32> to vector<2x32xf32>
    %517 = arith.negf %516 : vector<2x32xf32>
    %518 = math.exp %517 : vector<2x32xf32>
    %cst_81 = arith.constant 1.000000e+00 : f32
    %519 = vector.broadcast %cst_81 : f32 to vector<2x32xf32>
    %520 = arith.addf %519, %518 : vector<2x32xf32>
    %521 = arith.divf %519, %520 : vector<2x32xf32>
    %522 = arith.mulf %513, %491 : vector<2x32xf32>
    %523 = arith.mulf %507, %515 : vector<2x32xf32>
    %524 = arith.addf %522, %523 : vector<2x32xf32>
    %525 = math.tanh %524 : vector<2x32xf32>
    %526 = arith.mulf %521, %525 : vector<2x32xf32>
    %527 = vector.extract_strided_slice %501 {offsets = [0, 0], sizes = [2, 32], strides = [1, 1]} : vector<2x128xf32> to vector<2x32xf32>
    %528 = arith.negf %527 : vector<2x32xf32>
    %529 = math.exp %528 : vector<2x32xf32>
    %cst_82 = arith.constant 1.000000e+00 : f32
    %530 = vector.broadcast %cst_82 : f32 to vector<2x32xf32>
    %531 = arith.addf %530, %529 : vector<2x32xf32>
    %532 = arith.divf %530, %531 : vector<2x32xf32>
    %533 = vector.extract_strided_slice %501 {offsets = [0, 32], sizes = [2, 32], strides = [1, 1]} : vector<2x128xf32> to vector<2x32xf32>
    %534 = arith.negf %533 : vector<2x32xf32>
    %535 = math.exp %534 : vector<2x32xf32>
    %cst_83 = arith.constant 1.000000e+00 : f32
    %536 = vector.broadcast %cst_83 : f32 to vector<2x32xf32>
    %537 = arith.addf %536, %535 : vector<2x32xf32>
    %538 = arith.divf %536, %537 : vector<2x32xf32>
    %539 = vector.extract_strided_slice %501 {offsets = [0, 64], sizes = [2, 32], strides = [1, 1]} : vector<2x128xf32> to vector<2x32xf32>
    %540 = math.tanh %539 : vector<2x32xf32>
    %541 = vector.extract_strided_slice %501 {offsets = [0, 96], sizes = [2, 32], strides = [1, 1]} : vector<2x128xf32> to vector<2x32xf32>
    %542 = arith.negf %541 : vector<2x32xf32>
    %543 = math.exp %542 : vector<2x32xf32>
    %cst_84 = arith.constant 1.000000e+00 : f32
    %544 = vector.broadcast %cst_84 : f32 to vector<2x32xf32>
    %545 = arith.addf %544, %543 : vector<2x32xf32>
    %546 = arith.divf %544, %545 : vector<2x32xf32>
    %547 = arith.mulf %538, %493 : vector<2x32xf32>
    %548 = arith.mulf %532, %540 : vector<2x32xf32>
    %549 = arith.addf %547, %548 : vector<2x32xf32>
    %550 = math.tanh %549 : vector<2x32xf32>
    %551 = arith.mulf %546, %550 : vector<2x32xf32>
    %552 = tpu.concatenate %526, %551 in 1 : vector<2x32xf32>, vector<2x32xf32> -> vector<2x64xf32>
    %cst_85 = arith.constant dense<0.000000e+00> : vector<2x256xf32>
    %553 = tpu.matmul %552, %489, %cst_85 {dimension_numbers = #tpu.dot_dimension_numbers<[1], [0], [0], [1], [0, 0, 1, 1], [], []>} : vector<2x64xf32>, vector<64x256xf32>, vector<2x256xf32> -> vector<2x256xf32>
    %554 = vector.extract_strided_slice %488 {offsets = [2, 0], sizes = [2, 128], strides = [1, 1]} : vector<16x256xf32> to vector<2x128xf32>
    %555 = vector.extract_strided_slice %553 {offsets = [0, 0], sizes = [2, 128], strides = [1, 1]} : vector<2x256xf32> to vector<2x128xf32>
    %556 = arith.addf %554, %555 : vector<2x128xf32>
    %557 = vector.extract_strided_slice %488 {offsets = [12, 128], sizes = [2, 128], strides = [1, 1]} : vector<16x256xf32> to vector<2x128xf32>
    %558 = vector.extract_strided_slice %553 {offsets = [0, 128], sizes = [2, 128], strides = [1, 1]} : vector<2x256xf32> to vector<2x128xf32>
    %559 = arith.addf %557, %558 : vector<2x128xf32>
    %560 = vector.extract_strided_slice %556 {offsets = [0, 0], sizes = [2, 32], strides = [1, 1]} : vector<2x128xf32> to vector<2x32xf32>
    %561 = arith.negf %560 : vector<2x32xf32>
    %562 = math.exp %561 : vector<2x32xf32>
    %cst_86 = arith.constant 1.000000e+00 : f32
    %563 = vector.broadcast %cst_86 : f32 to vector<2x32xf32>
    %564 = arith.addf %563, %562 : vector<2x32xf32>
    %565 = arith.divf %563, %564 : vector<2x32xf32>
    %566 = vector.extract_strided_slice %556 {offsets = [0, 32], sizes = [2, 32], strides = [1, 1]} : vector<2x128xf32> to vector<2x32xf32>
    %567 = arith.negf %566 : vector<2x32xf32>
    %568 = math.exp %567 : vector<2x32xf32>
    %cst_87 = arith.constant 1.000000e+00 : f32
    %569 = vector.broadcast %cst_87 : f32 to vector<2x32xf32>
    %570 = arith.addf %569, %568 : vector<2x32xf32>
    %571 = arith.divf %569, %570 : vector<2x32xf32>
    %572 = vector.extract_strided_slice %556 {offsets = [0, 64], sizes = [2, 32], strides = [1, 1]} : vector<2x128xf32> to vector<2x32xf32>
    %573 = math.tanh %572 : vector<2x32xf32>
    %574 = vector.extract_strided_slice %556 {offsets = [0, 96], sizes = [2, 32], strides = [1, 1]} : vector<2x128xf32> to vector<2x32xf32>
    %575 = arith.negf %574 : vector<2x32xf32>
    %576 = math.exp %575 : vector<2x32xf32>
    %cst_88 = arith.constant 1.000000e+00 : f32
    %577 = vector.broadcast %cst_88 : f32 to vector<2x32xf32>
    %578 = arith.addf %577, %576 : vector<2x32xf32>
    %579 = arith.divf %577, %578 : vector<2x32xf32>
    %580 = arith.mulf %571, %524 : vector<2x32xf32>
    %581 = arith.mulf %565, %573 : vector<2x32xf32>
    %582 = arith.addf %580, %581 : vector<2x32xf32>
    %583 = math.tanh %582 : vector<2x32xf32>
    %584 = arith.mulf %579, %583 : vector<2x32xf32>
    %585 = vector.extract_strided_slice %559 {offsets = [0, 0], sizes = [2, 32], strides = [1, 1]} : vector<2x128xf32> to vector<2x32xf32>
    %586 = arith.negf %585 : vector<2x32xf32>
    %587 = math.exp %586 : vector<2x32xf32>
    %cst_89 = arith.constant 1.000000e+00 : f32
    %588 = vector.broadcast %cst_89 : f32 to vector<2x32xf32>
    %589 = arith.addf %588, %587 : vector<2x32xf32>
    %590 = arith.divf %588, %589 : vector<2x32xf32>
    %591 = vector.extract_strided_slice %559 {offsets = [0, 32], sizes = [2, 32], strides = [1, 1]} : vector<2x128xf32> to vector<2x32xf32>
    %592 = arith.negf %591 : vector<2x32xf32>
    %593 = math.exp %592 : vector<2x32xf32>
    %cst_90 = arith.constant 1.000000e+00 : f32
    %594 = vector.broadcast %cst_90 : f32 to vector<2x32xf32>
    %595 = arith.addf %594, %593 : vector<2x32xf32>
    %596 = arith.divf %594, %595 : vector<2x32xf32>
    %597 = vector.extract_strided_slice %559 {offsets = [0, 64], sizes = [2, 32], strides = [1, 1]} : vector<2x128xf32> to vector<2x32xf32>
    %598 = math.tanh %597 : vector<2x32xf32>
    %599 = vector.extract_strided_slice %559 {offsets = [0, 96], sizes = [2, 32], strides = [1, 1]} : vector<2x128xf32> to vector<2x32xf32>
    %600 = arith.negf %599 : vector<2x32xf32>
    %601 = math.exp %600 : vector<2x32xf32>
    %cst_91 = arith.constant 1.000000e+00 : f32
    %602 = vector.broadcast %cst_91 : f32 to vector<2x32xf32>
    %603 = arith.addf %602, %601 : vector<2x32xf32>
    %604 = arith.divf %602, %603 : vector<2x32xf32>
    %605 = arith.mulf %596, %549 : vector<2x32xf32>
    %606 = arith.mulf %590, %598 : vector<2x32xf32>
    %607 = arith.addf %605, %606 : vector<2x32xf32>
    %608 = math.tanh %607 : vector<2x32xf32>
    %609 = arith.mulf %604, %608 : vector<2x32xf32>
    %610 = tpu.concatenate %584, %609 in 1 : vector<2x32xf32>, vector<2x32xf32> -> vector<2x64xf32>
    %cst_92 = arith.constant dense<0.000000e+00> : vector<2x256xf32>
    %611 = tpu.matmul %610, %489, %cst_92 {dimension_numbers = #tpu.dot_dimension_numbers<[1], [0], [0], [1], [0, 0, 1, 1], [], []>} : vector<2x64xf32>, vector<64x256xf32>, vector<2x256xf32> -> vector<2x256xf32>
    %612 = vector.extract_strided_slice %488 {offsets = [4, 0], sizes = [2, 128], strides = [1, 1]} : vector<16x256xf32> to vector<2x128xf32>
    %613 = vector.extract_strided_slice %611 {offsets = [0, 0], sizes = [2, 128], strides = [1, 1]} : vector<2x256xf32> to vector<2x128xf32>
    %614 = arith.addf %612, %613 : vector<2x128xf32>
    %615 = vector.extract_strided_slice %488 {offsets = [10, 128], sizes = [2, 128], strides = [1, 1]} : vector<16x256xf32> to vector<2x128xf32>
    %616 = vector.extract_strided_slice %611 {offsets = [0, 128], sizes = [2, 128], strides = [1, 1]} : vector<2x256xf32> to vector<2x128xf32>
    %617 = arith.addf %615, %616 : vector<2x128xf32>
    %618 = vector.extract_strided_slice %614 {offsets = [0, 0], sizes = [2, 32], strides = [1, 1]} : vector<2x128xf32> to vector<2x32xf32>
    %619 = arith.negf %618 : vector<2x32xf32>
    %620 = math.exp %619 : vector<2x32xf32>
    %cst_93 = arith.constant 1.000000e+00 : f32
    %621 = vector.broadcast %cst_93 : f32 to vector<2x32xf32>
    %622 = arith.addf %621, %620 : vector<2x32xf32>
    %623 = arith.divf %621, %622 : vector<2x32xf32>
    %624 = vector.extract_strided_slice %614 {offsets = [0, 32], sizes = [2, 32], strides = [1, 1]} : vector<2x128xf32> to vector<2x32xf32>
    %625 = arith.negf %624 : vector<2x32xf32>
    %626 = math.exp %625 : vector<2x32xf32>
    %cst_94 = arith.constant 1.000000e+00 : f32
    %627 = vector.broadcast %cst_94 : f32 to vector<2x32xf32>
    %628 = arith.addf %627, %626 : vector<2x32xf32>
    %629 = arith.divf %627, %628 : vector<2x32xf32>
    %630 = vector.extract_strided_slice %614 {offsets = [0, 64], sizes = [2, 32], strides = [1, 1]} : vector<2x128xf32> to vector<2x32xf32>
    %631 = math.tanh %630 : vector<2x32xf32>
    %632 = vector.extract_strided_slice %614 {offsets = [0, 96], sizes = [2, 32], strides = [1, 1]} : vector<2x128xf32> to vector<2x32xf32>
    %633 = arith.negf %632 : vector<2x32xf32>
    %634 = math.exp %633 : vector<2x32xf32>
    %cst_95 = arith.constant 1.000000e+00 : f32
    %635 = vector.broadcast %cst_95 : f32 to vector<2x32xf32>
    %636 = arith.addf %635, %634 : vector<2x32xf32>
    %637 = arith.divf %635, %636 : vector<2x32xf32>
    %638 = arith.mulf %629, %582 : vector<2x32xf32>
    %639 = arith.mulf %623, %631 : vector<2x32xf32>
    %640 = arith.addf %638, %639 : vector<2x32xf32>
    %641 = math.tanh %640 : vector<2x32xf32>
    %642 = arith.mulf %637, %641 : vector<2x32xf32>
    %643 = vector.extract_strided_slice %617 {offsets = [0, 0], sizes = [2, 32], strides = [1, 1]} : vector<2x128xf32> to vector<2x32xf32>
    %644 = arith.negf %643 : vector<2x32xf32>
    %645 = math.exp %644 : vector<2x32xf32>
    %cst_96 = arith.constant 1.000000e+00 : f32
    %646 = vector.broadcast %cst_96 : f32 to vector<2x32xf32>
    %647 = arith.addf %646, %645 : vector<2x32xf32>
    %648 = arith.divf %646, %647 : vector<2x32xf32>
    %649 = vector.extract_strided_slice %617 {offsets = [0, 32], sizes = [2, 32], strides = [1, 1]} : vector<2x128xf32> to vector<2x32xf32>
    %650 = arith.negf %649 : vector<2x32xf32>
    %651 = math.exp %650 : vector<2x32xf32>
    %cst_97 = arith.constant 1.000000e+00 : f32
    %652 = vector.broadcast %cst_97 : f32 to vector<2x32xf32>
    %653 = arith.addf %652, %651 : vector<2x32xf32>
    %654 = arith.divf %652, %653 : vector<2x32xf32>
    %655 = vector.extract_strided_slice %617 {offsets = [0, 64], sizes = [2, 32], strides = [1, 1]} : vector<2x128xf32> to vector<2x32xf32>
    %656 = math.tanh %655 : vector<2x32xf32>
    %657 = vector.extract_strided_slice %617 {offsets = [0, 96], sizes = [2, 32], strides = [1, 1]} : vector<2x128xf32> to vector<2x32xf32>
    %658 = arith.negf %657 : vector<2x32xf32>
    %659 = math.exp %658 : vector<2x32xf32>
    %cst_98 = arith.constant 1.000000e+00 : f32
    %660 = vector.broadcast %cst_98 : f32 to vector<2x32xf32>
    %661 = arith.addf %660, %659 : vector<2x32xf32>
    %662 = arith.divf %660, %661 : vector<2x32xf32>
    %663 = arith.mulf %654, %607 : vector<2x32xf32>
    %664 = arith.mulf %648, %656 : vector<2x32xf32>
    %665 = arith.addf %663, %664 : vector<2x32xf32>
    %666 = math.tanh %665 : vector<2x32xf32>
    %667 = arith.mulf %662, %666 : vector<2x32xf32>
    %668 = tpu.concatenate %642, %667 in 1 : vector<2x32xf32>, vector<2x32xf32> -> vector<2x64xf32>
    %cst_99 = arith.constant dense<0.000000e+00> : vector<2x256xf32>
    %669 = tpu.matmul %668, %489, %cst_99 {dimension_numbers = #tpu.dot_dimension_numbers<[1], [0], [0], [1], [0, 0, 1, 1], [], []>} : vector<2x64xf32>, vector<64x256xf32>, vector<2x256xf32> -> vector<2x256xf32>
    %670 = vector.extract_strided_slice %488 {offsets = [6, 0], sizes = [2, 128], strides = [1, 1]} : vector<16x256xf32> to vector<2x128xf32>
    %671 = vector.extract_strided_slice %669 {offsets = [0, 0], sizes = [2, 128], strides = [1, 1]} : vector<2x256xf32> to vector<2x128xf32>
    %672 = arith.addf %670, %671 : vector<2x128xf32>
    %673 = vector.extract_strided_slice %488 {offsets = [8, 128], sizes = [2, 128], strides = [1, 1]} : vector<16x256xf32> to vector<2x128xf32>
    %674 = vector.extract_strided_slice %669 {offsets = [0, 128], sizes = [2, 128], strides = [1, 1]} : vector<2x256xf32> to vector<2x128xf32>
    %675 = arith.addf %673, %674 : vector<2x128xf32>
    %676 = vector.extract_strided_slice %672 {offsets = [0, 0], sizes = [2, 32], strides = [1, 1]} : vector<2x128xf32> to vector<2x32xf32>
    %677 = arith.negf %676 : vector<2x32xf32>
    %678 = math.exp %677 : vector<2x32xf32>
    %cst_100 = arith.constant 1.000000e+00 : f32
    %679 = vector.broadcast %cst_100 : f32 to vector<2x32xf32>
    %680 = arith.addf %679, %678 : vector<2x32xf32>
    %681 = arith.divf %679, %680 : vector<2x32xf32>
    %682 = vector.extract_strided_slice %672 {offsets = [0, 32], sizes = [2, 32], strides = [1, 1]} : vector<2x128xf32> to vector<2x32xf32>
    %683 = arith.negf %682 : vector<2x32xf32>
    %684 = math.exp %683 : vector<2x32xf32>
    %cst_101 = arith.constant 1.000000e+00 : f32
    %685 = vector.broadcast %cst_101 : f32 to vector<2x32xf32>
    %686 = arith.addf %685, %684 : vector<2x32xf32>
    %687 = arith.divf %685, %686 : vector<2x32xf32>
    %688 = vector.extract_strided_slice %672 {offsets = [0, 64], sizes = [2, 32], strides = [1, 1]} : vector<2x128xf32> to vector<2x32xf32>
    %689 = math.tanh %688 : vector<2x32xf32>
    %690 = vector.extract_strided_slice %672 {offsets = [0, 96], sizes = [2, 32], strides = [1, 1]} : vector<2x128xf32> to vector<2x32xf32>
    %691 = arith.negf %690 : vector<2x32xf32>
    %692 = math.exp %691 : vector<2x32xf32>
    %cst_102 = arith.constant 1.000000e+00 : f32
    %693 = vector.broadcast %cst_102 : f32 to vector<2x32xf32>
    %694 = arith.addf %693, %692 : vector<2x32xf32>
    %695 = arith.divf %693, %694 : vector<2x32xf32>
    %696 = arith.mulf %687, %640 : vector<2x32xf32>
    %697 = arith.mulf %681, %689 : vector<2x32xf32>
    %698 = arith.addf %696, %697 : vector<2x32xf32>
    %699 = math.tanh %698 : vector<2x32xf32>
    %700 = arith.mulf %695, %699 : vector<2x32xf32>
    %701 = vector.extract_strided_slice %675 {offsets = [0, 0], sizes = [2, 32], strides = [1, 1]} : vector<2x128xf32> to vector<2x32xf32>
    %702 = arith.negf %701 : vector<2x32xf32>
    %703 = math.exp %702 : vector<2x32xf32>
    %cst_103 = arith.constant 1.000000e+00 : f32
    %704 = vector.broadcast %cst_103 : f32 to vector<2x32xf32>
    %705 = arith.addf %704, %703 : vector<2x32xf32>
    %706 = arith.divf %704, %705 : vector<2x32xf32>
    %707 = vector.extract_strided_slice %675 {offsets = [0, 32], sizes = [2, 32], strides = [1, 1]} : vector<2x128xf32> to vector<2x32xf32>
    %708 = arith.negf %707 : vector<2x32xf32>
    %709 = math.exp %708 : vector<2x32xf32>
    %cst_104 = arith.constant 1.000000e+00 : f32
    %710 = vector.broadcast %cst_104 : f32 to vector<2x32xf32>
    %711 = arith.addf %710, %709 : vector<2x32xf32>
    %712 = arith.divf %710, %711 : vector<2x32xf32>
    %713 = vector.extract_strided_slice %675 {offsets = [0, 64], sizes = [2, 32], strides = [1, 1]} : vector<2x128xf32> to vector<2x32xf32>
    %714 = math.tanh %713 : vector<2x32xf32>
    %715 = vector.extract_strided_slice %675 {offsets = [0, 96], sizes = [2, 32], strides = [1, 1]} : vector<2x128xf32> to vector<2x32xf32>
    %716 = arith.negf %715 : vector<2x32xf32>
    %717 = math.exp %716 : vector<2x32xf32>
    %cst_105 = arith.constant 1.000000e+00 : f32
    %718 = vector.broadcast %cst_105 : f32 to vector<2x32xf32>
    %719 = arith.addf %718, %717 : vector<2x32xf32>
    %720 = arith.divf %718, %719 : vector<2x32xf32>
    %721 = arith.mulf %712, %665 : vector<2x32xf32>
    %722 = arith.mulf %706, %714 : vector<2x32xf32>
    %723 = arith.addf %721, %722 : vector<2x32xf32>
    %724 = math.tanh %723 : vector<2x32xf32>
    %725 = arith.mulf %720, %724 : vector<2x32xf32>
    %726 = tpu.concatenate %700, %725 in 1 : vector<2x32xf32>, vector<2x32xf32> -> vector<2x64xf32>
    %cst_106 = arith.constant dense<0.000000e+00> : vector<2x256xf32>
    %727 = tpu.matmul %726, %489, %cst_106 {dimension_numbers = #tpu.dot_dimension_numbers<[1], [0], [0], [1], [0, 0, 1, 1], [], []>} : vector<2x64xf32>, vector<64x256xf32>, vector<2x256xf32> -> vector<2x256xf32>
    %728 = vector.extract_strided_slice %488 {offsets = [8, 0], sizes = [2, 128], strides = [1, 1]} : vector<16x256xf32> to vector<2x128xf32>
    %729 = vector.extract_strided_slice %727 {offsets = [0, 0], sizes = [2, 128], strides = [1, 1]} : vector<2x256xf32> to vector<2x128xf32>
    %730 = arith.addf %728, %729 : vector<2x128xf32>
    %731 = vector.extract_strided_slice %488 {offsets = [6, 128], sizes = [2, 128], strides = [1, 1]} : vector<16x256xf32> to vector<2x128xf32>
    %732 = vector.extract_strided_slice %727 {offsets = [0, 128], sizes = [2, 128], strides = [1, 1]} : vector<2x256xf32> to vector<2x128xf32>
    %733 = arith.addf %731, %732 : vector<2x128xf32>
    %734 = vector.extract_strided_slice %730 {offsets = [0, 0], sizes = [2, 32], strides = [1, 1]} : vector<2x128xf32> to vector<2x32xf32>
    %735 = arith.negf %734 : vector<2x32xf32>
    %736 = math.exp %735 : vector<2x32xf32>
    %cst_107 = arith.constant 1.000000e+00 : f32
    %737 = vector.broadcast %cst_107 : f32 to vector<2x32xf32>
    %738 = arith.addf %737, %736 : vector<2x32xf32>
    %739 = arith.divf %737, %738 : vector<2x32xf32>
    %740 = vector.extract_strided_slice %730 {offsets = [0, 32], sizes = [2, 32], strides = [1, 1]} : vector<2x128xf32> to vector<2x32xf32>
    %741 = arith.negf %740 : vector<2x32xf32>
    %742 = math.exp %741 : vector<2x32xf32>
    %cst_108 = arith.constant 1.000000e+00 : f32
    %743 = vector.broadcast %cst_108 : f32 to vector<2x32xf32>
    %744 = arith.addf %743, %742 : vector<2x32xf32>
    %745 = arith.divf %743, %744 : vector<2x32xf32>
    %746 = vector.extract_strided_slice %730 {offsets = [0, 64], sizes = [2, 32], strides = [1, 1]} : vector<2x128xf32> to vector<2x32xf32>
    %747 = math.tanh %746 : vector<2x32xf32>
    %748 = vector.extract_strided_slice %730 {offsets = [0, 96], sizes = [2, 32], strides = [1, 1]} : vector<2x128xf32> to vector<2x32xf32>
    %749 = arith.negf %748 : vector<2x32xf32>
    %750 = math.exp %749 : vector<2x32xf32>
    %cst_109 = arith.constant 1.000000e+00 : f32
    %751 = vector.broadcast %cst_109 : f32 to vector<2x32xf32>
    %752 = arith.addf %751, %750 : vector<2x32xf32>
    %753 = arith.divf %751, %752 : vector<2x32xf32>
    %754 = arith.mulf %745, %698 : vector<2x32xf32>
    %755 = arith.mulf %739, %747 : vector<2x32xf32>
    %756 = arith.addf %754, %755 : vector<2x32xf32>
    %757 = math.tanh %756 : vector<2x32xf32>
    %758 = arith.mulf %753, %757 : vector<2x32xf32>
    %759 = vector.extract_strided_slice %733 {offsets = [0, 0], sizes = [2, 32], strides = [1, 1]} : vector<2x128xf32> to vector<2x32xf32>
    %760 = arith.negf %759 : vector<2x32xf32>
    %761 = math.exp %760 : vector<2x32xf32>
    %cst_110 = arith.constant 1.000000e+00 : f32
    %762 = vector.broadcast %cst_110 : f32 to vector<2x32xf32>
    %763 = arith.addf %762, %761 : vector<2x32xf32>
    %764 = arith.divf %762, %763 : vector<2x32xf32>
    %765 = vector.extract_strided_slice %733 {offsets = [0, 32], sizes = [2, 32], strides = [1, 1]} : vector<2x128xf32> to vector<2x32xf32>
    %766 = arith.negf %765 : vector<2x32xf32>
    %767 = math.exp %766 : vector<2x32xf32>
    %cst_111 = arith.constant 1.000000e+00 : f32
    %768 = vector.broadcast %cst_111 : f32 to vector<2x32xf32>
    %769 = arith.addf %768, %767 : vector<2x32xf32>
    %770 = arith.divf %768, %769 : vector<2x32xf32>
    %771 = vector.extract_strided_slice %733 {offsets = [0, 64], sizes = [2, 32], strides = [1, 1]} : vector<2x128xf32> to vector<2x32xf32>
    %772 = math.tanh %771 : vector<2x32xf32>
    %773 = vector.extract_strided_slice %733 {offsets = [0, 96], sizes = [2, 32], strides = [1, 1]} : vector<2x128xf32> to vector<2x32xf32>
    %774 = arith.negf %773 : vector<2x32xf32>
    %775 = math.exp %774 : vector<2x32xf32>
    %cst_112 = arith.constant 1.000000e+00 : f32
    %776 = vector.broadcast %cst_112 : f32 to vector<2x32xf32>
    %777 = arith.addf %776, %775 : vector<2x32xf32>
    %778 = arith.divf %776, %777 : vector<2x32xf32>
    %779 = arith.mulf %770, %723 : vector<2x32xf32>
    %780 = arith.mulf %764, %772 : vector<2x32xf32>
    %781 = arith.addf %779, %780 : vector<2x32xf32>
    %782 = math.tanh %781 : vector<2x32xf32>
    %783 = arith.mulf %778, %782 : vector<2x32xf32>
    %784 = tpu.concatenate %758, %783 in 1 : vector<2x32xf32>, vector<2x32xf32> -> vector<2x64xf32>
    %cst_113 = arith.constant dense<0.000000e+00> : vector<2x256xf32>
    %785 = tpu.matmul %784, %489, %cst_113 {dimension_numbers = #tpu.dot_dimension_numbers<[1], [0], [0], [1], [0, 0, 1, 1], [], []>} : vector<2x64xf32>, vector<64x256xf32>, vector<2x256xf32> -> vector<2x256xf32>
    %786 = vector.extract_strided_slice %488 {offsets = [10, 0], sizes = [2, 128], strides = [1, 1]} : vector<16x256xf32> to vector<2x128xf32>
    %787 = vector.extract_strided_slice %785 {offsets = [0, 0], sizes = [2, 128], strides = [1, 1]} : vector<2x256xf32> to vector<2x128xf32>
    %788 = arith.addf %786, %787 : vector<2x128xf32>
    %789 = vector.extract_strided_slice %488 {offsets = [4, 128], sizes = [2, 128], strides = [1, 1]} : vector<16x256xf32> to vector<2x128xf32>
    %790 = vector.extract_strided_slice %785 {offsets = [0, 128], sizes = [2, 128], strides = [1, 1]} : vector<2x256xf32> to vector<2x128xf32>
    %791 = arith.addf %789, %790 : vector<2x128xf32>
    %792 = vector.extract_strided_slice %788 {offsets = [0, 0], sizes = [2, 32], strides = [1, 1]} : vector<2x128xf32> to vector<2x32xf32>
    %793 = arith.negf %792 : vector<2x32xf32>
    %794 = math.exp %793 : vector<2x32xf32>
    %cst_114 = arith.constant 1.000000e+00 : f32
    %795 = vector.broadcast %cst_114 : f32 to vector<2x32xf32>
    %796 = arith.addf %795, %794 : vector<2x32xf32>
    %797 = arith.divf %795, %796 : vector<2x32xf32>
    %798 = vector.extract_strided_slice %788 {offsets = [0, 32], sizes = [2, 32], strides = [1, 1]} : vector<2x128xf32> to vector<2x32xf32>
    %799 = arith.negf %798 : vector<2x32xf32>
    %800 = math.exp %799 : vector<2x32xf32>
    %cst_115 = arith.constant 1.000000e+00 : f32
    %801 = vector.broadcast %cst_115 : f32 to vector<2x32xf32>
    %802 = arith.addf %801, %800 : vector<2x32xf32>
    %803 = arith.divf %801, %802 : vector<2x32xf32>
    %804 = vector.extract_strided_slice %788 {offsets = [0, 64], sizes = [2, 32], strides = [1, 1]} : vector<2x128xf32> to vector<2x32xf32>
    %805 = math.tanh %804 : vector<2x32xf32>
    %806 = vector.extract_strided_slice %788 {offsets = [0, 96], sizes = [2, 32], strides = [1, 1]} : vector<2x128xf32> to vector<2x32xf32>
    %807 = arith.negf %806 : vector<2x32xf32>
    %808 = math.exp %807 : vector<2x32xf32>
    %cst_116 = arith.constant 1.000000e+00 : f32
    %809 = vector.broadcast %cst_116 : f32 to vector<2x32xf32>
    %810 = arith.addf %809, %808 : vector<2x32xf32>
    %811 = arith.divf %809, %810 : vector<2x32xf32>
    %812 = arith.mulf %803, %756 : vector<2x32xf32>
    %813 = arith.mulf %797, %805 : vector<2x32xf32>
    %814 = arith.addf %812, %813 : vector<2x32xf32>
    %815 = math.tanh %814 : vector<2x32xf32>
    %816 = arith.mulf %811, %815 : vector<2x32xf32>
    %817 = vector.extract_strided_slice %791 {offsets = [0, 0], sizes = [2, 32], strides = [1, 1]} : vector<2x128xf32> to vector<2x32xf32>
    %818 = arith.negf %817 : vector<2x32xf32>
    %819 = math.exp %818 : vector<2x32xf32>
    %cst_117 = arith.constant 1.000000e+00 : f32
    %820 = vector.broadcast %cst_117 : f32 to vector<2x32xf32>
    %821 = arith.addf %820, %819 : vector<2x32xf32>
    %822 = arith.divf %820, %821 : vector<2x32xf32>
    %823 = vector.extract_strided_slice %791 {offsets = [0, 32], sizes = [2, 32], strides = [1, 1]} : vector<2x128xf32> to vector<2x32xf32>
    %824 = arith.negf %823 : vector<2x32xf32>
    %825 = math.exp %824 : vector<2x32xf32>
    %cst_118 = arith.constant 1.000000e+00 : f32
    %826 = vector.broadcast %cst_118 : f32 to vector<2x32xf32>
    %827 = arith.addf %826, %825 : vector<2x32xf32>
    %828 = arith.divf %826, %827 : vector<2x32xf32>
    %829 = vector.extract_strided_slice %791 {offsets = [0, 64], sizes = [2, 32], strides = [1, 1]} : vector<2x128xf32> to vector<2x32xf32>
    %830 = math.tanh %829 : vector<2x32xf32>
    %831 = vector.extract_strided_slice %791 {offsets = [0, 96], sizes = [2, 32], strides = [1, 1]} : vector<2x128xf32> to vector<2x32xf32>
    %832 = arith.negf %831 : vector<2x32xf32>
    %833 = math.exp %832 : vector<2x32xf32>
    %cst_119 = arith.constant 1.000000e+00 : f32
    %834 = vector.broadcast %cst_119 : f32 to vector<2x32xf32>
    %835 = arith.addf %834, %833 : vector<2x32xf32>
    %836 = arith.divf %834, %835 : vector<2x32xf32>
    %837 = arith.mulf %828, %781 : vector<2x32xf32>
    %838 = arith.mulf %822, %830 : vector<2x32xf32>
    %839 = arith.addf %837, %838 : vector<2x32xf32>
    %840 = math.tanh %839 : vector<2x32xf32>
    %841 = arith.mulf %836, %840 : vector<2x32xf32>
    %842 = tpu.concatenate %816, %841 in 1 : vector<2x32xf32>, vector<2x32xf32> -> vector<2x64xf32>
    %cst_120 = arith.constant dense<0.000000e+00> : vector<2x256xf32>
    %843 = tpu.matmul %842, %489, %cst_120 {dimension_numbers = #tpu.dot_dimension_numbers<[1], [0], [0], [1], [0, 0, 1, 1], [], []>} : vector<2x64xf32>, vector<64x256xf32>, vector<2x256xf32> -> vector<2x256xf32>
    %844 = vector.extract_strided_slice %488 {offsets = [12, 0], sizes = [2, 128], strides = [1, 1]} : vector<16x256xf32> to vector<2x128xf32>
    %845 = vector.extract_strided_slice %843 {offsets = [0, 0], sizes = [2, 128], strides = [1, 1]} : vector<2x256xf32> to vector<2x128xf32>
    %846 = arith.addf %844, %845 : vector<2x128xf32>
    %847 = vector.extract_strided_slice %488 {offsets = [2, 128], sizes = [2, 128], strides = [1, 1]} : vector<16x256xf32> to vector<2x128xf32>
    %848 = vector.extract_strided_slice %843 {offsets = [0, 128], sizes = [2, 128], strides = [1, 1]} : vector<2x256xf32> to vector<2x128xf32>
    %849 = arith.addf %847, %848 : vector<2x128xf32>
    %850 = vector.extract_strided_slice %846 {offsets = [0, 0], sizes = [2, 32], strides = [1, 1]} : vector<2x128xf32> to vector<2x32xf32>
    %851 = arith.negf %850 : vector<2x32xf32>
    %852 = math.exp %851 : vector<2x32xf32>
    %cst_121 = arith.constant 1.000000e+00 : f32
    %853 = vector.broadcast %cst_121 : f32 to vector<2x32xf32>
    %854 = arith.addf %853, %852 : vector<2x32xf32>
    %855 = arith.divf %853, %854 : vector<2x32xf32>
    %856 = vector.extract_strided_slice %846 {offsets = [0, 32], sizes = [2, 32], strides = [1, 1]} : vector<2x128xf32> to vector<2x32xf32>
    %857 = arith.negf %856 : vector<2x32xf32>
    %858 = math.exp %857 : vector<2x32xf32>
    %cst_122 = arith.constant 1.000000e+00 : f32
    %859 = vector.broadcast %cst_122 : f32 to vector<2x32xf32>
    %860 = arith.addf %859, %858 : vector<2x32xf32>
    %861 = arith.divf %859, %860 : vector<2x32xf32>
    %862 = vector.extract_strided_slice %846 {offsets = [0, 64], sizes = [2, 32], strides = [1, 1]} : vector<2x128xf32> to vector<2x32xf32>
    %863 = math.tanh %862 : vector<2x32xf32>
    %864 = vector.extract_strided_slice %846 {offsets = [0, 96], sizes = [2, 32], strides = [1, 1]} : vector<2x128xf32> to vector<2x32xf32>
    %865 = arith.negf %864 : vector<2x32xf32>
    %866 = math.exp %865 : vector<2x32xf32>
    %cst_123 = arith.constant 1.000000e+00 : f32
    %867 = vector.broadcast %cst_123 : f32 to vector<2x32xf32>
    %868 = arith.addf %867, %866 : vector<2x32xf32>
    %869 = arith.divf %867, %868 : vector<2x32xf32>
    %870 = arith.mulf %861, %814 : vector<2x32xf32>
    %871 = arith.mulf %855, %863 : vector<2x32xf32>
    %872 = arith.addf %870, %871 : vector<2x32xf32>
    %873 = math.tanh %872 : vector<2x32xf32>
    %874 = arith.mulf %869, %873 : vector<2x32xf32>
    %875 = vector.extract_strided_slice %849 {offsets = [0, 0], sizes = [2, 32], strides = [1, 1]} : vector<2x128xf32> to vector<2x32xf32>
    %876 = arith.negf %875 : vector<2x32xf32>
    %877 = math.exp %876 : vector<2x32xf32>
    %cst_124 = arith.constant 1.000000e+00 : f32
    %878 = vector.broadcast %cst_124 : f32 to vector<2x32xf32>
    %879 = arith.addf %878, %877 : vector<2x32xf32>
    %880 = arith.divf %878, %879 : vector<2x32xf32>
    %881 = vector.extract_strided_slice %849 {offsets = [0, 32], sizes = [2, 32], strides = [1, 1]} : vector<2x128xf32> to vector<2x32xf32>
    %882 = arith.negf %881 : vector<2x32xf32>
    %883 = math.exp %882 : vector<2x32xf32>
    %cst_125 = arith.constant 1.000000e+00 : f32
    %884 = vector.broadcast %cst_125 : f32 to vector<2x32xf32>
    %885 = arith.addf %884, %883 : vector<2x32xf32>
    %886 = arith.divf %884, %885 : vector<2x32xf32>
    %887 = vector.extract_strided_slice %849 {offsets = [0, 64], sizes = [2, 32], strides = [1, 1]} : vector<2x128xf32> to vector<2x32xf32>
    %888 = math.tanh %887 : vector<2x32xf32>
    %889 = vector.extract_strided_slice %849 {offsets = [0, 96], sizes = [2, 32], strides = [1, 1]} : vector<2x128xf32> to vector<2x32xf32>
    %890 = arith.negf %889 : vector<2x32xf32>
    %891 = math.exp %890 : vector<2x32xf32>
    %cst_126 = arith.constant 1.000000e+00 : f32
    %892 = vector.broadcast %cst_126 : f32 to vector<2x32xf32>
    %893 = arith.addf %892, %891 : vector<2x32xf32>
    %894 = arith.divf %892, %893 : vector<2x32xf32>
    %895 = arith.mulf %886, %839 : vector<2x32xf32>
    %896 = arith.mulf %880, %888 : vector<2x32xf32>
    %897 = arith.addf %895, %896 : vector<2x32xf32>
    %898 = math.tanh %897 : vector<2x32xf32>
    %899 = arith.mulf %894, %898 : vector<2x32xf32>
    %900 = tpu.concatenate %874, %899 in 1 : vector<2x32xf32>, vector<2x32xf32> -> vector<2x64xf32>
    %cst_127 = arith.constant dense<0.000000e+00> : vector<2x256xf32>
    %901 = tpu.matmul %900, %489, %cst_127 {dimension_numbers = #tpu.dot_dimension_numbers<[1], [0], [0], [1], [0, 0, 1, 1], [], []>} : vector<2x64xf32>, vector<64x256xf32>, vector<2x256xf32> -> vector<2x256xf32>
    %902 = vector.extract_strided_slice %488 {offsets = [14, 0], sizes = [2, 128], strides = [1, 1]} : vector<16x256xf32> to vector<2x128xf32>
    %903 = vector.extract_strided_slice %901 {offsets = [0, 0], sizes = [2, 128], strides = [1, 1]} : vector<2x256xf32> to vector<2x128xf32>
    %904 = arith.addf %902, %903 : vector<2x128xf32>
    %905 = vector.extract_strided_slice %488 {offsets = [0, 128], sizes = [2, 128], strides = [1, 1]} : vector<16x256xf32> to vector<2x128xf32>
    %906 = vector.extract_strided_slice %901 {offsets = [0, 128], sizes = [2, 128], strides = [1, 1]} : vector<2x256xf32> to vector<2x128xf32>
    %907 = arith.addf %905, %906 : vector<2x128xf32>
    %908 = vector.extract_strided_slice %904 {offsets = [0, 0], sizes = [2, 32], strides = [1, 1]} : vector<2x128xf32> to vector<2x32xf32>
    %909 = arith.negf %908 : vector<2x32xf32>
    %910 = math.exp %909 : vector<2x32xf32>
    %cst_128 = arith.constant 1.000000e+00 : f32
    %911 = vector.broadcast %cst_128 : f32 to vector<2x32xf32>
    %912 = arith.addf %911, %910 : vector<2x32xf32>
    %913 = arith.divf %911, %912 : vector<2x32xf32>
    %914 = vector.extract_strided_slice %904 {offsets = [0, 32], sizes = [2, 32], strides = [1, 1]} : vector<2x128xf32> to vector<2x32xf32>
    %915 = arith.negf %914 : vector<2x32xf32>
    %916 = math.exp %915 : vector<2x32xf32>
    %cst_129 = arith.constant 1.000000e+00 : f32
    %917 = vector.broadcast %cst_129 : f32 to vector<2x32xf32>
    %918 = arith.addf %917, %916 : vector<2x32xf32>
    %919 = arith.divf %917, %918 : vector<2x32xf32>
    %920 = vector.extract_strided_slice %904 {offsets = [0, 64], sizes = [2, 32], strides = [1, 1]} : vector<2x128xf32> to vector<2x32xf32>
    %921 = math.tanh %920 : vector<2x32xf32>
    %922 = vector.extract_strided_slice %904 {offsets = [0, 96], sizes = [2, 32], strides = [1, 1]} : vector<2x128xf32> to vector<2x32xf32>
    %923 = arith.negf %922 : vector<2x32xf32>
    %924 = math.exp %923 : vector<2x32xf32>
    %cst_130 = arith.constant 1.000000e+00 : f32
    %925 = vector.broadcast %cst_130 : f32 to vector<2x32xf32>
    %926 = arith.addf %925, %924 : vector<2x32xf32>
    %927 = arith.divf %925, %926 : vector<2x32xf32>
    %928 = arith.mulf %919, %872 : vector<2x32xf32>
    %929 = arith.mulf %913, %921 : vector<2x32xf32>
    %930 = arith.addf %928, %929 : vector<2x32xf32>
    %931 = math.tanh %930 : vector<2x32xf32>
    %932 = arith.mulf %927, %931 : vector<2x32xf32>
    %933 = vector.extract_strided_slice %907 {offsets = [0, 0], sizes = [2, 32], strides = [1, 1]} : vector<2x128xf32> to vector<2x32xf32>
    %934 = arith.negf %933 : vector<2x32xf32>
    %935 = math.exp %934 : vector<2x32xf32>
    %cst_131 = arith.constant 1.000000e+00 : f32
    %936 = vector.broadcast %cst_131 : f32 to vector<2x32xf32>
    %937 = arith.addf %936, %935 : vector<2x32xf32>
    %938 = arith.divf %936, %937 : vector<2x32xf32>
    %939 = vector.extract_strided_slice %907 {offsets = [0, 32], sizes = [2, 32], strides = [1, 1]} : vector<2x128xf32> to vector<2x32xf32>
    %940 = arith.negf %939 : vector<2x32xf32>
    %941 = math.exp %940 : vector<2x32xf32>
    %cst_132 = arith.constant 1.000000e+00 : f32
    %942 = vector.broadcast %cst_132 : f32 to vector<2x32xf32>
    %943 = arith.addf %942, %941 : vector<2x32xf32>
    %944 = arith.divf %942, %943 : vector<2x32xf32>
    %945 = vector.extract_strided_slice %907 {offsets = [0, 64], sizes = [2, 32], strides = [1, 1]} : vector<2x128xf32> to vector<2x32xf32>
    %946 = math.tanh %945 : vector<2x32xf32>
    %947 = vector.extract_strided_slice %907 {offsets = [0, 96], sizes = [2, 32], strides = [1, 1]} : vector<2x128xf32> to vector<2x32xf32>
    %948 = arith.negf %947 : vector<2x32xf32>
    %949 = math.exp %948 : vector<2x32xf32>
    %cst_133 = arith.constant 1.000000e+00 : f32
    %950 = vector.broadcast %cst_133 : f32 to vector<2x32xf32>
    %951 = arith.addf %950, %949 : vector<2x32xf32>
    %952 = arith.divf %950, %951 : vector<2x32xf32>
    %953 = arith.mulf %944, %897 : vector<2x32xf32>
    %954 = arith.mulf %938, %946 : vector<2x32xf32>
    %955 = arith.addf %953, %954 : vector<2x32xf32>
    %956 = math.tanh %955 : vector<2x32xf32>
    %957 = arith.mulf %952, %956 : vector<2x32xf32>
    %958 = tpu.concatenate %526, %957 in 1 : vector<2x32xf32>, vector<2x32xf32> -> vector<2x64xf32>
    %959 = tpu.concatenate %584, %899 in 1 : vector<2x32xf32>, vector<2x32xf32> -> vector<2x64xf32>
    %960 = tpu.concatenate %642, %841 in 1 : vector<2x32xf32>, vector<2x32xf32> -> vector<2x64xf32>
    %961 = tpu.concatenate %700, %783 in 1 : vector<2x32xf32>, vector<2x32xf32> -> vector<2x64xf32>
    %962 = tpu.concatenate %758, %725 in 1 : vector<2x32xf32>, vector<2x32xf32> -> vector<2x64xf32>
    %963 = tpu.concatenate %816, %667 in 1 : vector<2x32xf32>, vector<2x32xf32> -> vector<2x64xf32>
    %964 = tpu.concatenate %874, %609 in 1 : vector<2x32xf32>, vector<2x32xf32> -> vector<2x64xf32>
    %965 = tpu.concatenate %932, %551 in 1 : vector<2x32xf32>, vector<2x32xf32> -> vector<2x64xf32>
    %c0_134 = arith.constant 0 : index
    %c0_135 = arith.constant 0 : index
    %c0_136 = arith.constant 0 : index
    %966 = vector.load %arg9[%c0_134, %c0_135, %c0_136] : memref<8x2x64xf32, #tpu.memory_space<vmem>>, vector<1x2x64xf32>
    %967 = vector.shape_cast %966 : vector<1x2x64xf32> to vector<2x64xf32>
    %968 = vector.shape_cast %958 : vector<2x64xf32> to vector<1x2x64xf32>
    tpu.vector_store %arg9[%c0_134, %c0_135, %c0_136], %968 {strides = array<i32>} : memref<8x2x64xf32, #tpu.memory_space<vmem>>, vector<1x2x64xf32>,
    %c1 = arith.constant 1 : index
    %c0_137 = arith.constant 0 : index
    %c0_138 = arith.constant 0 : index
    %969 = vector.load %arg9[%c1, %c0_137, %c0_138] : memref<8x2x64xf32, #tpu.memory_space<vmem>>, vector<1x2x64xf32>
    %970 = vector.shape_cast %969 : vector<1x2x64xf32> to vector<2x64xf32>
    %971 = vector.shape_cast %959 : vector<2x64xf32> to vector<1x2x64xf32>
    tpu.vector_store %arg9[%c1, %c0_137, %c0_138], %971 {strides = array<i32>} : memref<8x2x64xf32, #tpu.memory_space<vmem>>, vector<1x2x64xf32>,
    %c2 = arith.constant 2 : index
    %c0_139 = arith.constant 0 : index
    %c0_140 = arith.constant 0 : index
    %972 = vector.load %arg9[%c2, %c0_139, %c0_140] : memref<8x2x64xf32, #tpu.memory_space<vmem>>, vector<1x2x64xf32>
    %973 = vector.shape_cast %972 : vector<1x2x64xf32> to vector<2x64xf32>
    %974 = vector.shape_cast %960 : vector<2x64xf32> to vector<1x2x64xf32>
    tpu.vector_store %arg9[%c2, %c0_139, %c0_140], %974 {strides = array<i32>} : memref<8x2x64xf32, #tpu.memory_space<vmem>>, vector<1x2x64xf32>,
    %c3 = arith.constant 3 : index
    %c0_141 = arith.constant 0 : index
    %c0_142 = arith.constant 0 : index
    %975 = vector.load %arg9[%c3, %c0_141, %c0_142] : memref<8x2x64xf32, #tpu.memory_space<vmem>>, vector<1x2x64xf32>
    %976 = vector.shape_cast %975 : vector<1x2x64xf32> to vector<2x64xf32>
    %977 = vector.shape_cast %961 : vector<2x64xf32> to vector<1x2x64xf32>
    tpu.vector_store %arg9[%c3, %c0_141, %c0_142], %977 {strides = array<i32>} : memref<8x2x64xf32, #tpu.memory_space<vmem>>, vector<1x2x64xf32>,
    %c4 = arith.constant 4 : index
    %c0_143 = arith.constant 0 : index
    %c0_144 = arith.constant 0 : index
    %978 = vector.load %arg9[%c4, %c0_143, %c0_144] : memref<8x2x64xf32, #tpu.memory_space<vmem>>, vector<1x2x64xf32>
    %979 = vector.shape_cast %978 : vector<1x2x64xf32> to vector<2x64xf32>
    %980 = vector.shape_cast %962 : vector<2x64xf32> to vector<1x2x64xf32>
    tpu.vector_store %arg9[%c4, %c0_143, %c0_144], %980 {strides = array<i32>} : memref<8x2x64xf32, #tpu.memory_space<vmem>>, vector<1x2x64xf32>,
    %c5 = arith.constant 5 : index
    %c0_145 = arith.constant 0 : index
    %c0_146 = arith.constant 0 : index
    %981 = vector.load %arg9[%c5, %c0_145, %c0_146] : memref<8x2x64xf32, #tpu.memory_space<vmem>>, vector<1x2x64xf32>
    %982 = vector.shape_cast %981 : vector<1x2x64xf32> to vector<2x64xf32>
    %983 = vector.shape_cast %963 : vector<2x64xf32> to vector<1x2x64xf32>
    tpu.vector_store %arg9[%c5, %c0_145, %c0_146], %983 {strides = array<i32>} : memref<8x2x64xf32, #tpu.memory_space<vmem>>, vector<1x2x64xf32>,
    %c6 = arith.constant 6 : index
    %c0_147 = arith.constant 0 : index
    %c0_148 = arith.constant 0 : index
    %984 = vector.load %arg9[%c6, %c0_147, %c0_148] : memref<8x2x64xf32, #tpu.memory_space<vmem>>, vector<1x2x64xf32>
    %985 = vector.shape_cast %984 : vector<1x2x64xf32> to vector<2x64xf32>
    %986 = vector.shape_cast %964 : vector<2x64xf32> to vector<1x2x64xf32>
    tpu.vector_store %arg9[%c6, %c0_147, %c0_148], %986 {strides = array<i32>} : memref<8x2x64xf32, #tpu.memory_space<vmem>>, vector<1x2x64xf32>,
    %c7 = arith.constant 7 : index
    %c0_149 = arith.constant 0 : index
    %c0_150 = arith.constant 0 : index
    %987 = vector.load %arg9[%c7, %c0_149, %c0_150] : memref<8x2x64xf32, #tpu.memory_space<vmem>>, vector<1x2x64xf32>
    %988 = vector.shape_cast %987 : vector<1x2x64xf32> to vector<2x64xf32>
    %989 = vector.shape_cast %965 : vector<2x64xf32> to vector<1x2x64xf32>
    tpu.vector_store %arg9[%c7, %c0_149, %c0_150], %989 {strides = array<i32>} : memref<8x2x64xf32, #tpu.memory_space<vmem>>, vector<1x2x64xf32>,
    %c0_151 = arith.constant 0 : index
    %990 = memref.load %arg0[%c0_151] : memref<2xi32, #tpu.memory_space<smem>>
    %c1_i32 = arith.constant 1 : i32
    %991 = arith.subi %990, %c1_i32 : i32
    %992 = arith.index_cast %991 : i32 to index
    %c0_152 = arith.constant 0 : index
    %c0_153 = arith.constant 0 : index
    %993 = vector.load %arg9[%992, %c0_152, %c0_153] : memref<8x2x64xf32, #tpu.memory_space<vmem>>, vector<1x2x64xf32>
    %994 = vector.shape_cast %993 : vector<1x2x64xf32> to vector<2x64xf32>
    %995 = vector.extract_strided_slice %994 {offsets = [0, 0], sizes = [1, 64], strides = [1, 1]} : vector<2x64xf32> to vector<1x64xf32>
    %c1_154 = arith.constant 1 : index
    %996 = memref.load %arg0[%c1_154] : memref<2xi32, #tpu.memory_space<smem>>
    %c1_i32_155 = arith.constant 1 : i32
    %997 = arith.subi %996, %c1_i32_155 : i32
    %998 = arith.index_cast %997 : i32 to index
    %c0_156 = arith.constant 0 : index
    %c0_157 = arith.constant 0 : index
    %999 = vector.load %arg9[%998, %c0_156, %c0_157] : memref<8x2x64xf32, #tpu.memory_space<vmem>>, vector<1x2x64xf32>
    %1000 = vector.shape_cast %999 : vector<1x2x64xf32> to vector<2x64xf32>
    %1001 = vector.extract_strided_slice %1000 {offsets = [1, 0], sizes = [1, 64], strides = [1, 1]} : vector<2x64xf32> to vector<1x64xf32>
    %1002 = tpu.concatenate %995, %1001 in 0 : vector<1x64xf32>, vector<1x64xf32> -> vector<2x64xf32>
    %c0_158 = arith.constant 0 : index
    %c0_159 = arith.constant 0 : index
    %1003 = vector.load %arg8[%c0_158, %c0_159] : memref<2x64xf32, #tpu.memory_space<vmem>>, vector<2x64xf32>
    tpu.vector_store %arg8[%c0_158, %c0_159], %1002 {strides = array<i32>} : memref<2x64xf32, #tpu.memory_space<vmem>>, vector<2x64xf32>,
    return
  }
}

</mosaic_0001>

<bundles_post_ra>
// kernel: lstm_acceptor_pallas.1
= control target key start
LH: loop header
LB: loop body
LE: loop exit
PB: predicated region body
PF: predicated region fallthrough
CT: control target
= control target key end

     0   :  { %13 = vsyncpa [#allocation6], 0  ;;  %s4254_s0 = inlined_call_operand.vmem [shape: s32[2], index: 0, kind: input, shape index: {}]   ;;  %s4255_s1 = inlined_call_operand.vmem [shape: f32[16,16], index: 1, kind: input, shape index: {}]   ;;  %s4256_s2 = inlined_call_operand.hbm [shape: f32[16,256], index: 2, kind: input, shape index: {}]   ;;  %s4257_s3 = inlined_call_operand.hbm [shape: f32[64,256], index: 3, kind: input, shape index: {}]   ;;  %s4258_s4 = inlined_call_operand.vmem [shape: f32[1,256], index: 4, kind: input, shape index: {}]   ;;  %s4259_s5 = inlined_call_operand.hbm [shape: f32[64,256], index: 5, kind: input, shape index: {}]   ;;  %s4260_s6 = inlined_call_operand.hbm [shape: f32[64,256], index: 6, kind: input, shape index: {}]   ;;  %s4261_s7 = inlined_call_operand.vmem [shape: f32[1,256], index: 7, kind: input, shape index: {}]   ;;  %s4262_s8 = inlined_call_operand.hbm [shape: f32[2,64], index: 8, kind: output, shape index: {}]  }
   0x1   :  { %14 = vsyncpa [#allocation4], 0 }
   0x2   :  { %15 = vsyncpa [#allocation9], 0 }
   0x3   :  { %16 = vsyncpa [#allocation12], 0 }
   0x4   :  { %17 = vsyncpa [#allocation5], 0  ;;  %s24_s29 = sshll.u32 %s4254_s0, 4  ;;  %s3499_s30 = smov [#allocation8]   ;;  %s25_s29 = int_to_ptr.vmem [resolvable:$true] %s24_s29 }
   0x5   :  { %s47_s9 = sshll.u32 %s3499_s30, 4  ;;  %s3367_s12 = scalar_lea.hbm %s4257_s3, 2048  ;;  %s48_s9 = int_to_ptr.vmem [resolvable:$true] %s47_s9 }
   0x6   :  { %p3368_p0 = scmp.ne.s32.totalorder %s4257_s3, %s3367_s12  ;;  %p3371_p1 = scmp.lt.u32.totalorder %s3367_s12, %s4257_s3 }
   0x8   :  { %p3373_p2 = pnand %p3371_p1, %p3368_p0 }
   0xa   :  { %3376 = shalt.err (!%p3373_p2)
}
   0xb   :  { %s3377_s17 = scalar_lea.vmem %s48_s9, 2048  ;;  %p3382_p4 = scmp.lt.s32.totalorder %s48_s9, %s48_s9 }
   0xc   :  { %p3378_p3 = scmp.ne.s32.totalorder %s48_s9, %s3377_s17  ;;  %p3383_p5 = scmp.lt.s32.totalorder %s3377_s17, %s3377_s17 }
   0xe   :  { %p3384_p6 = por %p3383_p5, %p3382_p4 }
  0x10   :  { %p3385_p7 = pnand %p3384_p6, %p3378_p3 }
  0x12   :  { %3388 = shalt.err (!%p3385_p7)
}
  0x13   :  { %s3500_s0 = smov 256   ;;  %s3501_s18 = smov 16  }
  0x14   :  { %53 = dma.hbm_to_vmem [thread:$0]  %s4257_s3, 2048, %s48_s9, [#allocation9], %s3500_s0, %s3500_s0, %s3501_s18  }
  0x15   :  { %s3389_s21 = scalar_lea.vmem %s25_s29, 16  ;;  %p3394_p9 = scmp.lt.s32.totalorder %s25_s29, %s25_s29 }
  0x16   :  { %p3390_p8 = scmp.ne.s32.totalorder %s25_s29, %s3389_s21  ;;  %p3395_p10 = scmp.lt.s32.totalorder %s3389_s21, %s3389_s21 }
  0x18   :  { %p3396_p11 = por %p3395_p10, %p3394_p9 }
  0x1a   :  { %p3397_p12 = pnand %p3396_p11, %p3390_p8 }
  0x1c   :  { %3400 = shalt.err (!%p3397_p12)
}
  0x1d   :  { %s3502_s22 = smov [#allocation3]   ;;  %s3503_s23 = smov [#allocation7]  }
  0x1e   :  { %27 = dma.vmem_to_smem %s25_s29, 16, %s3502_s22, [#allocation6]  }
  0x1f   :  { %s35_s24 = sshll.u32 %s3503_s23, 4  ;;  %s3504_s25 = smov [#allocation10]   ;;  %s36_s24 = int_to_ptr.vmem [resolvable:$true] %s35_s24 }
  0x20   :  { %s61_s26 = sshll.u32 %s3504_s25, 4  ;;  %s3401_s3 = scalar_lea.hbm %s4256_s2, 512  ;;  %s3573_s26 = int_to_ptr.vmem [resolvable:$true] %s61_s26 }
  0x21   :  { %p3402_p13 = scmp.ne.s32.totalorder %s4256_s2, %s3401_s3  ;;  %p3405_p0 = scmp.lt.u32.totalorder %s3401_s3, %s4256_s2 }
  0x23   :  { %p3407_p1 = pnand %p3405_p0, %p3402_p13 }
  0x25   :  { %3410 = shalt.err (!%p3407_p1)
}
  0x26   :  { %s3411_s29 = scalar_lea.vmem %s36_s24, 512  ;;  %p3416_p3 = scmp.lt.s32.totalorder %s36_s24, %s36_s24 }
  0x27   :  { %p3412_p2 = scmp.ne.s32.totalorder %s36_s24, %s3411_s29  ;;  %p3417_p4 = scmp.lt.s32.totalorder %s3411_s29, %s3411_s29 }
  0x29   :  { %p3418_p5 = por %p3417_p4, %p3416_p3 }
  0x2b   :  { %p3419_p6 = pnand %p3418_p5, %p3412_p2 }
  0x2d   :  { %3422 = shalt.err (!%p3419_p6)
}
  0x2e   :  { %41 = dma.hbm_to_vmem [thread:$0]  %s4256_s2, 512, %s36_s24, [#allocation4], %s3500_s0, %s3500_s0, %s3501_s18  }
  0x2f   :  { %s3423_s16 = scalar_lea.hbm %s4259_s5, 2048 }
  0x30   :  { %p3424_p7 = scmp.ne.s32.totalorder %s4259_s5, %s3423_s16  ;;  %p3427_p8 = scmp.lt.u32.totalorder %s3423_s16, %s4259_s5 }
  0x32   :  { %p3429_p9 = pnand %p3427_p8, %p3424_p7 }
  0x34   :  { %3432 = shalt.err (!%p3429_p9)
}
  0x35   :  { %s3433_s22 = scalar_lea.vmem %s3573_s26, 2048  ;;  %p3438_p11 = scmp.lt.s32.totalorder %s3573_s26, %s3573_s26 }
  0x36   :  { %p3434_p10 = scmp.ne.s32.totalorder %s3573_s26, %s3433_s22  ;;  %p3439_p12 = scmp.lt.s32.totalorder %s3433_s22, %s3433_s22 }
  0x38   :  { %p3440_p13 = por %p3439_p12, %p3438_p11 }
  0x3a   :  { %p3441_p0 = pnand %p3440_p13, %p3434_p10 }
  0x3c   :  { %3444 = shalt.err (!%p3441_p0)
}
  0x3d   :  { %67 = dma.hbm_to_vmem [thread:$0]  %s4259_s5, 2048, %s3573_s26, [#allocation9], %s3500_s0, %s3500_s0, %s3501_s18  }
  0x3e   :  { %s3505_s24 = smov [#allocation11]   ;;  %s3445_s3 = scalar_lea.hbm %s4260_s6, 2048 }
  0x3f   :  { %s73_s25 = sshll.u32 %s3505_s24, 4  ;;  %p3446_p1 = scmp.ne.s32.totalorder %s4260_s6, %s3445_s3  ;;  %s74_s25 = int_to_ptr.vmem [resolvable:$true] %s73_s25 }
  0x40   :  { %p3449_p2 = scmp.lt.u32.totalorder %s3445_s3, %s4260_s6 }
  0x42   :  { %p3451_p3 = pnand %p3449_p2, %p3446_p1 }
  0x44   :  { %3454 = shalt.err (!%p3451_p3)
}
  0x45   :  { %s3455_s29 = scalar_lea.vmem %s74_s25, 2048  ;;  %p3460_p5 = scmp.lt.s32.totalorder %s74_s25, %s74_s25 }
  0x46   :  { %p3456_p4 = scmp.ne.s32.totalorder %s74_s25, %s3455_s29  ;;  %p3461_p6 = scmp.lt.s32.totalorder %s3455_s29, %s3455_s29 }
  0x48   :  { %p3462_p7 = por %p3461_p6, %p3460_p5 }
  0x4a   :  { %p3463_p8 = pnand %p3462_p7, %p3456_p4 }
  0x4c   :  { %3466 = shalt.err (!%p3463_p8)
}
  0x4d   :  { %79 = dma.hbm_to_vmem [thread:$0]  %s4260_s6, 2048, %s74_s25, [#allocation12], %s3500_s0, %s3500_s0, %s3501_s18  }
  0x4e   :  { %3489 = dma.done.wait [#allocation6], 16  }
  0x4f   :  { %3490 = vsyncadd [#allocation6], 4294967280 }
  0x50   :  { %3491 = dma.done.wait [#allocation4], 512  }
  0x51   :  { %3492 = vsyncadd [#allocation4], 4294966784 }
  0x52   :  { %3493 = dma.done.wait [#allocation9], 4096  }
  0x53   :  { %3494 = vsyncadd [#allocation9], 4294963200 }
  0x54   :  { %3495 = dma.done.wait [#allocation12], 2048  }
  0x55   :  { %3496 = vsyncadd [#allocation12], 4294965248 }
  0x56   :  { %97 = sfence }
  0x57   :  { %v201_v0 = vld [vmem:[#allocation8 + $0x8] sm:$0xff]  ;;  %v203_v1 = vld [vmem:[#allocation8 + $0x18] sm:$0xff]  ;;  %v200_v2 = vld [vmem:[#allocation8] sm:$0xff]  ;;  %v3506_v7 = vmov 0.0   ;;  %vm116_vm0 = vcmask 130048   ;;  %v106_v33 = vlaneseq  ;;  %s3508_s14 = smov 32  }
  0x58   :  { %v3625_v3 = vpack.c.bf16 %v203_v1, %v201_v0  ;;  %v202_v4 = vld [vmem:[#allocation8 + $0x10] sm:$0xff]  ;;  %v205_v5 = vld [vmem:[#allocation8 + $0x28] sm:$0xff]  ;;  %v207_v6 = vld [vmem:[#allocation8 + $0x38] sm:$0xff]  ;;  %187 = vmatprep.mubr.f32.mxu0 %v3506_v7  ;;  %284 = vmatprep.mubr.f32.mxu1 %v3506_v7  ;;  %vm353_vm1 = vcmask 261120   ;;  %vm216_vm2 = vcmask 523264   ;;  %vm1402_vm3 = vcmask 1043456  }
  0x59   :  { %v3629_v8 = vpack.c.bf16 %v202_v4, %v200_v2  ;;  %v3631_v9 = vpack.c.bf16 %v207_v6, %v205_v5  ;;  %v204_v10 = vld [vmem:[#allocation8 + $0x20] sm:$0xff]  ;;  %v206_v11 = vld [vmem:[#allocation8 + $0x30] sm:$0xff]  ;;  %v101_v12 = vld [vmem:[#allocation7 + $0x8] sm:$0xff]  ;;  %v3681_v34 = vshrl.u32 %v106_v33, 7  ;;  %vm1400_vm4 = vcmask 1041408   ;;  %s2821_s17 = sld [smem:[#allocation3 + $0x1]] }
  0x5a   :  { %2829 = vmatprep.subr.bf16.mxu1 %v3625_v3  ;;  %v103_v13 = vld [vmem:[#allocation7 + $0x18] sm:$0xff]  ;;  %v100_v14 = vld [vmem:[#allocation7] sm:$0xff]  ;;  %v102_v15 = vld [vmem:[#allocation7 + $0x10] sm:$0xff]  ;;  %v3635_v16 = vpack.c.bf16 %v206_v11, %v204_v10  ;;  %vm1404_vm5 = vcmask 1045504   ;;  %vm2718_vm6 = vcmask 519170   ;;  %vm2721_vm7 = vcmask 521220  }
  0x5b   :  { %2831 = vmatpush1.bf16.msra.mxu1 %v3629_v8  ;;  %v2824_v17 = vpack.c.bf16 %v103_v13, %v101_v12  ;;  %v2826_v18 = vpack.c.bf16 %v102_v15, %v100_v14  ;;  %v209_v19 = vld [vmem:[#allocation8 + $0x48] sm:$0xff]  ;;  %v211_v20 = vld [vmem:[#allocation8 + $0x58] sm:$0xff]  ;;  %v208_v22 = vld [vmem:[#allocation8 + $0x40] sm:$0xff]  ;;  %v112_v35 = vsub.s32 1, %v3681_v34  ;;  %v108_v38 = vsub.s32 0, %v3681_v34  ;;  %s3509_s2 = smov [#allocation13]  }
  0x5c   :  { %2833 = vmatprep.subr.bf16.mxu1 %v3631_v9  ;;  %v3638_v21 = vpack.c.bf16 %v211_v20, %v209_v19  ;;  %v210_v23 = vld [vmem:[#allocation8 + $0x50] sm:$0xff]  ;;  %v213_v24 = vld [vmem:[#allocation8 + $0x68] sm:$0xff]  ;;  %v215_v25 = vld [vmem:[#allocation8 + $0x78] sm:$0xff]  ;;  %vm2724_vm8 = vcmask 523270   ;;  %vm2715_vm9 = vcmask 517120   ;;  %s2753_s23 = sshll.u32 %s3509_s2, 4  ;;  %s2754_s23 = int_to_ptr.vmem [resolvable:$true] %s2753_s23 }
  0x5d   :  { %2825 = vmatprep.subr.bf16.mxu0 %v2824_v17  ;;  %v98_v26 = vld [vmem:[%s4255_s1] sm:$0xff]  ;;  %v3644_v27 = vpack.c.bf16 %v210_v23, %v208_v22  ;;  %v3648_v28 = vpack.c.bf16 %v215_v25, %v213_v24  ;;  %v212_v29 = vld [vmem:[#allocation8 + $0x60] sm:$0xff]  ;;  %v99_v31 = vld [vmem:[%s4255_s1 + $0x8] sm:$0xff]  ;;  %vm2744_vm10 = vcmask 1040384   ;;  %s3467_s27 = scalar_lea.vmem %s2754_s23, 32  ;;  %p3472_p10 = scmp.lt.s32.totalorder %s2754_s23, %s2754_s23 }
  0x5e   :  { %2827 = vmatpush1.bf16.msra.mxu0 %v2826_v18  ;;  %v214_v30 = vld [vmem:[#allocation8 + $0x70] sm:$0xff]  ;;  %p3468_p9 = scmp.ne.s32.totalorder %s2754_s23, %s3467_s27  ;;  %p3473_p11 = scmp.lt.s32.totalorder %s3467_s27, %s3467_s27 }
  0x5f   :  { %2835 = vmatpush1.bf16.msra.mxu1 %v3635_v16  ;;  %2845 = vmatprep.subr.bf16.mxu0 %v3625_v3  ;;  %v3657_v32 = vpack.c.bf16 %v214_v30, %v212_v29  ;;  %v104_v36 = vld [vmem:[%s4258_s4] sm:$0x3]  ;;  %s3507_s4 = smov 64   ;;  %s2822_s20 = sadd.s32 4294967295, %s2821_s17 }
  0x60   :  { %2837 = vmatprep.subr.bf16.mxu1 %v3638_v21  ;;  %v113_v37 = vrot.slane %v104_v36, %v112_v35  ;;  %v109_v42 = vrot.slane %v104_v36, %v108_v38  ;;  %s2823_s22 = sshll.u32 %s2822_s20, 1  ;;  %p3474_p12 = por %p3473_p11, %p3472_p10 }
  0x61   :  { %2769 = vmatmul.mubr.msk.f32.vlgmr.msra.gmra.mrb[0].mxu0 %vm116_vm0, %v98_v26  ;;  %s2742_s25 = scalar_lea.vmem [#allocation2], %s2823_s22 }
  0x62   :  { %193 = vmatprep.mubr.f32.mxu0 %v3506_v7  ;;  %2847 = vmatpush1.bf16.msra.mxu0 %v3629_v8  ;;  %p3475_p13 = pnand %p3474_p12, %p3468_p9 }
  0x63   :  { %2839 = vmatpush1.bf16.msra.mxu1 %v3644_v27  ;;  %2849 = vmatprep.subr.bf16.mxu0 %v3631_v9 }
  0x64   :  { %2841 = vmatprep.subr.bf16.mxu1 %v3648_v28 }
  0x65   :  { %2770 = vmatmul.mubr.msk.f32.gmra.mrb[2].mxu0 %vm116_vm0, %v99_v31 }
  0x66   :  { %2851 = vmatpush1.bf16.msra.mxu0 %v3635_v16  ;;  %422 = vmatprep.mubr.f32.mxu0 %v3506_v7 }
  0x67   :  { %2843 = vmatpush1.bf16.msra.mxu1 %v3657_v32  ;;  %2853 = vmatprep.subr.bf16.mxu0 %v3638_v21 }
  0x68   :  { %2861 = vmatprep.subr.bf16.mxu1 %v3625_v3 }
  0x6a   :  { %285 = vmatmul.mubr.f32.vlgmr.msra.gmra.mrb[0].mxu1 %v3506_v7  ;;  %2855 = vmatpush1.bf16.msra.mxu0 %v3644_v27 }
  0x6b   :  { %2857 = vmatprep.subr.bf16.mxu0 %v3648_v28  ;;  %2863 = vmatpush1.bf16.msra.mxu1 %v3629_v8 }
  0x6c   :  { %2865 = vmatprep.subr.bf16.mxu1 %v3631_v9  ;;  %569 = vmatprep.mubr.f32.mxu1 %v3506_v7 }
  0x6e   :  { %2859 = vmatpush1.bf16.msra.mxu0 %v3657_v32 }
  0x6f   :  { %2867 = vmatpush1.bf16.msra.mxu1 %v3635_v16  ;;  %2877 = vmatprep.subr.bf16.mxu0 %v3625_v3 }
  0x70   :  { %2869 = vmatprep.subr.bf16.mxu1 %v3638_v21 }
  0x73   :  { %2871 = vmatpush1.bf16.msra.mxu1 %v3644_v27 }
  0x74   :  { %2873 = vmatprep.subr.bf16.mxu1 %v3648_v28 }
  0x77   :  { %2875 = vmatpush1.bf16.msra.mxu1 %v3657_v32 }
  0x78   :  { %2893 = vmatprep.subr.bf16.mxu1 %v3625_v3 }
 0x134   :  { %v189_v39 = vpop.f32.mrb[0].mxu0 }
 0x135   :  { %v191_v40 = vpop.f32.mrb[1].mxu0  ;;  %v3698_v50 = vadd.f32 %v189_v39, %v109_v42 }
 0x136   :  { %v3690_v41 = vadd.f32 %v191_v40, %v113_v37 }
 0x138   :  { %v195_v43 = vpop.f32.mrb[2].mxu0 }
 0x139   :  { %v3694_v44 = vadd.f32 %v195_v43, %v109_v42  ;;  %v197_v45 = vpop.f32.mrb[3].mxu0 }
 0x13a   :  { %v3696_v46 = vadd.f32 %v197_v45, %v113_v37 }
 0x13d   :  { %v286_v47 = vpop.f32.mrb[0].mxu1 }
 0x13e   :  { %v288_v48 = vpop.f32.mrb[1].mxu1  ;;  %v291_v52 = vadd.f32 %v286_v47, %v3698_v50 }
 0x13f   :  { %v293_v49 = vrot.slane %v288_v48, 2 }
 0x140   :  { %v2771_v56 = vmul.f32 -1.442695, %v291_v52 }
 0x141   :  { %v295_v51 = vadd.f32 %v293_v49, %v3696_v46 }
 0x143   :  { %3111 = vtanh.f32 %v295_v51  ;;  %v2772_v55 = vmul.f32 -1.442695, %v295_v51 }
 0x144   :  { %3113 = vtanh.f32 %v291_v52 }
 0x145   :  { %3115 = vpow2.f32 %v2772_v55 }
 0x146   :  { %3117 = vpow2.f32 %v2771_v56 }
 0x14d   :  { %v3112_v53 = vpop.eup %3111 }
 0x14e   :  { %329 = vrot.lane.b32.xlu0 %v3112_v53, %s3507_s4  ;;  %v3114_v54 = vpop.eup %3113 }
 0x14f   :  { %v3116_v57 = vpop.eup %3115 }
 0x150   :  { %v323_v58 = vadd.f32 1.0, %v3116_v57  ;;  %v3118_v59 = vpop.eup %3117 }
 0x151   :  { %v299_v60 = vadd.f32 1.0, %v3118_v59 }
 0x152   :  { %305 = vrot.lane.b32.xlu0 %v3114_v54, %s3507_s4  ;;  %3119 = vrcp.f32 %v323_v58 }
 0x153   :  { %3121 = vrcp.f32 %v299_v60 }
 0x15c   :  { %v3120_v61 = vpop.eup %3119 }
 0x15d   :  { %v3122_v0 = vpop.eup %3121  ;;  %v327_v4 = vmul.f32 0.0, %v3120_v61 }
 0x15e   :  { %v303_v10 = vmul.f32 0.0, %v3122_v0 }
 0x1c0   :  { %v330_v62 = vpop.permute.xlu0 %329 }
 0x1c1   :  { %v332_v63 = vmul.f32 %v3120_v61, %v330_v62 }
 0x1c3   :  { %334 = vrot.lane.b32.xlu1 %v332_v63, %s3508_s14 }
 0x1c4   :  { %v306_v1 = vpop.permute.xlu0 %305 }
 0x1c5   :  { %v308_v2 = vmul.f32 %v3122_v0, %v306_v1 }
 0x1c7   :  { %310 = vrot.lane.b32.xlu1 %v308_v2, %s3508_s14 }
 0x235   :  { %v335_v5 = vpop.permute.xlu1 %334 }
 0x236   :  { %v3706_v6 = vadd.f32 %v335_v5, %v327_v4 }
 0x238   :  { %3123 = vtanh.f32 %v3706_v6  ;;  %v472_v56 = vrot.slane %v3706_v6, 2 }
 0x239   :  { %v311_v11 = vpop.permute.xlu1 %310 }
 0x23a   :  { %v313_v12 = vadd.f32 %v311_v11, %v303_v10 }
 0x23c   :  { %3125 = vtanh.f32 %v313_v12  ;;  %v445_v55 = vrot.slane %v313_v12, 6 }
 0x242   :  { %v3124_v13 = vpop.eup %3123 }
 0x243   :  { %340 = vrot.lane.b32.xlu0 %v3124_v13, %s3507_s4 }
 0x246   :  { %v3126_v14 = vpop.eup %3125 }
 0x247   :  { %316 = vrot.lane.b32.xlu1 %v3126_v14, %s3507_s4 }
 0x2b5   :  { %v341_v15 = vpop.permute.xlu0 %340 }
 0x2b6   :  { %v3711_v17 = vmul.f32 %v3120_v61, %v341_v15 }
 0x2b8   :  { %v349_v18 = vrot.slane %v3711_v17, 6 }
 0x2b9   :  { %v317_v19 = vpop.permute.xlu1 %316 }
 0x2ba   :  { %v319_v20 = vmul.f32 %v3122_v0, %v317_v19  ;;  %350 = vrot.lane.b32.xlu1 %v349_v18, %s3507_s4 }
 0x2bc   :  { %345 = vrot.lane.b32.xlu0 %v319_v20, %s3508_s14 }
 0x32c   :  { %v351_v22 = vpop.permute.xlu1 %350 }
 0x32e   :  { %v3716_v23 = vpop.permute.xlu0 %345 }
 0x32f   :  { %v354_v24 = vsel %vm353_vm1, %v3716_v23, %v351_v22 }
 0x330   :  { %2773 = vmatmul.mubr.msk.f32.vlgmr.msra.gmra.mrb[4].mxu0 %vm216_vm2, %v354_v24 }
 0x331   :  { %2879 = vmatpush1.bf16.msra.mxu0 %v3629_v8  ;;  %716 = vmatprep.mubr.f32.mxu0 %v3506_v7 }
 0x332   :  { %2881 = vmatprep.subr.bf16.mxu0 %v3631_v9 }
 0x335   :  { %2883 = vmatpush1.bf16.msra.mxu0 %v3635_v16 }
 0x336   :  { %2885 = vmatprep.subr.bf16.mxu0 %v3638_v21 }
 0x339   :  { %2887 = vmatpush1.bf16.msra.mxu0 %v3644_v27 }
 0x33a   :  { %2889 = vmatprep.subr.bf16.mxu0 %v3648_v28 }
 0x33d   :  { %2891 = vmatpush1.bf16.msra.mxu0 %v3657_v32 }
 0x33e   :  { %2909 = vmatprep.subr.bf16.mxu0 %v3625_v3 }
 0x403   :  { %v424_v25 = vpop.f32.mrb[4].mxu0 }
 0x404   :  { %v430_v26 = vrot.slane %v424_v25, 6  ;;  %v426_v29 = vpop.f32.mrb[5].mxu0 }
 0x405   :  { %v434_v30 = vrot.slane %v426_v29, 4 }
 0x406   :  { %v432_v31 = vadd.f32 %v430_v26, %v3698_v50 }
 0x407   :  { %v436_v33 = vadd.f32 %v434_v30, %v3696_v46 }
 0x408   :  { %3127 = vtanh.f32 %v432_v31  ;;  %v2774_v39 = vmul.f32 -1.442695, %v432_v31 }
 0x409   :  { %3129 = vtanh.f32 %v436_v33  ;;  %v2775_v40 = vmul.f32 -1.442695, %v436_v33 }
 0x40a   :  { %3131 = vpow2.f32 %v2774_v39 }
 0x40b   :  { %3133 = vpow2.f32 %v2775_v40 }
 0x412   :  { %v3128_v36 = vpop.eup %3127 }
 0x413   :  { %v3130_v37 = vpop.eup %3129  ;;  %449 = vrot.lane.b32.xlu1 %v3128_v36, %s3507_s4 }
 0x414   :  { %476 = vrot.lane.b32.xlu0 %v3130_v37, %s3507_s4  ;;  %v3132_v42 = vpop.eup %3131 }
 0x415   :  { %v3134_v43 = vpop.eup %3133  ;;  %v440_v45 = vadd.f32 1.0, %v3132_v42 }
 0x416   :  { %v467_v47 = vadd.f32 1.0, %v3134_v43 }
 0x417   :  { %3135 = vrcp.f32 %v440_v45 }
 0x418   :  { %3137 = vrcp.f32 %v467_v47 }
 0x421   :  { %v3136_v48 = vpop.eup %3135 }
 0x422   :  { %v3138_v51 = vpop.eup %3137  ;;  %v447_v57 = vmul.f32 %v3136_v48, %v445_v55 }
 0x423   :  { %v474_v59 = vmul.f32 %v3138_v51, %v472_v56 }
 0x485   :  { %v450_v49 = vpop.permute.xlu1 %449 }
 0x486   :  { %v452_v52 = vmul.f32 %v3136_v48, %v450_v49  ;;  %v477_v53 = vpop.permute.xlu0 %476 }
 0x487   :  { %v479_v54 = vmul.f32 %v3138_v51, %v477_v53 }
 0x488   :  { %454 = vrot.lane.b32.xlu1 %v452_v52, %s3508_s14 }
 0x489   :  { %481 = vrot.lane.b32.xlu0 %v479_v54, %s3508_s14 }
 0x4fa   :  { %v455_v58 = vpop.permute.xlu1 %454 }
 0x4fb   :  { %v3737_v60 = vadd.f32 %v455_v58, %v447_v57  ;;  %v482_v61 = vpop.permute.xlu0 %481 }
 0x4fc   :  { %v3739_v62 = vadd.f32 %v482_v61, %v474_v59 }
 0x4fd   :  { %3139 = vtanh.f32 %v3737_v60  ;;  %v592_v47 = vrot.slane %v3737_v60, 6 }
 0x4fe   :  { %3141 = vtanh.f32 %v3739_v62 }
 0x507   :  { %v3140_v63 = vpop.eup %3139 }
 0x508   :  { %v3142_v0 = vpop.eup %3141  ;;  %460 = vrot.lane.b32.xlu1 %v3140_v63, %s3507_s4 }
 0x509   :  { %487 = vrot.lane.b32.xlu0 %v3142_v0, %s3507_s4 }
 0x57a   :  { %v461_v1 = vpop.permute.xlu1 %460 }
 0x57b   :  { %v463_v2 = vmul.f32 %v3136_v48, %v461_v1  ;;  %v488_v4 = vpop.permute.xlu0 %487  ;;  %v619_v48 = vrot.slane %v3739_v62, 2 }
 0x57c   :  { %v3745_v5 = vmul.f32 %v3138_v51, %v488_v4 }
 0x57d   :  { %492 = vrot.lane.b32.xlu0 %v463_v2, %s3508_s14 }
 0x57e   :  { %v496_v6 = vrot.slane %v3745_v5, 2 }
 0x580   :  { %497 = vrot.lane.b32.xlu1 %v496_v6, %s3507_s4 }
 0x5ef   :  { %v3750_v10 = vpop.permute.xlu0 %492 }
 0x5f2   :  { %v498_v11 = vpop.permute.xlu1 %497 }
 0x5f3   :  { %v500_v12 = vsel %vm353_vm1, %v3750_v10, %v498_v11 }
 0x5f4   :  { %v502_v13 = vrot.slane %v500_v12, 2 }
 0x5f6   :  { %2776 = vmatmul.mubr.msk.f32.vlgmr.msra.gmra.mrb[2].mxu1 %vm216_vm2, %v502_v13 }
 0x5f7   :  { %2895 = vmatpush1.bf16.msra.mxu1 %v3629_v8  ;;  %860 = vmatprep.mubr.f32.mxu1 %v3506_v7 }
 0x5f8   :  { %2897 = vmatprep.subr.bf16.mxu1 %v3631_v9 }
 0x5fb   :  { %2899 = vmatpush1.bf16.msra.mxu1 %v3635_v16 }
 0x5fc   :  { %2901 = vmatprep.subr.bf16.mxu1 %v3638_v21 }
 0x5ff   :  { %2903 = vmatpush1.bf16.msra.mxu1 %v3644_v27 }
 0x600   :  { %2905 = vmatprep.subr.bf16.mxu1 %v3648_v28 }
 0x603   :  { %2907 = vmatpush1.bf16.msra.mxu1 %v3657_v32 }
 0x604   :  { %2925 = vmatprep.subr.bf16.mxu1 %v3625_v3 }
 0x6c9   :  { %v571_v14 = vpop.f32.mrb[2].mxu1 }
 0x6ca   :  { %v577_v15 = vrot.slane %v571_v14, 4  ;;  %v573_v18 = vpop.f32.mrb[3].mxu1 }
 0x6cb   :  { %v581_v19 = vrot.slane %v573_v18, 6 }
 0x6cc   :  { %v579_v20 = vadd.f32 %v577_v15, %v3698_v50 }
 0x6cd   :  { %v583_v22 = vadd.f32 %v581_v19, %v3696_v46 }
 0x6ce   :  { %3143 = vtanh.f32 %v579_v20  ;;  %v2777_v26 = vmul.f32 -1.442695, %v579_v20 }
 0x6cf   :  { %3145 = vtanh.f32 %v583_v22  ;;  %v2778_v29 = vmul.f32 -1.442695, %v583_v22 }
 0x6d0   :  { %3147 = vpow2.f32 %v2777_v26 }
 0x6d1   :  { %3149 = vpow2.f32 %v2778_v29 }
 0x6d8   :  { %v3144_v24 = vpop.eup %3143 }
 0x6d9   :  { %v3146_v25 = vpop.eup %3145  ;;  %596 = vrot.lane.b32.xlu1 %v3144_v24, %s3507_s4 }
 0x6da   :  { %623 = vrot.lane.b32.xlu0 %v3146_v25, %s3507_s4  ;;  %v3148_v30 = vpop.eup %3147 }
 0x6db   :  { %v3150_v31 = vpop.eup %3149  ;;  %v587_v33 = vadd.f32 1.0, %v3148_v30 }
 0x6dc   :  { %v614_v36 = vadd.f32 1.0, %v3150_v31 }
 0x6dd   :  { %3151 = vrcp.f32 %v587_v33 }
 0x6de   :  { %3153 = vrcp.f32 %v614_v36 }
 0x6e7   :  { %v3152_v37 = vpop.eup %3151 }
 0x6e8   :  { %v3154_v40 = vpop.eup %3153  ;;  %v594_v49 = vmul.f32 %v3152_v37, %v592_v47 }
 0x6e9   :  { %v621_v52 = vmul.f32 %v3154_v40, %v619_v48 }
 0x74b   :  { %v597_v39 = vpop.permute.xlu1 %596 }
 0x74c   :  { %v599_v42 = vmul.f32 %v3152_v37, %v597_v39  ;;  %v624_v43 = vpop.permute.xlu0 %623 }
 0x74d   :  { %v626_v45 = vmul.f32 %v3154_v40, %v624_v43 }
 0x74e   :  { %601 = vrot.lane.b32.xlu1 %v599_v42, %s3508_s14 }
 0x74f   :  { %628 = vrot.lane.b32.xlu0 %v626_v45, %s3508_s14 }
 0x7c0   :  { %v602_v51 = vpop.permute.xlu1 %601 }
 0x7c1   :  { %v3772_v53 = vadd.f32 %v602_v51, %v594_v49  ;;  %v629_v54 = vpop.permute.xlu0 %628 }
 0x7c2   :  { %v631_v55 = vadd.f32 %v629_v54, %v621_v52 }
 0x7c3   :  { %3155 = vtanh.f32 %v3772_v53  ;;  %v736_v33 = vrot.slane %v3772_v53, 6 }
 0x7c4   :  { %3157 = vtanh.f32 %v631_v55  ;;  %v763_v31 = vrot.slane %v631_v55, 2 }
 0x7cd   :  { %v3156_v56 = vpop.eup %3155 }
 0x7ce   :  { %v3158_v57 = vpop.eup %3157  ;;  %607 = vrot.lane.b32.xlu1 %v3156_v56, %s3507_s4 }
 0x7cf   :  { %634 = vrot.lane.b32.xlu0 %v3158_v57, %s3507_s4 }
 0x840   :  { %v608_v58 = vpop.permute.xlu1 %607 }
 0x841   :  { %v610_v59 = vmul.f32 %v3152_v37, %v608_v58  ;;  %v635_v60 = vpop.permute.xlu0 %634 }
 0x842   :  { %v3777_v61 = vmul.f32 %v3154_v40, %v635_v60 }
 0x843   :  { %639 = vrot.lane.b32.xlu0 %v610_v59, %s3508_s14 }
 0x844   :  { %v643_v62 = vrot.slane %v3777_v61, 6 }
 0x846   :  { %644 = vrot.lane.b32.xlu1 %v643_v62, %s3507_s4 }
 0x8b5   :  { %v3782_v63 = vpop.permute.xlu0 %639 }
 0x8b8   :  { %v645_v0 = vpop.permute.xlu1 %644 }
 0x8b9   :  { %v647_v1 = vsel %vm353_vm1, %v3782_v63, %v645_v0 }
 0x8ba   :  { %v649_v2 = vrot.slane %v647_v1, 4 }
 0x8bc   :  { %2779 = vmatmul.mubr.msk.f32.vlgmr.msra.gmra.mrb[6].mxu0 %vm216_vm2, %v649_v2 }
 0x8bd   :  { %2911 = vmatpush1.bf16.msra.mxu0 %v3629_v8  ;;  %1003 = vmatprep.mubr.f32.mxu0 %v3506_v7 }
 0x8be   :  { %2913 = vmatprep.subr.bf16.mxu0 %v3631_v9 }
 0x8c1   :  { %2915 = vmatpush1.bf16.msra.mxu0 %v3635_v16 }
 0x8c2   :  { %2917 = vmatprep.subr.bf16.mxu0 %v3638_v21 }
 0x8c5   :  { %2919 = vmatpush1.bf16.msra.mxu0 %v3644_v27 }
 0x8c6   :  { %2921 = vmatprep.subr.bf16.mxu0 %v3648_v28 }
 0x8c9   :  { %2923 = vmatpush1.bf16.msra.mxu0 %v3657_v32 }
 0x8ca   :  { %2941 = vmatprep.subr.bf16.mxu0 %v3625_v3 }
 0x98f   :  { %v718_v4 = vpop.f32.mrb[6].mxu0 }
 0x990   :  { %v724_v6 = vrot.slane %v718_v4, 2  ;;  %v720_v11 = vpop.f32.mrb[7].mxu0 }
 0x991   :  { %v727_v12 = vadd.f32 %v720_v11, %v3696_v46 }
 0x992   :  { %v726_v13 = vadd.f32 %v724_v6, %v3698_v50 }
 0x993   :  { %3159 = vtanh.f32 %v727_v12  ;;  %v2781_v18 = vmul.f32 -1.442695, %v727_v12 }
 0x994   :  { %3161 = vtanh.f32 %v726_v13  ;;  %v2780_v19 = vmul.f32 -1.442695, %v726_v13 }
 0x995   :  { %3163 = vpow2.f32 %v2781_v18 }
 0x996   :  { %3165 = vpow2.f32 %v2780_v19 }
 0x99d   :  { %v3160_v14 = vpop.eup %3159 }
 0x99e   :  { %v3162_v15 = vpop.eup %3161  ;;  %767 = vrot.lane.b32.xlu0 %v3160_v14, %s3507_s4 }
 0x99f   :  { %740 = vrot.lane.b32.xlu1 %v3162_v15, %s3507_s4  ;;  %v3164_v3 = vpop.eup %3163 }
 0x9a0   :  { %v3166_v20 = vpop.eup %3165  ;;  %v758_v22 = vadd.f32 1.0, %v3164_v3 }
 0x9a1   :  { %v731_v24 = vadd.f32 1.0, %v3166_v20 }
 0x9a2   :  { %3167 = vrcp.f32 %v758_v22 }
 0x9a3   :  { %3169 = vrcp.f32 %v731_v24 }
 0x9ac   :  { %v3168_v46 = vpop.eup %3167 }
 0x9ad   :  { %v3170_v25 = vpop.eup %3169  ;;  %v765_v36 = vmul.f32 %v3168_v46, %v763_v31 }
 0x9ae   :  { %v738_v39 = vmul.f32 %v3170_v25, %v736_v33 }
 0xa10   :  { %v768_v50 = vpop.permute.xlu0 %767 }
 0xa11   :  { %v770_v26 = vmul.f32 %v3168_v46, %v768_v50  ;;  %v741_v29 = vpop.permute.xlu1 %740 }
 0xa12   :  { %v743_v30 = vmul.f32 %v3170_v25, %v741_v29 }
 0xa13   :  { %772 = vrot.lane.b32.xlu0 %v770_v26, %s3508_s14 }
 0xa14   :  { %745 = vrot.lane.b32.xlu1 %v743_v30, %s3508_s14 }
 0xa85   :  { %v773_v37 = vpop.permute.xlu0 %772 }
 0xa86   :  { %v3803_v40 = vadd.f32 %v773_v37, %v765_v36  ;;  %v746_v42 = vpop.permute.xlu1 %745 }
 0xa87   :  { %v748_v43 = vadd.f32 %v746_v42, %v738_v39 }
 0xa88   :  { %3171 = vtanh.f32 %v3803_v40  ;;  %v907_v50 = vrot.slane %v3803_v40, 2 }
 0xa89   :  { %3173 = vtanh.f32 %v748_v43  ;;  %v880_v24 = vrot.slane %v748_v43, 6 }
 0xa92   :  { %v3172_v45 = vpop.eup %3171 }
 0xa93   :  { %v3174_v47 = vpop.eup %3173  ;;  %778 = vrot.lane.b32.xlu0 %v3172_v45, %s3507_s4 }
 0xa94   :  { %751 = vrot.lane.b32.xlu1 %v3174_v47, %s3507_s4 }
 0xb05   :  { %v779_v48 = vpop.permute.xlu0 %778 }
 0xb06   :  { %v3808_v49 = vmul.f32 %v3168_v46, %v779_v48  ;;  %v752_v51 = vpop.permute.xlu1 %751 }
 0xb07   :  { %v754_v52 = vmul.f32 %v3170_v25, %v752_v51 }
 0xb08   :  { %v787_v53 = vrot.slane %v3808_v49, 2 }
 0xb09   :  { %783 = vrot.lane.b32.xlu0 %v754_v52, %s3508_s14 }
 0xb0a   :  { %788 = vrot.lane.b32.xlu1 %v787_v53, %s3507_s4 }
 0xb7b   :  { %v3813_v54 = vpop.permute.xlu0 %783 }
 0xb7c   :  { %v789_v55 = vpop.permute.xlu1 %788 }
 0xb7d   :  { %v791_v56 = vsel %vm353_vm1, %v3813_v54, %v789_v55 }
 0xb7e   :  { %v793_v57 = vrot.slane %v791_v56, 6 }
 0xb80   :  { %2782 = vmatmul.mubr.msk.f32.vlgmr.msra.gmra.mrb[4].mxu1 %vm216_vm2, %v793_v57 }
 0xb81   :  { %2927 = vmatpush1.bf16.msra.mxu1 %v3629_v8  ;;  %1150 = vmatprep.mubr.f32.mxu1 %v3506_v7 }
 0xb82   :  { %2929 = vmatprep.subr.bf16.mxu1 %v3631_v9 }
 0xb85   :  { %2931 = vmatpush1.bf16.msra.mxu1 %v3635_v16 }
 0xb86   :  { %2933 = vmatprep.subr.bf16.mxu1 %v3638_v21 }
 0xb89   :  { %2935 = vmatpush1.bf16.msra.mxu1 %v3644_v27 }
 0xb8a   :  { %2937 = vmatprep.subr.bf16.mxu1 %v3648_v28 }
 0xb8d   :  { %2939 = vmatpush1.bf16.msra.mxu1 %v3657_v32 }
 0xc53   :  { %v862_v58 = vpop.f32.mrb[4].mxu1 }
 0xc54   :  { %v867_v59 = vadd.f32 %v862_v58, %v3694_v44  ;;  %v864_v60 = vpop.f32.mrb[5].mxu1 }
 0xc55   :  { %v869_v62 = vrot.slane %v864_v60, 2 }
 0xc56   :  { %3175 = vtanh.f32 %v867_v59  ;;  %v2783_v4 = vmul.f32 -1.442695, %v867_v59 }
 0xc57   :  { %v871_v0 = vadd.f32 %v869_v62, %v3690_v41 }
 0xc59   :  { %3177 = vtanh.f32 %v871_v0  ;;  %v2784_v6 = vmul.f32 -1.442695, %v871_v0 }
 0xc5a   :  { %3179 = vpow2.f32 %v2783_v4 }
 0xc5b   :  { %3181 = vpow2.f32 %v2784_v6 }
 0xc60   :  { %v3176_v1 = vpop.eup %3175 }
 0xc61   :  { %884 = vrot.lane.b32.xlu1 %v3176_v1, %s3507_s4 }
 0xc63   :  { %v3178_v2 = vpop.eup %3177 }
 0xc64   :  { %911 = vrot.lane.b32.xlu0 %v3178_v2, %s3507_s4  ;;  %v3180_v11 = vpop.eup %3179 }
 0xc65   :  { %v3182_v12 = vpop.eup %3181  ;;  %v875_v13 = vadd.f32 1.0, %v3180_v11 }
 0xc66   :  { %v902_v14 = vadd.f32 1.0, %v3182_v12 }
 0xc67   :  { %3183 = vrcp.f32 %v875_v13 }
 0xc68   :  { %3185 = vrcp.f32 %v902_v14 }
 0xc71   :  { %v3184_v15 = vpop.eup %3183 }
 0xc72   :  { %v3186_v3 = vpop.eup %3185  ;;  %v882_v46 = vmul.f32 %v3184_v15, %v880_v24 }
 0xc73   :  { %v909_v29 = vmul.f32 %v3186_v3, %v907_v50 }
 0xcd3   :  { %v885_v18 = vpop.permute.xlu1 %884 }
 0xcd4   :  { %v887_v19 = vmul.f32 %v3184_v15, %v885_v18 }
 0xcd6   :  { %889 = vrot.lane.b32.xlu1 %v887_v19, %s3508_s14  ;;  %v912_v20 = vpop.permute.xlu0 %911 }
 0xcd7   :  { %v914_v22 = vmul.f32 %v3186_v3, %v912_v20 }
 0xcd9   :  { %916 = vrot.lane.b32.xlu0 %v914_v22, %s3508_s14 }
 0xd48   :  { %v890_v25 = vpop.permute.xlu1 %889 }
 0xd49   :  { %v892_v26 = vadd.f32 %v890_v25, %v882_v46 }
 0xd4b   :  { %3187 = vtanh.f32 %v892_v26  ;;  %v917_v30 = vpop.permute.xlu0 %916  ;;  %v1026_v4 = vrot.slane %v892_v26, 6 }
 0xd4c   :  { %v919_v31 = vadd.f32 %v917_v30, %v909_v29 }
 0xd4e   :  { %3189 = vtanh.f32 %v919_v31  ;;  %v1053_v6 = vrot.slane %v919_v31, 2 }
 0xd55   :  { %v3188_v33 = vpop.eup %3187 }
 0xd56   :  { %895 = vrot.lane.b32.xlu1 %v3188_v33, %s3507_s4 }
 0xd58   :  { %v3190_v36 = vpop.eup %3189 }
 0xd59   :  { %922 = vrot.lane.b32.xlu0 %v3190_v36, %s3507_s4 }
 0xdc8   :  { %v896_v37 = vpop.permute.xlu1 %895 }
 0xdc9   :  { %v898_v39 = vmul.f32 %v3184_v15, %v896_v37 }
 0xdcb   :  { %927 = vrot.lane.b32.xlu0 %v898_v39, %s3508_s14  ;;  %v923_v42 = vpop.permute.xlu0 %922 }
 0xdcc   :  { %v3836_v43 = vmul.f32 %v3186_v3, %v923_v42 }
 0xdce   :  { %v931_v40 = vrot.slane %v3836_v43, 6 }
 0xdd0   :  { %932 = vrot.lane.b32.xlu1 %v931_v40, %s3507_s4 }
 0xe3d   :  { %v3840_v45 = vpop.permute.xlu0 %927 }
 0xe42   :  { %v933_v47 = vpop.permute.xlu1 %932 }
 0xe43   :  { %v935_v48 = vsel %vm353_vm1, %v3840_v45, %v933_v47 }
 0xe44   :  { %2785 = vmatmul.mubr.msk.f32.vlgmr.msra.gmra.mrb[8].mxu0 %vm216_vm2, %v935_v48 }
 0xe45   :  { %2943 = vmatpush1.bf16.msra.mxu0 %v3629_v8  ;;  %1297 = vmatprep.mubr.f32.mxu0 %v3506_v7 }
 0xe46   :  { %2945 = vmatprep.subr.bf16.mxu0 %v3631_v9 }
 0xe49   :  { %2947 = vmatpush1.bf16.msra.mxu0 %v3635_v16 }
 0xe4a   :  { %2949 = vmatprep.subr.bf16.mxu0 %v3638_v21 }
 0xe4d   :  { %2951 = vmatpush1.bf16.msra.mxu0 %v3644_v27 }
 0xe4e   :  { %2953 = vmatprep.subr.bf16.mxu0 %v3648_v28 }
 0xe51   :  { %2955 = vmatpush1.bf16.msra.mxu0 %v3657_v32 }
 0xf17   :  { %v1005_v51 = vpop.f32.mrb[8].mxu0 }
 0xf18   :  { %v1011_v52 = vrot.slane %v1005_v51, 6  ;;  %v1007_v53 = vpop.f32.mrb[9].mxu0 }
 0xf19   :  { %v1015_v55 = vrot.slane %v1007_v53, 4 }
 0xf1a   :  { %v1013_v8 = vadd.f32 %v1011_v52, %v3694_v44 }
 0xf1b   :  { %v1017_v56 = vadd.f32 %v1015_v55, %v3690_v41 }
 0xf1c   :  { %3191 = vtanh.f32 %v1013_v8  ;;  %v2786_v21 = vmul.f32 -1.442695, %v1013_v8 }
 0xf1d   :  { %3193 = vtanh.f32 %v1017_v56  ;;  %v2787_v27 = vmul.f32 -1.442695, %v1017_v56 }
 0xf1e   :  { %3195 = vpow2.f32 %v2786_v21 }
 0xf1f   :  { %3197 = vpow2.f32 %v2787_v27 }
 0xf26   :  { %v3192_v9 = vpop.eup %3191 }
 0xf27   :  { %v3194_v16 = vpop.eup %3193  ;;  %1030 = vrot.lane.b32.xlu1 %v3192_v9, %s3507_s4 }
 0xf28   :  { %1057 = vrot.lane.b32.xlu0 %v3194_v16, %s3507_s4  ;;  %v3196_v28 = vpop.eup %3195 }
 0xf29   :  { %v3198_v32 = vpop.eup %3197  ;;  %v1021_v57 = vadd.f32 1.0, %v3196_v28 }
 0xf2a   :  { %v1048_v58 = vadd.f32 1.0, %v3198_v32 }
 0xf2b   :  { %3199 = vrcp.f32 %v1021_v57 }
 0xf2c   :  { %3201 = vrcp.f32 %v1048_v58 }
 0xf35   :  { %v3200_v59 = vpop.eup %3199 }
 0xf36   :  { %v3202_v62 = vpop.eup %3201  ;;  %v1028_v11 = vmul.f32 %v3200_v59, %v1026_v4 }
 0xf37   :  { %v1055_v13 = vmul.f32 %v3202_v62, %v1053_v6 }
 0xf99   :  { %v1031_v60 = vpop.permute.xlu1 %1030 }
 0xf9a   :  { %v1033_v0 = vmul.f32 %v3200_v59, %v1031_v60  ;;  %v1058_v1 = vpop.permute.xlu0 %1057 }
 0xf9b   :  { %v1060_v2 = vmul.f32 %v3202_v62, %v1058_v1 }
 0xf9c   :  { %1035 = vrot.lane.b32.xlu1 %v1033_v0, %s3508_s14 }
 0xf9d   :  { %1062 = vrot.lane.b32.xlu0 %v1060_v2, %s3508_s14 }
0x100e   :  { %v1036_v12 = vpop.permute.xlu1 %1035 }
0x100f   :  { %v1038_v14 = vadd.f32 %v1036_v12, %v1028_v11  ;;  %v1063_v15 = vpop.permute.xlu0 %1062 }
0x1010   :  { %v1065_v18 = vadd.f32 %v1063_v15, %v1055_v13 }
0x1011   :  { %3203 = vtanh.f32 %v1038_v14  ;;  %v1173_v32 = vrot.slane %v1038_v14, 6 }
0x1012   :  { %3205 = vtanh.f32 %v1065_v18  ;;  %v1200_v57 = vrot.slane %v1065_v18, 2 }
0x101b   :  { %v3204_v19 = vpop.eup %3203 }
0x101c   :  { %v3206_v3 = vpop.eup %3205  ;;  %1041 = vrot.lane.b32.xlu1 %v3204_v19, %s3507_s4 }
0x101d   :  { %1068 = vrot.lane.b32.xlu0 %v3206_v3, %s3507_s4 }
0x108e   :  { %v1042_v20 = vpop.permute.xlu1 %1041 }
0x108f   :  { %v1044_v22 = vmul.f32 %v3200_v59, %v1042_v20  ;;  %v1069_v24 = vpop.permute.xlu0 %1068 }
0x1090   :  { %v3861_v46 = vmul.f32 %v3202_v62, %v1069_v24 }
0x1091   :  { %1073 = vrot.lane.b32.xlu0 %v1044_v22, %s3508_s14 }
0x1092   :  { %v1077_v50 = vrot.slane %v3861_v46, 2 }
0x1094   :  { %1078 = vrot.lane.b32.xlu1 %v1077_v50, %s3507_s4 }
0x1103   :  { %v3866_v25 = vpop.permute.xlu0 %1073 }
0x1106   :  { %v1079_v26 = vpop.permute.xlu1 %1078 }
0x1107   :  { %v1081_v29 = vsel %vm353_vm1, %v3866_v25, %v1079_v26 }
0x1108   :  { %v1083_v30 = vrot.slane %v1081_v29, 2 }
0x110a   :  { %2788 = vmatmul.mubr.msk.f32.vlgmr.msra.gmra.mrb[6].mxu1 %vm216_vm2, %v1083_v30 }
0x110b   :  { %1507 = vmatprep.mubr.f32.mxu1 %v3506_v7 }
0x11dd   :  { %v1152_v31 = vpop.f32.mrb[6].mxu1 }
0x11de   :  { %v1158_v33 = vrot.slane %v1152_v31, 4  ;;  %v1154_v36 = vpop.f32.mrb[7].mxu1 }
0x11df   :  { %v1162_v37 = vrot.slane %v1154_v36, 6 }
0x11e0   :  { %v1160_v39 = vadd.f32 %v1158_v33, %v3694_v44 }
0x11e1   :  { %v1164_v42 = vadd.f32 %v1162_v37, %v3690_v41 }
0x11e2   :  { %3207 = vtanh.f32 %v1160_v39  ;;  %v2789_v48 = vmul.f32 -1.442695, %v1160_v39 }
0x11e3   :  { %3209 = vtanh.f32 %v1164_v42  ;;  %v2790_v51 = vmul.f32 -1.442695, %v1164_v42 }
0x11e4   :  { %3211 = vpow2.f32 %v2789_v48 }
0x11e5   :  { %3213 = vpow2.f32 %v2790_v51 }
0x11ec   :  { %v3208_v40 = vpop.eup %3207 }
0x11ed   :  { %v3210_v47 = vpop.eup %3209  ;;  %1177 = vrot.lane.b32.xlu1 %v3208_v40, %s3507_s4 }
0x11ee   :  { %1204 = vrot.lane.b32.xlu0 %v3210_v47, %s3507_s4  ;;  %v3212_v52 = vpop.eup %3211 }
0x11ef   :  { %v3214_v53 = vpop.eup %3213  ;;  %v1168_v55 = vadd.f32 1.0, %v3212_v52 }
0x11f0   :  { %v1195_v8 = vadd.f32 1.0, %v3214_v53 }
0x11f1   :  { %3215 = vrcp.f32 %v1168_v55 }
0x11f2   :  { %3217 = vrcp.f32 %v1195_v8 }
0x11fb   :  { %v3216_v56 = vpop.eup %3215 }
0x11fc   :  { %v3218_v16 = vpop.eup %3217  ;;  %v1175_v58 = vmul.f32 %v3216_v56, %v1173_v32  ;;  %v1410_v32 = vld [vmem:[#allocation10 + $0x8] sm:$0xff] }
0x11fd   :  { %v1202_v60 = vmul.f32 %v3218_v16, %v1200_v57  ;;  %v1412_v57 = vld [vmem:[#allocation10 + $0x18] sm:$0xff] }
0x125f   :  { %v1178_v9 = vpop.permute.xlu1 %1177 }
0x1260   :  { %v1180_v21 = vmul.f32 %v3216_v56, %v1178_v9  ;;  %v1205_v27 = vpop.permute.xlu0 %1204 }
0x1261   :  { %v1207_v28 = vmul.f32 %v3218_v16, %v1205_v27 }
0x1262   :  { %1182 = vrot.lane.b32.xlu1 %v1180_v21, %s3508_s14 }
0x1263   :  { %1209 = vrot.lane.b32.xlu0 %v1207_v28, %s3508_s14 }
0x12d4   :  { %v1183_v59 = vpop.permute.xlu1 %1182 }
0x12d5   :  { %v1185_v62 = vadd.f32 %v1183_v59, %v1175_v58  ;;  %v1210_v0 = vpop.permute.xlu0 %1209  ;;  %v1409_v58 = vld [vmem:[#allocation10] sm:$0xff]  ;;  %v2956_v59 = vpack.c.bf16 %v1412_v57, %v1410_v32 }
0x12d6   :  { %v1212_v1 = vadd.f32 %v1210_v0, %v1202_v60  ;;  %v1411_v60 = vld [vmem:[#allocation10 + $0x10] sm:$0xff]  ;;  %v1523_v0 = vld [vmem:[#allocation11 + $0x18] sm:$0xff] }
0x12d7   :  { %3219 = vtanh.f32 %v1185_v62  ;;  %v1317_v53 = vrot.slane %v1185_v62, 6  ;;  %v1521_v62 = vld [vmem:[#allocation11 + $0x8] sm:$0xff]  ;;  %2957 = vmatprep.subr.bf16.mxu1 %v2956_v59 }
0x12d8   :  { %3221 = vtanh.f32 %v1212_v1  ;;  %v1344_v52 = vrot.slane %v1212_v1, 2  ;;  %v2958_v1 = vpack.c.bf16 %v1411_v60, %v1409_v58 }
0x12da   :  { %2959 = vmatpush1.bf16.msra.mxu1 %v2958_v1 }
0x12e1   :  { %v3220_v2 = vpop.eup %3219 }
0x12e2   :  { %v3222_v4 = vpop.eup %3221  ;;  %1188 = vrot.lane.b32.xlu1 %v3220_v2, %s3507_s4  ;;  %v3907_v2 = vpack.c.bf16 %v1523_v0, %v1521_v62 }
0x12e3   :  { %1215 = vrot.lane.b32.xlu0 %v3222_v4, %s3507_s4  ;;  %v1520_v4 = vld [vmem:[#allocation11] sm:$0xff] }
0x12e4   :  { %2973 = vmatprep.subr.bf16.mxu0 %v3907_v2 }
0x1354   :  { %v1189_v6 = vpop.permute.xlu1 %1188 }
0x1355   :  { %v1191_v11 = vmul.f32 %v3216_v56, %v1189_v6  ;;  %v1216_v12 = vpop.permute.xlu0 %1215  ;;  %v1522_v6 = vld [vmem:[#allocation11 + $0x10] sm:$0xff] }
0x1356   :  { %v3880_v13 = vmul.f32 %v3218_v16, %v1216_v12  ;;  %v3911_v12 = vpack.c.bf16 %v1522_v6, %v1520_v4 }
0x1357   :  { %1220 = vrot.lane.b32.xlu0 %v1191_v11, %s3508_s14  ;;  %v1414_v11 = vld [vmem:[#allocation10 + $0x28] sm:$0xff] }
0x1358   :  { %v1224_v14 = vrot.slane %v3880_v13, 6 }
0x135a   :  { %1225 = vrot.lane.b32.xlu1 %v1224_v14, %s3507_s4  ;;  %v1416_v14 = vld [vmem:[#allocation10 + $0x38] sm:$0xff] }
0x13c9   :  { %v3885_v15 = vpop.permute.xlu0 %1220 }
0x13cc   :  { %v1226_v18 = vpop.permute.xlu1 %1225 }
0x13cd   :  { %v1228_v19 = vsel %vm353_vm1, %v3885_v15, %v1226_v18  ;;  %v1413_v18 = vld [vmem:[#allocation10 + $0x20] sm:$0xff] }
0x13ce   :  { %v1230_v3 = vrot.slane %v1228_v19, 4  ;;  %v1415_v19 = vld [vmem:[#allocation10 + $0x30] sm:$0xff] }
0x13d0   :  { %2791 = vmatmul.mubr.msk.f32.vlgmr.msra.gmra.mrb[10].mxu0 %vm216_vm2, %v1230_v3  ;;  %v2960_v3 = vpack.c.bf16 %v1416_v14, %v1414_v11 }
0x13d1   :  { %1600 = vmatprep.mubr.f32.mxu0 %v3506_v7  ;;  %2975 = vmatpush1.bf16.msra.mxu0 %v3911_v12 }
0x13d2   :  { %2961 = vmatprep.subr.bf16.mxu1 %v2960_v3 }
0x14a3   :  { %v1299_v20 = vpop.f32.mrb[10].mxu0 }
0x14a4   :  { %v1305_v22 = vrot.slane %v1299_v20, 2  ;;  %v1301_v24 = vpop.f32.mrb[11].mxu0  ;;  %v2962_v20 = vpack.c.bf16 %v1415_v19, %v1413_v18 }
0x14a5   :  { %v1308_v50 = vadd.f32 %v1301_v24, %v3690_v41  ;;  %v1527_v24 = vld [vmem:[#allocation11 + $0x38] sm:$0xff] }
0x14a6   :  { %v1307_v26 = vadd.f32 %v1305_v22, %v3694_v44  ;;  %v1525_v22 = vld [vmem:[#allocation11 + $0x28] sm:$0xff]  ;;  %2963 = vmatpush1.bf16.msra.mxu1 %v2962_v20 }
0x14a7   :  { %3223 = vtanh.f32 %v1308_v50  ;;  %v2793_v31 = vmul.f32 -1.442695, %v1308_v50  ;;  %v1524_v50 = vld [vmem:[#allocation11 + $0x20] sm:$0xff] }
0x14a8   :  { %3225 = vtanh.f32 %v1307_v26  ;;  %v2792_v33 = vmul.f32 -1.442695, %v1307_v26  ;;  %v3916_v26 = vpack.c.bf16 %v1527_v24, %v1525_v22  ;;  %v1425_v24 = vld [vmem:[%s4261_s7] sm:$0x3]  ;;  %s2734_s7 = sld [smem:[#allocation3]] }
0x14a9   :  { %3227 = vpow2.f32 %v2793_v31 }
0x14aa   :  { %3229 = vpow2.f32 %v2792_v33  ;;  %2977 = vmatprep.subr.bf16.mxu0 %v3916_v26 }
0x14ae   :  { %s2819_s19 = sadd.s32 4294967295, %s2734_s7 }
0x14af   :  { %s2820_s21 = sshll.u32 %s2819_s19, 1 }
0x14b0   :  { %s2737_s24 = scalar_lea.vmem [#allocation2], %s2820_s21 }
0x14b1   :  { %v3224_v29 = vpop.eup %3223 }
0x14b2   :  { %v3226_v30 = vpop.eup %3225  ;;  %1348 = vrot.lane.b32.xlu0 %v3224_v29, %s3507_s4  ;;  %v1418_v29 = vld [vmem:[#allocation10 + $0x48] sm:$0xff] }
0x14b3   :  { %1321 = vrot.lane.b32.xlu1 %v3226_v30, %s3507_s4  ;;  %v3228_v36 = vpop.eup %3227  ;;  %v1420_v30 = vld [vmem:[#allocation10 + $0x58] sm:$0xff] }
0x14b4   :  { %v3230_v37 = vpop.eup %3229  ;;  %v1339_v39 = vadd.f32 1.0, %v3228_v36  ;;  %v2964_v33 = vpack.c.bf16 %v1420_v30, %v1418_v29  ;;  %v1419_v36 = vld [vmem:[#allocation10 + $0x50] sm:$0xff] }
0x14b5   :  { %v1312_v42 = vadd.f32 1.0, %v3230_v37  ;;  %v1529_v37 = vld [vmem:[#allocation11 + $0x48] sm:$0xff] }
0x14b6   :  { %3231 = vrcp.f32 %v1339_v39  ;;  %v1531_v39 = vld [vmem:[#allocation11 + $0x58] sm:$0xff]  ;;  %2965 = vmatprep.subr.bf16.mxu1 %v2964_v33 }
0x14b7   :  { %3233 = vrcp.f32 %v1312_v42  ;;  %v1528_v42 = vld [vmem:[#allocation11 + $0x40] sm:$0xff] }
0x14c0   :  { %v3895_v41 = vpop.eup %3231 }
0x14c1   :  { %v3897_v40 = vpop.eup %3233  ;;  %v1346_v55 = vmul.f32 %v3895_v41, %v1344_v52  ;;  %v1424_v52 = vld [vmem:[#allocation10 + $0x78] sm:$0xff] }
0x14c2   :  { %v1319_v56 = vmul.f32 %v3897_v40, %v1317_v53  ;;  %v1421_v53 = vld [vmem:[#allocation10 + $0x60] sm:$0xff] }
0x1524   :  { %v1349_v44 = vpop.permute.xlu0 %1348 }
0x1525   :  { %v1351_v47 = vmul.f32 %v3895_v41, %v1349_v44  ;;  %v1322_v48 = vpop.permute.xlu1 %1321  ;;  %v1530_v44 = vld [vmem:[#allocation11 + $0x50] sm:$0xff] }
0x1526   :  { %v1324_v51 = vmul.f32 %v3897_v40, %v1322_v48  ;;  %v3926_v48 = vpack.c.bf16 %v1531_v39, %v1529_v37 }
0x1527   :  { %1353 = vrot.lane.b32.xlu0 %v1351_v47, %s3508_s14 }
0x1528   :  { %1326 = vrot.lane.b32.xlu1 %v1324_v51, %s3508_s14  ;;  %v3929_v51 = vpack.c.bf16 %v1530_v44, %v1528_v42 }
0x1599   :  { %v1354_v8 = vpop.permute.xlu0 %1353 }
0x159a   :  { %v1356_v9 = vadd.f32 %v1354_v8, %v1346_v55  ;;  %v1327_v16 = vpop.permute.xlu1 %1326  ;;  %v1423_v55 = vld [vmem:[#allocation10 + $0x70] sm:$0xff] }
0x159b   :  { %v1329_v21 = vadd.f32 %v1327_v16, %v1319_v56  ;;  %v2970_v8 = vpack.c.bf16 %v1423_v55, %v1421_v53  ;;  %v1533_v56 = vld [vmem:[#allocation11 + $0x68] sm:$0xff] }
0x159c   :  { %3235 = vtanh.f32 %v1356_v9  ;;  %v1535_v9 = vld [vmem:[#allocation11 + $0x78] sm:$0xff] }
0x159d   :  { %3237 = vtanh.f32 %v1329_v21  ;;  %v3935_v16 = vpack.c.bf16 %v1535_v9, %v1533_v56  ;;  %v1532_v21 = vld [vmem:[#allocation11 + $0x60] sm:$0xff] }
0x15a6   :  { %v3236_v27 = vpop.eup %3235 }
0x15a7   :  { %v3238_v28 = vpop.eup %3237  ;;  %1359 = vrot.lane.b32.xlu0 %v3236_v27, %s3507_s4  ;;  %v1534_v27 = vld [vmem:[#allocation11 + $0x70] sm:$0xff] }
0x15a8   :  { %1332 = vrot.lane.b32.xlu1 %v3238_v28, %s3507_s4  ;;  %v3937_v28 = vpack.c.bf16 %v1534_v27, %v1532_v21 }
0x15ab   :  { %1372 = vrot.lane.b32.xlu0 %v3861_v46, %s3507_s4  ;;  %v1526_v46 = vld [vmem:[#allocation11 + $0x30] sm:$0xff] }
0x15ac   :  { %1368 = vrot.lane.b32.xlu1 %v3880_v13, %s3507_s4  ;;  %v3919_v31 = vpack.c.bf16 %v1526_v46, %v1524_v50  ;;  %v1417_v13 = vld [vmem:[#allocation10 + $0x40] sm:$0xff]  ;;  %v1430_v50 = vrot.slane %v1425_v24, %v108_v38  ;;  %v1434_v46 = vrot.slane %v1425_v24, %v112_v35 }
0x15ad   :  { %v2966_v47 = vpack.c.bf16 %v1419_v36, %v1417_v13 }
0x15ae   :  { %2979 = vmatpush1.bf16.msra.mxu0 %v3919_v31 }
0x15af   :  { %1380 = vrot.lane.b32.xlu0 %v3808_v49, %s3507_s4  ;;  %2981 = vmatprep.subr.bf16.mxu0 %v3926_v48  ;;  %v1422_v49 = vld [vmem:[#allocation10 + $0x68] sm:$0xff] }
0x15b0   :  { %1376 = vrot.lane.b32.xlu1 %v3836_v43, %s3507_s4  ;;  %2967 = vmatpush1.bf16.msra.mxu1 %v2966_v47  ;;  %v2968_v43 = vpack.c.bf16 %v1424_v52, %v1422_v49 }
0x15b2   :  { %2983 = vmatpush1.bf16.msra.mxu0 %v3929_v51  ;;  %2969 = vmatprep.subr.bf16.mxu1 %v2968_v43 }
0x15b3   :  { %2985 = vmatprep.subr.bf16.mxu0 %v3935_v16 }
0x15b4   :  { %1384 = vrot.lane.b32.xlu1 %v3777_v61, %s3507_s4  ;;  %2971 = vmatpush1.bf16.msra.mxu1 %v2970_v8 }
0x15b5   :  { %2989 = vmatprep.subr.bf16.mxu1 %v3907_v2 }
0x15b6   :  { %2987 = vmatpush1.bf16.msra.mxu0 %v3937_v28 }
0x15b7   :  { %3005 = vmatprep.subr.bf16.mxu0 %v3907_v2 }
0x15b9   :  { %1601 = vmatmul.mubr.f32.vlgmr.msra.gmra.mrb[12].mxu0 %v3506_v7 }
0x15ba   :  { %3007 = vmatpush1.bf16.msra.mxu0 %v3911_v12  ;;  %1884 = vmatprep.mubr.f32.mxu0 %v3506_v7 }
0x15bb   :  { %3009 = vmatprep.subr.bf16.mxu0 %v3916_v26 }
0x15be   :  { %3011 = vmatpush1.bf16.msra.mxu0 %v3919_v31 }
0x15bf   :  { %3013 = vmatprep.subr.bf16.mxu0 %v3926_v48 }
0x15c2   :  { %3015 = vmatpush1.bf16.msra.mxu0 %v3929_v51 }
0x15c3   :  { %3017 = vmatprep.subr.bf16.mxu0 %v3935_v16 }
0x15c6   :  { %3019 = vmatpush1.bf16.msra.mxu0 %v3937_v28 }
0x15c7   :  { %3037 = vmatprep.subr.bf16.mxu0 %v3907_v2 }
0x1619   :  { %v1360_v61 = vpop.permute.xlu0 %1359 }
0x161a   :  { %v1362_v32 = vmul.f32 %v3895_v41, %v1360_v61  ;;  %v1333_v57 = vpop.permute.xlu1 %1332 }
0x161b   :  { %v1335_v58 = vmul.f32 %v3897_v40, %v1333_v57 }
0x161c   :  { %1364 = vrot.lane.b32.xlu0 %v1362_v32, %s3507_s4 }
0x161d   :  { %1393 = vrot.lane.b32.xlu1 %v1335_v58, %s3508_s14  ;;  %v1373_v41 = vpop.permute.xlu0 %1372 }
0x161e   :  { %v1369_v40 = vpop.permute.xlu1 %1368  ;;  %v1375_v1 = vsel %vm353_vm1, %v3782_v63, %v1373_v41 }
0x161f   :  { %v1371_v0 = vsel %vm353_vm1, %v3750_v10, %v1369_v40 }
0x1620   :  { %1388 = vrot.lane.b32.xlu0 %v3745_v5, %s3507_s4 }
0x1621   :  { %v1381_v59 = vpop.permute.xlu0 %1380 }
0x1622   :  { %v1377_v60 = vpop.permute.xlu1 %1376  ;;  %v1383_v63 = vsel %vm353_vm1, %v3840_v45, %v1381_v59 }
0x1623   :  { %v1379_v6 = vsel %vm353_vm1, %v3813_v54, %v1377_v60 }
0x1624   :  { %1396 = vrot.lane.b32.xlu0 %v3711_v17, %s3507_s4 }
0x1626   :  { %v1385_v4 = vpop.permute.xlu1 %1384 }
0x1627   :  { %v1387_v10 = vsel %vm353_vm1, %v3866_v25, %v1385_v4 }
0x1628   :  { %v1406_v54 = vsel %vm1400_vm4, %v1383_v63, %v1387_v10 }
0x168c   :  { %v1602_v45 = vpop.f32.mrb[12].mxu0 }
0x168e   :  { %v1365_v62 = vpop.permute.xlu0 %1364 }
0x168f   :  { %v1367_v5 = vsel %vm353_vm1, %v3716_v23, %v1365_v62  ;;  %v1394_v19 = vpop.permute.xlu1 %1393 }
0x1690   :  { %v1401_v17 = vsel %vm1400_vm4, %v1367_v5, %v1371_v0 }
0x1691   :  { %v1403_v11 = vsel %vm1402_vm3, %v1401_v17, %v1375_v1 }
0x1692   :  { %v1389_v14 = vpop.permute.xlu0 %1388  ;;  %v1405_v18 = vsel %vm1404_vm5, %v1403_v11, %v1379_v6 }
0x1693   :  { %2794 = vmatmul.mubr.msk.f32.vlgmr.msra.gmra.mrb[8].mxu1 %vm216_vm2, %v1405_v18  ;;  %v1391_v23 = vsel %vm353_vm1, %v3885_v15, %v1389_v14  ;;  %v1604_v15 = vpop.f32.mrb[13].mxu0 }
0x1694   :  { %1513 = vmatprep.mubr.f32.mxu1 %v3506_v7  ;;  %2991 = vmatpush1.bf16.msra.mxu1 %v3911_v12  ;;  %v1407_v25 = vsel %vm1402_vm3, %v1406_v54, %v1391_v23  ;;  %v1609_v39 = vrot.slane %v1604_v15, 2 }
0x1695   :  { %2993 = vmatprep.subr.bf16.mxu1 %v3916_v26 }
0x1696   :  { %v1397_v3 = vpop.permute.xlu0 %1396 }
0x1697   :  { %v1399_v20 = vsel %vm353_vm1, %v1394_v19, %v1397_v3 }
0x1698   :  { %v1408_v22 = vsel %vm1404_vm5, %v1407_v25, %v1399_v20  ;;  %2995 = vmatpush1.bf16.msra.mxu1 %v3919_v31 }
0x1699   :  { %2795 = vmatmul.mubr.msk.f32.gmra.mrb[10].mxu1 %vm216_vm2, %v1408_v22  ;;  %2997 = vmatprep.subr.bf16.mxu1 %v3926_v48 }
0x169a   :  { %1737 = vmatprep.mubr.f32.mxu1 %v3506_v7 }
0x169c   :  { %2999 = vmatpush1.bf16.msra.mxu1 %v3929_v51 }
0x169d   :  { %3001 = vmatprep.subr.bf16.mxu1 %v3935_v16 }
0x16a0   :  { %3003 = vmatpush1.bf16.msra.mxu1 %v3937_v28 }
0x16a1   :  { %3021 = vmatprep.subr.bf16.mxu1 %v3907_v2 }
0x1766   :  { %v1509_v29 = vpop.f32.mrb[8].mxu1 }
0x1767   :  { %v4001_v30 = vadd.f32 %v1509_v29, %v1430_v50  ;;  %v1511_v33 = vpop.f32.mrb[9].mxu1 }
0x1768   :  { %v4003_v13 = vadd.f32 %v1511_v33, %v1434_v46 }
0x1769   :  { %v1607_v36 = vadd.f32 %v1602_v45, %v4001_v30 }
0x176b   :  { %3239 = vtanh.f32 %v1607_v36  ;;  %v2796_v49 = vmul.f32 -1.442695, %v1607_v36 }
0x176c   :  { %v1515_v37 = vpop.f32.mrb[10].mxu1 }
0x176d   :  { %v4006_v42 = vadd.f32 %v1515_v37, %v1430_v50  ;;  %v1517_v44 = vpop.f32.mrb[11].mxu1 }
0x176e   :  { %v4008_v47 = vadd.f32 %v1517_v44, %v1434_v46 }
0x1770   :  { %v1611_v38 = vadd.f32 %v1609_v39, %v4008_v47 }
0x1772   :  { %3241 = vtanh.f32 %v1611_v38  ;;  %v2797_v52 = vmul.f32 -1.442695, %v1611_v38 }
0x1773   :  { %3243 = vpow2.f32 %v2796_v49 }
0x1774   :  { %3245 = vpow2.f32 %v2797_v52 }
0x1775   :  { %v3240_v34 = vpop.eup %3239 }
0x1776   :  { %1621 = vrot.lane.b32.xlu0 %v3240_v34, %s3507_s4 }
0x177c   :  { %v3242_v35 = vpop.eup %3241 }
0x177d   :  { %1645 = vrot.lane.b32.xlu1 %v3242_v35, %s3507_s4  ;;  %v3244_v43 = vpop.eup %3243 }
0x177e   :  { %v1615_v53 = vadd.f32 1.0, %v3244_v43  ;;  %v3246_v55 = vpop.eup %3245 }
0x177f   :  { %v1639_v8 = vadd.f32 1.0, %v3246_v55 }
0x1780   :  { %3247 = vrcp.f32 %v1615_v53 }
0x1781   :  { %3249 = vrcp.f32 %v1639_v8 }
0x178a   :  { %v3248_v56 = vpop.eup %3247 }
0x178b   :  { %v3250_v27 = vpop.eup %3249  ;;  %v1619_v57 = vmul.f32 0.0, %v3248_v56 }
0x178c   :  { %v1643_v40 = vmul.f32 0.0, %v3250_v27 }
0x17e8   :  { %v1622_v9 = vpop.permute.xlu0 %1621 }
0x17e9   :  { %v1624_v21 = vmul.f32 %v3248_v56, %v1622_v9 }
0x17eb   :  { %1626 = vrot.lane.b32.xlu0 %v1624_v21, %s3508_s14 }
0x17ef   :  { %v1646_v61 = vpop.permute.xlu1 %1645 }
0x17f0   :  { %v1648_v32 = vmul.f32 %v3250_v27, %v1646_v61 }
0x17f2   :  { %1650 = vrot.lane.b32.xlu1 %v1648_v32, %s3508_s14 }
0x185d   :  { %v1627_v58 = vpop.permute.xlu0 %1626 }
0x185e   :  { %v4015_v41 = vadd.f32 %v1627_v58, %v1619_v57 }
0x1860   :  { %3251 = vtanh.f32 %v4015_v41  ;;  %v1760_v38 = vrot.slane %v4015_v41, 6 }
0x1864   :  { %v1651_v59 = vpop.permute.xlu1 %1650 }
0x1865   :  { %v1653_v60 = vadd.f32 %v1651_v59, %v1643_v40 }
0x1867   :  { %3253 = vtanh.f32 %v1653_v60  ;;  %v1787_v34 = vrot.slane %v1653_v60, 2 }
0x186a   :  { %v3252_v62 = vpop.eup %3251 }
0x186b   :  { %1632 = vrot.lane.b32.xlu0 %v3252_v62, %s3507_s4 }
0x1871   :  { %v3254_v0 = vpop.eup %3253 }
0x1872   :  { %1656 = vrot.lane.b32.xlu1 %v3254_v0, %s3507_s4 }
0x18dd   :  { %v1633_v5 = vpop.permute.xlu0 %1632 }
0x18de   :  { %v1635_v1 = vmul.f32 %v3248_v56, %v1633_v5 }
0x18e0   :  { %1661 = vrot.lane.b32.xlu1 %v1635_v1, %s3508_s14 }
0x18e4   :  { %v1657_v4 = vpop.permute.xlu1 %1656 }
0x18e5   :  { %v4021_v17 = vmul.f32 %v3250_v27, %v1657_v4 }
0x18e7   :  { %v1665_v6 = vrot.slane %v4021_v17, 6 }
0x18e9   :  { %1666 = vrot.lane.b32.xlu0 %v1665_v6, %s3507_s4 }
0x1952   :  { %v4025_v11 = vpop.permute.xlu1 %1661 }
0x195b   :  { %v1667_v14 = vpop.permute.xlu0 %1666 }
0x195c   :  { %v1669_v18 = vsel %vm353_vm1, %v4025_v11, %v1667_v14 }
0x195d   :  { %2798 = vmatmul.mubr.msk.f32.vlgmr.msra.gmra.mrb[12].mxu1 %vm216_vm2, %v1669_v18 }
0x195e   :  { %3023 = vmatpush1.bf16.msra.mxu1 %v3911_v12  ;;  %2031 = vmatprep.mubr.f32.mxu1 %v3506_v7 }
0x195f   :  { %3025 = vmatprep.subr.bf16.mxu1 %v3916_v26 }
0x1962   :  { %3027 = vmatpush1.bf16.msra.mxu1 %v3919_v31 }
0x1963   :  { %3029 = vmatprep.subr.bf16.mxu1 %v3926_v48 }
0x1966   :  { %3031 = vmatpush1.bf16.msra.mxu1 %v3929_v51 }
0x1967   :  { %3033 = vmatprep.subr.bf16.mxu1 %v3935_v16 }
0x196a   :  { %3035 = vmatpush1.bf16.msra.mxu1 %v3937_v28 }
0x196b   :  { %3053 = vmatprep.subr.bf16.mxu1 %v3907_v2 }
0x1a30   :  { %v1739_v10 = vpop.f32.mrb[12].mxu1 }
0x1a31   :  { %v1745_v23 = vrot.slane %v1739_v10, 6  ;;  %v1741_v63 = vpop.f32.mrb[13].mxu1 }
0x1a32   :  { %v1749_v54 = vrot.slane %v1741_v63, 4 }
0x1a33   :  { %v1747_v19 = vadd.f32 %v1745_v23, %v4001_v30 }
0x1a34   :  { %v1751_v3 = vadd.f32 %v1749_v54, %v4008_v47 }
0x1a35   :  { %3255 = vtanh.f32 %v1747_v19  ;;  %v2799_v22 = vmul.f32 -1.442695, %v1747_v19 }
0x1a36   :  { %3257 = vtanh.f32 %v1751_v3  ;;  %v2800_v45 = vmul.f32 -1.442695, %v1751_v3 }
0x1a37   :  { %3259 = vpow2.f32 %v2799_v22 }
0x1a38   :  { %3261 = vpow2.f32 %v2800_v45 }
0x1a3f   :  { %v3256_v25 = vpop.eup %3255 }
0x1a40   :  { %v3258_v20 = vpop.eup %3257  ;;  %1764 = vrot.lane.b32.xlu0 %v3256_v25, %s3507_s4 }
0x1a41   :  { %1791 = vrot.lane.b32.xlu1 %v3258_v20, %s3507_s4  ;;  %v3260_v15 = vpop.eup %3259 }
0x1a42   :  { %v3262_v24 = vpop.eup %3261  ;;  %v1755_v50 = vadd.f32 1.0, %v3260_v15 }
0x1a43   :  { %v1782_v46 = vadd.f32 1.0, %v3262_v24 }
0x1a44   :  { %3263 = vrcp.f32 %v1755_v50 }
0x1a45   :  { %3265 = vrcp.f32 %v1782_v46 }
0x1a4e   :  { %v3264_v29 = vpop.eup %3263 }
0x1a4f   :  { %v3266_v36 = vpop.eup %3265  ;;  %v1762_v35 = vmul.f32 %v3264_v29, %v1760_v38 }
0x1a50   :  { %v1789_v52 = vmul.f32 %v3266_v36, %v1787_v34 }
0x1ab2   :  { %v1765_v33 = vpop.permute.xlu0 %1764 }
0x1ab3   :  { %v1767_v37 = vmul.f32 %v3264_v29, %v1765_v33  ;;  %v1792_v39 = vpop.permute.xlu1 %1791 }
0x1ab4   :  { %v1794_v44 = vmul.f32 %v3266_v36, %v1792_v39 }
0x1ab5   :  { %1769 = vrot.lane.b32.xlu0 %v1767_v37, %s3508_s14 }
0x1ab6   :  { %1796 = vrot.lane.b32.xlu1 %v1794_v44, %s3508_s14 }
0x1b27   :  { %v1770_v49 = vpop.permute.xlu0 %1769 }
0x1b28   :  { %v4046_v43 = vadd.f32 %v1770_v49, %v1762_v35  ;;  %v1797_v53 = vpop.permute.xlu1 %1796 }
0x1b29   :  { %v4048_v55 = vadd.f32 %v1797_v53, %v1789_v52 }
0x1b2a   :  { %3267 = vtanh.f32 %v4046_v43  ;;  %v1907_v15 = vrot.slane %v4046_v43, 6 }
0x1b2b   :  { %3269 = vtanh.f32 %v4048_v55  ;;  %v1934_v24 = vrot.slane %v4048_v55, 2 }
0x1b34   :  { %v3268_v8 = vpop.eup %3267 }
0x1b35   :  { %v3270_v56 = vpop.eup %3269  ;;  %1775 = vrot.lane.b32.xlu0 %v3268_v8, %s3507_s4 }
0x1b36   :  { %1802 = vrot.lane.b32.xlu1 %v3270_v56, %s3507_s4 }
0x1ba7   :  { %v1776_v9 = vpop.permute.xlu0 %1775 }
0x1ba8   :  { %v1778_v21 = vmul.f32 %v3264_v29, %v1776_v9  ;;  %v1803_v27 = vpop.permute.xlu1 %1802 }
0x1ba9   :  { %v4054_v61 = vmul.f32 %v3266_v36, %v1803_v27 }
0x1baa   :  { %1807 = vrot.lane.b32.xlu1 %v1778_v21, %s3508_s14 }
0x1bab   :  { %v1811_v32 = vrot.slane %v4054_v61, 2 }
0x1bad   :  { %1812 = vrot.lane.b32.xlu0 %v1811_v32, %s3507_s4 }
0x1c1c   :  { %v4059_v57 = vpop.permute.xlu1 %1807 }
0x1c1f   :  { %v1813_v58 = vpop.permute.xlu0 %1812 }
0x1c20   :  { %v1815_v41 = vsel %vm353_vm1, %v4059_v57, %v1813_v58 }
0x1c21   :  { %v1817_v40 = vrot.slane %v1815_v41, 2 }
0x1c23   :  { %2801 = vmatmul.mubr.msk.f32.vlgmr.msra.gmra.mrb[14].mxu0 %vm216_vm2, %v1817_v40 }
0x1c24   :  { %3039 = vmatpush1.bf16.msra.mxu0 %v3911_v12  ;;  %2175 = vmatprep.mubr.f32.mxu0 %v3506_v7 }
0x1c25   :  { %3041 = vmatprep.subr.bf16.mxu0 %v3916_v26 }
0x1c28   :  { %3043 = vmatpush1.bf16.msra.mxu0 %v3919_v31 }
0x1c29   :  { %3045 = vmatprep.subr.bf16.mxu0 %v3926_v48 }
0x1c2c   :  { %3047 = vmatpush1.bf16.msra.mxu0 %v3929_v51 }
0x1c2d   :  { %3049 = vmatprep.subr.bf16.mxu0 %v3935_v16 }
0x1c30   :  { %3051 = vmatpush1.bf16.msra.mxu0 %v3937_v28 }
0x1c31   :  { %3069 = vmatprep.subr.bf16.mxu0 %v3907_v2 }
0x1cf6   :  { %v1886_v59 = vpop.f32.mrb[14].mxu0 }
0x1cf7   :  { %v1892_v60 = vrot.slane %v1886_v59, 4  ;;  %v1888_v62 = vpop.f32.mrb[15].mxu0 }
0x1cf8   :  { %v1896_v0 = vrot.slane %v1888_v62, 6 }
0x1cf9   :  { %v1894_v5 = vadd.f32 %v1892_v60, %v4001_v30 }
0x1cfa   :  { %v1898_v1 = vadd.f32 %v1896_v0, %v4008_v47 }
0x1cfb   :  { %3271 = vtanh.f32 %v1894_v5  ;;  %v2802_v14 = vmul.f32 -1.442695, %v1894_v5 }
0x1cfc   :  { %3273 = vtanh.f32 %v1898_v1  ;;  %v2803_v18 = vmul.f32 -1.442695, %v1898_v1 }
0x1cfd   :  { %3275 = vpow2.f32 %v2802_v14 }
0x1cfe   :  { %3277 = vpow2.f32 %v2803_v18 }
0x1d05   :  { %v3272_v4 = vpop.eup %3271 }
0x1d06   :  { %v3274_v6 = vpop.eup %3273  ;;  %1911 = vrot.lane.b32.xlu0 %v3272_v4, %s3507_s4 }
0x1d07   :  { %1938 = vrot.lane.b32.xlu1 %v3274_v6, %s3507_s4  ;;  %v3276_v10 = vpop.eup %3275 }
0x1d08   :  { %v3278_v23 = vpop.eup %3277  ;;  %v1902_v63 = vadd.f32 1.0, %v3276_v10 }
0x1d09   :  { %v1929_v54 = vadd.f32 1.0, %v3278_v23 }
0x1d0a   :  { %3279 = vrcp.f32 %v1902_v63 }
0x1d0b   :  { %3281 = vrcp.f32 %v1929_v54 }
0x1d14   :  { %v3280_v19 = vpop.eup %3279 }
0x1d15   :  { %v3282_v25 = vpop.eup %3281  ;;  %v1909_v50 = vmul.f32 %v3280_v19, %v1907_v15 }
0x1d16   :  { %v1936_v29 = vmul.f32 %v3282_v25, %v1934_v24 }
0x1d78   :  { %v1912_v3 = vpop.permute.xlu0 %1911 }
0x1d79   :  { %v1914_v20 = vmul.f32 %v3280_v19, %v1912_v3  ;;  %v1939_v22 = vpop.permute.xlu1 %1938 }
0x1d7a   :  { %v1941_v45 = vmul.f32 %v3282_v25, %v1939_v22 }
0x1d7b   :  { %1916 = vrot.lane.b32.xlu0 %v1914_v20, %s3508_s14 }
0x1d7c   :  { %1943 = vrot.lane.b32.xlu1 %v1941_v45, %s3508_s14 }
0x1ded   :  { %v1917_v46 = vpop.permute.xlu0 %1916 }
0x1dee   :  { %v4081_v33 = vadd.f32 %v1917_v46, %v1909_v50  ;;  %v1944_v36 = vpop.permute.xlu1 %1943 }
0x1def   :  { %v1946_v37 = vadd.f32 %v1944_v36, %v1936_v29 }
0x1df0   :  { %3283 = vtanh.f32 %v4081_v33  ;;  %v2051_v18 = vrot.slane %v4081_v33, 6 }
0x1df1   :  { %3285 = vtanh.f32 %v1946_v37  ;;  %v2078_v14 = vrot.slane %v1946_v37, 2 }
0x1dfa   :  { %v3284_v39 = vpop.eup %3283 }
0x1dfb   :  { %v3286_v44 = vpop.eup %3285  ;;  %1922 = vrot.lane.b32.xlu0 %v3284_v39, %s3507_s4 }
0x1dfc   :  { %1949 = vrot.lane.b32.xlu1 %v3286_v44, %s3507_s4 }
0x1e6d   :  { %v1923_v38 = vpop.permute.xlu0 %1922 }
0x1e6e   :  { %v1925_v34 = vmul.f32 %v3280_v19, %v1923_v38  ;;  %v1950_v35 = vpop.permute.xlu1 %1949 }
0x1e6f   :  { %v4086_v49 = vmul.f32 %v3282_v25, %v1950_v35 }
0x1e70   :  { %1954 = vrot.lane.b32.xlu1 %v1925_v34, %s3508_s14 }
0x1e71   :  { %v1958_v52 = vrot.slane %v4086_v49, 6 }
0x1e73   :  { %1959 = vrot.lane.b32.xlu0 %v1958_v52, %s3507_s4 }
0x1ee2   :  { %v4091_v43 = vpop.permute.xlu1 %1954 }
0x1ee5   :  { %v1960_v53 = vpop.permute.xlu0 %1959 }
0x1ee6   :  { %v1962_v55 = vsel %vm353_vm1, %v4091_v43, %v1960_v53 }
0x1ee7   :  { %v1964_v8 = vrot.slane %v1962_v55, 4 }
0x1ee9   :  { %2804 = vmatmul.mubr.msk.f32.vlgmr.msra.gmra.mrb[14].mxu1 %vm216_vm2, %v1964_v8 }
0x1eea   :  { %3055 = vmatpush1.bf16.msra.mxu1 %v3911_v12  ;;  %2318 = vmatprep.mubr.f32.mxu1 %v3506_v7 }
0x1eeb   :  { %3057 = vmatprep.subr.bf16.mxu1 %v3916_v26 }
0x1eee   :  { %3059 = vmatpush1.bf16.msra.mxu1 %v3919_v31 }
0x1eef   :  { %3061 = vmatprep.subr.bf16.mxu1 %v3926_v48 }
0x1ef2   :  { %3063 = vmatpush1.bf16.msra.mxu1 %v3929_v51 }
0x1ef3   :  { %3065 = vmatprep.subr.bf16.mxu1 %v3935_v16 }
0x1ef6   :  { %3067 = vmatpush1.bf16.msra.mxu1 %v3937_v28 }
0x1ef7   :  { %3085 = vmatprep.subr.bf16.mxu1 %v3907_v2 }
0x1fbc   :  { %v2033_v56 = vpop.f32.mrb[14].mxu1 }
0x1fbd   :  { %v2039_v9 = vrot.slane %v2033_v56, 2  ;;  %v2035_v21 = vpop.f32.mrb[15].mxu1 }
0x1fbe   :  { %v2042_v27 = vadd.f32 %v2035_v21, %v4008_v47 }
0x1fbf   :  { %v2041_v32 = vadd.f32 %v2039_v9, %v4001_v30 }
0x1fc0   :  { %3287 = vtanh.f32 %v2042_v27  ;;  %v2806_v40 = vmul.f32 -1.442695, %v2042_v27 }
0x1fc1   :  { %3289 = vtanh.f32 %v2041_v32  ;;  %v2805_v59 = vmul.f32 -1.442695, %v2041_v32 }
0x1fc2   :  { %3291 = vpow2.f32 %v2806_v40 }
0x1fc3   :  { %3293 = vpow2.f32 %v2805_v59 }
0x1fca   :  { %v3288_v58 = vpop.eup %3287 }
0x1fcb   :  { %v3290_v41 = vpop.eup %3289  ;;  %2082 = vrot.lane.b32.xlu1 %v3288_v58, %s3507_s4 }
0x1fcc   :  { %2055 = vrot.lane.b32.xlu0 %v3290_v41, %s3507_s4  ;;  %v3292_v2 = vpop.eup %3291 }
0x1fcd   :  { %v3294_v60 = vpop.eup %3293  ;;  %v2073_v62 = vadd.f32 1.0, %v3292_v2 }
0x1fce   :  { %v2046_v0 = vadd.f32 1.0, %v3294_v60 }
0x1fcf   :  { %3295 = vrcp.f32 %v2073_v62 }
0x1fd0   :  { %3297 = vrcp.f32 %v2046_v0 }
0x1fd9   :  { %v3296_v47 = vpop.eup %3295 }
0x1fda   :  { %v3298_v5 = vpop.eup %3297  ;;  %v2080_v10 = vmul.f32 %v3296_v47, %v2078_v14 }
0x1fdb   :  { %v2053_v63 = vmul.f32 %v3298_v5, %v2051_v18 }
0x203d   :  { %v2083_v30 = vpop.permute.xlu1 %2082 }
0x203e   :  { %v2085_v1 = vmul.f32 %v3296_v47, %v2083_v30  ;;  %v2056_v4 = vpop.permute.xlu0 %2055 }
0x203f   :  { %v2058_v6 = vmul.f32 %v3298_v5, %v2056_v4 }
0x2040   :  { %2087 = vrot.lane.b32.xlu1 %v2085_v1, %s3508_s14 }
0x2041   :  { %2060 = vrot.lane.b32.xlu0 %v2058_v6, %s3508_s14 }
0x20b2   :  { %v2088_v23 = vpop.permute.xlu1 %2087 }
0x20b3   :  { %v4112_v54 = vadd.f32 %v2088_v23, %v2080_v10  ;;  %v2061_v19 = vpop.permute.xlu0 %2060 }
0x20b4   :  { %v2063_v3 = vadd.f32 %v2061_v19, %v2053_v63 }
0x20b5   :  { %3299 = vtanh.f32 %v4112_v54  ;;  %v2222_v62 = vrot.slane %v4112_v54, 2 }
0x20b6   :  { %3301 = vtanh.f32 %v2063_v3  ;;  %v2195_v2 = vrot.slane %v2063_v3, 6 }
0x20bf   :  { %v3300_v25 = vpop.eup %3299 }
0x20c0   :  { %v3302_v20 = vpop.eup %3301  ;;  %2093 = vrot.lane.b32.xlu1 %v3300_v25, %s3507_s4 }
0x20c1   :  { %2066 = vrot.lane.b32.xlu0 %v3302_v20, %s3507_s4 }
0x2132   :  { %v2094_v22 = vpop.permute.xlu1 %2093 }
0x2133   :  { %v4117_v45 = vmul.f32 %v3296_v47, %v2094_v22  ;;  %v2067_v15 = vpop.permute.xlu0 %2066 }
0x2134   :  { %v2069_v24 = vmul.f32 %v3298_v5, %v2067_v15 }
0x2135   :  { %v2102_v50 = vrot.slane %v4117_v45, 2 }
0x2136   :  { %2098 = vrot.lane.b32.xlu1 %v2069_v24, %s3508_s14 }
0x2137   :  { %2103 = vrot.lane.b32.xlu0 %v2102_v50, %s3507_s4 }
0x21a8   :  { %v4122_v46 = vpop.permute.xlu1 %2098 }
0x21a9   :  { %v2104_v29 = vpop.permute.xlu0 %2103 }
0x21aa   :  { %v2106_v33 = vsel %vm353_vm1, %v4122_v46, %v2104_v29 }
0x21ab   :  { %v2108_v36 = vrot.slane %v2106_v33, 6 }
0x21ad   :  { %2807 = vmatmul.mubr.msk.f32.vlgmr.msra.gmra.mrb[16].mxu0 %vm216_vm2, %v2108_v36 }
0x21ae   :  { %3071 = vmatpush1.bf16.msra.mxu0 %v3911_v12  ;;  %2465 = vmatprep.mubr.f32.mxu0 %v3506_v7 }
0x21af   :  { %3073 = vmatprep.subr.bf16.mxu0 %v3916_v26 }
0x21b2   :  { %3075 = vmatpush1.bf16.msra.mxu0 %v3919_v31 }
0x21b3   :  { %3077 = vmatprep.subr.bf16.mxu0 %v3926_v48 }
0x21b6   :  { %3079 = vmatpush1.bf16.msra.mxu0 %v3929_v51 }
0x21b7   :  { %3081 = vmatprep.subr.bf16.mxu0 %v3935_v16 }
0x21ba   :  { %3083 = vmatpush1.bf16.msra.mxu0 %v3937_v28 }
0x2280   :  { %v2177_v37 = vpop.f32.mrb[16].mxu0 }
0x2281   :  { %v2182_v39 = vadd.f32 %v2177_v37, %v4006_v42  ;;  %v2179_v44 = vpop.f32.mrb[17].mxu0 }
0x2282   :  { %v2184_v38 = vrot.slane %v2179_v44, 2 }
0x2283   :  { %3303 = vtanh.f32 %v2182_v39  ;;  %v2808_v53 = vmul.f32 -1.442695, %v2182_v39 }
0x2284   :  { %v2186_v34 = vadd.f32 %v2184_v38, %v4003_v13 }
0x2286   :  { %3305 = vtanh.f32 %v2186_v34  ;;  %v2809_v55 = vmul.f32 -1.442695, %v2186_v34 }
0x2287   :  { %3307 = vpow2.f32 %v2808_v53 }
0x2288   :  { %3309 = vpow2.f32 %v2809_v55 }
0x228d   :  { %v3304_v35 = vpop.eup %3303 }
0x228e   :  { %2199 = vrot.lane.b32.xlu0 %v3304_v35, %s3507_s4 }
0x2290   :  { %v3306_v52 = vpop.eup %3305 }
0x2291   :  { %2226 = vrot.lane.b32.xlu1 %v3306_v52, %s3507_s4  ;;  %v3308_v8 = vpop.eup %3307 }
0x2292   :  { %v3310_v56 = vpop.eup %3309  ;;  %v2190_v9 = vadd.f32 1.0, %v3308_v8 }
0x2293   :  { %v2217_v21 = vadd.f32 1.0, %v3310_v56 }
0x2294   :  { %3311 = vrcp.f32 %v2190_v9 }
0x2295   :  { %3313 = vrcp.f32 %v2217_v21 }
0x229e   :  { %v3312_v27 = vpop.eup %3311 }
0x229f   :  { %v3314_v41 = vpop.eup %3313  ;;  %v2197_v60 = vmul.f32 %v3312_v27, %v2195_v2 }
0x22a0   :  { %v2224_v30 = vmul.f32 %v3314_v41, %v2222_v62 }
0x2300   :  { %v2200_v32 = vpop.permute.xlu0 %2199 }
0x2301   :  { %v2202_v58 = vmul.f32 %v3312_v27, %v2200_v32 }
0x2303   :  { %2204 = vrot.lane.b32.xlu0 %v2202_v58, %s3508_s14  ;;  %v2227_v40 = vpop.permute.xlu1 %2226 }
0x2304   :  { %v2229_v59 = vmul.f32 %v3314_v41, %v2227_v40 }
0x2306   :  { %2231 = vrot.lane.b32.xlu1 %v2229_v59, %s3508_s14 }
0x2375   :  { %v2205_v0 = vpop.permute.xlu0 %2204 }
0x2376   :  { %v2207_v47 = vadd.f32 %v2205_v0, %v2197_v60 }
0x2378   :  { %3315 = vtanh.f32 %v2207_v47  ;;  %v2232_v5 = vpop.permute.xlu1 %2231  ;;  %v2341_v38 = vrot.slane %v2207_v47, 6 }
0x2379   :  { %v2234_v1 = vadd.f32 %v2232_v5, %v2224_v30 }
0x237b   :  { %3317 = vtanh.f32 %v2234_v1  ;;  %v2368_v34 = vrot.slane %v2234_v1, 2 }
0x2382   :  { %v3316_v4 = vpop.eup %3315 }
0x2383   :  { %2210 = vrot.lane.b32.xlu0 %v3316_v4, %s3507_s4 }
0x2385   :  { %v3318_v6 = vpop.eup %3317 }
0x2386   :  { %2237 = vrot.lane.b32.xlu1 %v3318_v6, %s3507_s4 }
0x23f5   :  { %v2211_v14 = vpop.permute.xlu0 %2210 }
0x23f6   :  { %v2213_v18 = vmul.f32 %v3312_v27, %v2211_v14 }
0x23f8   :  { %2242 = vrot.lane.b32.xlu1 %v2213_v18, %s3508_s14  ;;  %v2238_v10 = vpop.permute.xlu1 %2237 }
0x23f9   :  { %v4145_v23 = vmul.f32 %v3314_v41, %v2238_v10 }
0x23fb   :  { %v2246_v63 = vrot.slane %v4145_v23, 6 }
0x23fd   :  { %2247 = vrot.lane.b32.xlu0 %v2246_v63, %s3507_s4 }
0x246a   :  { %v4149_v54 = vpop.permute.xlu1 %2242 }
0x246f   :  { %v2248_v19 = vpop.permute.xlu0 %2247 }
0x2470   :  { %v2250_v3 = vsel %vm353_vm1, %v4149_v54, %v2248_v19 }
0x2471   :  { %2810 = vmatmul.mubr.msk.f32.vlgmr.msra.gmra.mrb[16].mxu1 %vm216_vm2, %v2250_v3 }
0x2472   :  { %3087 = vmatpush1.bf16.msra.mxu1 %v3911_v12  ;;  %2612 = vmatprep.mubr.f32.mxu1 %v3506_v7 }
0x2473   :  { %3089 = vmatprep.subr.bf16.mxu1 %v3916_v26 }
0x2476   :  { %3091 = vmatpush1.bf16.msra.mxu1 %v3919_v31 }
0x2477   :  { %3093 = vmatprep.subr.bf16.mxu1 %v3926_v48 }
0x247a   :  { %3095 = vmatpush1.bf16.msra.mxu1 %v3929_v51 }
0x247b   :  { %3097 = vmatprep.subr.bf16.mxu1 %v3935_v16 }
0x247e   :  { %3099 = vmatpush1.bf16.msra.mxu1 %v3937_v28 }
0x2544   :  { %v2320_v25 = vpop.f32.mrb[16].mxu1 }
0x2545   :  { %v2326_v20 = vrot.slane %v2320_v25, 6  ;;  %v2322_v22 = vpop.f32.mrb[17].mxu1 }
0x2546   :  { %v2330_v15 = vrot.slane %v2322_v22, 4 }
0x2547   :  { %v2328_v12 = vadd.f32 %v2326_v20, %v4006_v42 }
0x2548   :  { %v2332_v7 = vadd.f32 %v2330_v15, %v4003_v13 }
0x2549   :  { %3319 = vtanh.f32 %v2328_v12  ;;  %v2811_v48 = vmul.f32 -1.442695, %v2328_v12 }
0x254a   :  { %3321 = vtanh.f32 %v2332_v7  ;;  %v2812_v51 = vmul.f32 -1.442695, %v2332_v7 }
0x254b   :  { %3323 = vpow2.f32 %v2811_v48 }
0x254c   :  { %3325 = vpow2.f32 %v2812_v51 }
0x2553   :  { %v3320_v26 = vpop.eup %3319 }
0x2554   :  { %v3322_v31 = vpop.eup %3321  ;;  %2345 = vrot.lane.b32.xlu0 %v3320_v26, %s3507_s4 }
0x2555   :  { %2372 = vrot.lane.b32.xlu1 %v3322_v31, %s3507_s4  ;;  %v3324_v16 = vpop.eup %3323 }
0x2556   :  { %v3326_v28 = vpop.eup %3325  ;;  %v2336_v24 = vadd.f32 1.0, %v3324_v16 }
0x2557   :  { %v2363_v50 = vadd.f32 1.0, %v3326_v28 }
0x2558   :  { %3327 = vrcp.f32 %v2336_v24 }
0x2559   :  { %3329 = vrcp.f32 %v2363_v50 }
0x2562   :  { %v3328_v29 = vpop.eup %3327 }
0x2563   :  { %v3330_v36 = vpop.eup %3329  ;;  %v2343_v35 = vmul.f32 %v3328_v29, %v2341_v38 }
0x2564   :  { %v2370_v53 = vmul.f32 %v3330_v36, %v2368_v34 }
0x25c6   :  { %v2346_v33 = vpop.permute.xlu0 %2345 }
0x25c7   :  { %v2348_v37 = vmul.f32 %v3328_v29, %v2346_v33  ;;  %v2373_v39 = vpop.permute.xlu1 %2372 }
0x25c8   :  { %v2375_v44 = vmul.f32 %v3330_v36, %v2373_v39 }
0x25c9   :  { %2350 = vrot.lane.b32.xlu0 %v2348_v37, %s3508_s14 }
0x25ca   :  { %2377 = vrot.lane.b32.xlu1 %v2375_v44, %s3508_s14 }
0x263b   :  { %v2351_v52 = vpop.permute.xlu0 %2350 }
0x263c   :  { %v2353_v55 = vadd.f32 %v2351_v52, %v2343_v35  ;;  %v2378_v8 = vpop.permute.xlu1 %2377 }
0x263d   :  { %v2380_v56 = vadd.f32 %v2378_v8, %v2370_v53 }
0x263e   :  { %3331 = vtanh.f32 %v2353_v55  ;;  %v2488_v31 = vrot.slane %v2353_v55, 6 }
0x263f   :  { %3333 = vtanh.f32 %v2380_v56  ;;  %v2515_v48 = vrot.slane %v2380_v56, 2 }
0x2648   :  { %v3332_v9 = vpop.eup %3331 }
0x2649   :  { %v3334_v21 = vpop.eup %3333  ;;  %2356 = vrot.lane.b32.xlu0 %v3332_v9, %s3507_s4 }
0x264a   :  { %2383 = vrot.lane.b32.xlu1 %v3334_v21, %s3507_s4 }
0x26bb   :  { %v2357_v27 = vpop.permute.xlu0 %2356 }
0x26bc   :  { %v2359_v32 = vmul.f32 %v3328_v29, %v2357_v27  ;;  %v2384_v58 = vpop.permute.xlu1 %2383 }
0x26bd   :  { %v4170_v41 = vmul.f32 %v3330_v36, %v2384_v58 }
0x26be   :  { %2388 = vrot.lane.b32.xlu1 %v2359_v32, %s3508_s14 }
0x26bf   :  { %v2392_v40 = vrot.slane %v4170_v41, 2 }
0x26c1   :  { %2393 = vrot.lane.b32.xlu0 %v2392_v40, %s3507_s4 }
0x2730   :  { %v4175_v59 = vpop.permute.xlu1 %2388 }
0x2733   :  { %v2394_v2 = vpop.permute.xlu0 %2393 }
0x2734   :  { %v2396_v60 = vsel %vm353_vm1, %v4175_v59, %v2394_v2 }
0x2735   :  { %v2398_v62 = vrot.slane %v2396_v60, 2 }
0x2737   :  { %2813 = vmatmul.mubr.msk.f32.vlgmr.msra.gmra.mrb[18].mxu0 %vm216_vm2, %v2398_v62 }
0x280a   :  { %v2467_v0 = vpop.f32.mrb[18].mxu0 }
0x280b   :  { %v2473_v47 = vrot.slane %v2467_v0, 4  ;;  %v2469_v30 = vpop.f32.mrb[19].mxu0 }
0x280c   :  { %v2477_v5 = vrot.slane %v2469_v30, 6 }
0x280d   :  { %v2475_v1 = vadd.f32 %v2473_v47, %v4006_v42 }
0x280e   :  { %v2479_v4 = vadd.f32 %v2477_v5, %v4003_v13 }
0x280f   :  { %3335 = vtanh.f32 %v2475_v1  ;;  %v2814_v18 = vmul.f32 -1.442695, %v2475_v1 }
0x2810   :  { %3337 = vtanh.f32 %v2479_v4  ;;  %v2815_v10 = vmul.f32 -1.442695, %v2479_v4 }
0x2811   :  { %3339 = vpow2.f32 %v2814_v18 }
0x2812   :  { %3341 = vpow2.f32 %v2815_v10 }
0x2819   :  { %v3336_v6 = vpop.eup %3335 }
0x281a   :  { %v3338_v14 = vpop.eup %3337  ;;  %2492 = vrot.lane.b32.xlu0 %v3336_v6, %s3507_s4 }
0x281b   :  { %2519 = vrot.lane.b32.xlu1 %v3338_v14, %s3507_s4  ;;  %v3340_v63 = vpop.eup %3339 }
0x281c   :  { %v3342_v19 = vpop.eup %3341  ;;  %v2483_v3 = vadd.f32 1.0, %v3340_v63 }
0x281d   :  { %v2510_v25 = vadd.f32 1.0, %v3342_v19 }
0x281e   :  { %3343 = vrcp.f32 %v2483_v3 }
0x281f   :  { %3345 = vrcp.f32 %v2510_v25 }
0x2828   :  { %v3344_v20 = vpop.eup %3343 }
0x2829   :  { %v3346_v15 = vpop.eup %3345  ;;  %v2490_v51 = vmul.f32 %v3344_v20, %v2488_v31 }
0x282a   :  { %v2517_v28 = vmul.f32 %v3346_v15, %v2515_v48 }
0x288c   :  { %v2493_v22 = vpop.permute.xlu0 %2492 }
0x288d   :  { %v2495_v12 = vmul.f32 %v3344_v20, %v2493_v22  ;;  %v2520_v7 = vpop.permute.xlu1 %2519 }
0x288e   :  { %v2522_v26 = vmul.f32 %v3346_v15, %v2520_v7 }
0x288f   :  { %2497 = vrot.lane.b32.xlu0 %v2495_v12, %s3508_s14 }
0x2890   :  { %2524 = vrot.lane.b32.xlu1 %v2522_v26, %s3508_s14 }
0x2901   :  { %v2498_v16 = vpop.permute.xlu0 %2497 }
0x2902   :  { %v2500_v24 = vadd.f32 %v2498_v16, %v2490_v51  ;;  %v2525_v50 = vpop.permute.xlu1 %2524 }
0x2903   :  { %v2527_v29 = vadd.f32 %v2525_v50, %v2517_v28 }
0x2904   :  { %3347 = vtanh.f32 %v2500_v24  ;;  %v2632_v14 = vrot.slane %v2500_v24, 6 }
0x2905   :  { %3349 = vtanh.f32 %v2527_v29  ;;  %v2659_v6 = vrot.slane %v2527_v29, 2 }
0x290e   :  { %v3348_v33 = vpop.eup %3347 }
0x290f   :  { %v3350_v36 = vpop.eup %3349  ;;  %2503 = vrot.lane.b32.xlu0 %v3348_v33, %s3507_s4 }
0x2910   :  { %2530 = vrot.lane.b32.xlu1 %v3350_v36, %s3507_s4 }
0x2981   :  { %v2504_v37 = vpop.permute.xlu0 %2503 }
0x2982   :  { %v2506_v39 = vmul.f32 %v3344_v20, %v2504_v37  ;;  %v2531_v44 = vpop.permute.xlu1 %2530 }
0x2983   :  { %v2533_v38 = vmul.f32 %v3346_v15, %v2531_v44 }
0x2984   :  { %2535 = vrot.lane.b32.xlu1 %v2506_v39, %s3508_s14 }
0x2985   :  { %v2539_v34 = vrot.slane %v2533_v38, 6 }
0x2987   :  { %2540 = vrot.lane.b32.xlu0 %v2539_v34, %s3507_s4 }
0x29f6   :  { %v4190_v35 = vpop.permute.xlu1 %2535 }
0x29f9   :  { %v2541_v52 = vpop.permute.xlu0 %2540 }
0x29fa   :  { %v2543_v53 = vsel %vm353_vm1, %v4190_v35, %v2541_v52 }
0x29fb   :  { %v2545_v55 = vrot.slane %v2543_v53, 4 }
0x29fd   :  { %2816 = vmatmul.mubr.msk.f32.vlgmr.msra.gmra.mrb[18].mxu1 %vm216_vm2, %v2545_v55 }
0x2ad0   :  { %v2614_v8 = vpop.f32.mrb[18].mxu1 }
0x2ad1   :  { %v2620_v56 = vrot.slane %v2614_v8, 2  ;;  %v2616_v9 = vpop.f32.mrb[19].mxu1 }
0x2ad2   :  { %v2623_v21 = vadd.f32 %v2616_v9, %v4003_v13 }
0x2ad3   :  { %v2622_v27 = vadd.f32 %v2620_v56, %v4006_v42 }
0x2ad4   :  { %3351 = vtanh.f32 %v2623_v21  ;;  %v2818_v40 = vmul.f32 -1.442695, %v2623_v21 }
0x2ad5   :  { %3353 = vtanh.f32 %v2622_v27  ;;  %v2817_v2 = vmul.f32 -1.442695, %v2622_v27 }
0x2ad6   :  { %3355 = vpow2.f32 %v2818_v40 }
0x2ad7   :  { %3357 = vpow2.f32 %v2817_v2 }
0x2ade   :  { %v3352_v32 = vpop.eup %3351 }
0x2adf   :  { %v3354_v58 = vpop.eup %3353  ;;  %2663 = vrot.lane.b32.xlu0 %v3352_v32, %s3507_s4 }
0x2ae0   :  { %2636 = vrot.lane.b32.xlu1 %v3354_v58, %s3507_s4  ;;  %v3356_v60 = vpop.eup %3355 }
0x2ae1   :  { %v3358_v62 = vpop.eup %3357  ;;  %v2654_v0 = vadd.f32 1.0, %v3356_v60 }
0x2ae2   :  { %v2627_v47 = vadd.f32 1.0, %v3358_v62 }
0x2ae3   :  { %3359 = vrcp.f32 %v2654_v0 }
0x2ae4   :  { %3361 = vrcp.f32 %v2627_v47 }
0x2aed   :  { %v3360_v13 = vpop.eup %3359 }
0x2aee   :  { %v3362_v30 = vpop.eup %3361  ;;  %v2661_v18 = vmul.f32 %v3360_v13, %v2659_v6 }
0x2aef   :  { %v2634_v63 = vmul.f32 %v3362_v30, %v2632_v14 }
0x2b51   :  { %v2664_v42 = vpop.permute.xlu0 %2663 }
0x2b52   :  { %v2666_v5 = vmul.f32 %v3360_v13, %v2664_v42  ;;  %v2637_v1 = vpop.permute.xlu1 %2636 }
0x2b53   :  { %v2639_v4 = vmul.f32 %v3362_v30, %v2637_v1 }
0x2b54   :  { %2668 = vrot.lane.b32.xlu0 %v2666_v5, %s3508_s14 }
0x2b55   :  { %2641 = vrot.lane.b32.xlu1 %v2639_v4, %s3508_s14 }
0x2bc6   :  { %v2669_v10 = vpop.permute.xlu0 %2668 }
0x2bc7   :  { %v2671_v19 = vadd.f32 %v2669_v10, %v2661_v18  ;;  %v2642_v3 = vpop.permute.xlu1 %2641 }
0x2bc8   :  { %v2644_v25 = vadd.f32 %v2642_v3, %v2634_v63 }
0x2bc9   :  { %3363 = vtanh.f32 %v2671_v19 }
0x2bca   :  { %3365 = vtanh.f32 %v2644_v25 }
0x2bd3   :  { %v3364_v20 = vpop.eup %3363 }
0x2bd4   :  { %v3366_v22 = vpop.eup %3365  ;;  %2674 = vrot.lane.b32.xlu0 %v3364_v20, %s3507_s4 }
0x2bd5   :  { %2647 = vrot.lane.b32.xlu1 %v3366_v22, %s3507_s4 }
0x2bd8   :  { %2683 = vrot.lane.b32.xlu0 %v2533_v38, %s3507_s4 }
0x2bd9   :  { %2687 = vrot.lane.b32.xlu1 %v4170_v41, %s3507_s4 }
0x2bdc   :  { %2691 = vrot.lane.b32.xlu0 %v4145_v23, %s3507_s4 }
0x2bdd   :  { %2695 = vrot.lane.b32.xlu1 %v4117_v45, %s3507_s4 }
0x2be0   :  { %2699 = vrot.lane.b32.xlu0 %v4086_v49, %s3507_s4 }
0x2be1   :  { %2703 = vrot.lane.b32.xlu1 %v4054_v61, %s3507_s4 }
0x2c46   :  { %v2675_v15 = vpop.permute.xlu0 %2674 }
0x2c47   :  { %v2677_v12 = vmul.f32 %v3360_v13, %v2675_v15  ;;  %v2648_v7 = vpop.permute.xlu1 %2647 }
0x2c48   :  { %v2650_v26 = vmul.f32 %v3362_v30, %v2648_v7 }
0x2c49   :  { %2679 = vrot.lane.b32.xlu1 %v2677_v12, %s3507_s4 }
0x2c4a   :  { %2708 = vrot.lane.b32.xlu0 %v2650_v26, %s3508_s14  ;;  %v2684_v41 = vpop.permute.xlu0 %2683 }
0x2c4b   :  { %v2686_v45 = vsel %vm353_vm1, %v4059_v57, %v2684_v41  ;;  %v2688_v23 = vpop.permute.xlu1 %2687 }
0x2c4c   :  { %2719 = vst.msk [vmem:[#allocation2] sm:$0xc] %vm2718_vm6, %v2686_v45  ;;  %v2690_v61 = vsel %vm353_vm1, %v4091_v43, %v2688_v23 }
0x2c4d   :  { %2722 = vst.msk [vmem:[#allocation2] sm:$0x30] %vm2721_vm7, %v2690_v61  ;;  %2711 = vrot.lane.b32.xlu1 %v4021_v17, %s3507_s4 }
0x2c4e   :  { %v2692_v49 = vpop.permute.xlu0 %2691 }
0x2c4f   :  { %v2694_v31 = vsel %vm353_vm1, %v4122_v46, %v2692_v49  ;;  %v2696_v48 = vpop.permute.xlu1 %2695 }
0x2c50   :  { %2725 = vst.msk [vmem:[#allocation2] sm:$0xc0] %vm2724_vm8, %v2694_v31  ;;  %v2698_v57 = vsel %vm353_vm1, %v4149_v54, %v2696_v48 }
0x2c51   :  { %2727 = vst.msk [vmem:[#allocation2 + $0x8] sm:$0x3] %vm2715_vm9, %v2698_v57 }
0x2c52   :  { %v2700_v43 = vpop.permute.xlu0 %2699 }
0x2c53   :  { %v2702_v51 = vsel %vm353_vm1, %v4175_v59, %v2700_v43  ;;  %v2704_v16 = vpop.permute.xlu1 %2703 }
0x2c54   :  { %2729 = vst.msk [vmem:[#allocation2 + $0x8] sm:$0xc] %vm2718_vm6, %v2702_v51  ;;  %v2706_v17 = vsel %vm353_vm1, %v4190_v35, %v2704_v16 }
0x2c55   :  { %2731 = vst.msk [vmem:[#allocation2 + $0x8] sm:$0x30] %vm2721_vm7, %v2706_v17 }
0x2cbb   :  { %v2680_v46 = vpop.permute.xlu1 %2679 }
0x2cbc   :  { %v2682_v54 = vsel %vm353_vm1, %v4025_v11, %v2680_v46  ;;  %v2709_v28 = vpop.permute.xlu0 %2708 }
0x2cbd   :  { %2716 = vst.msk [vmem:[#allocation2] sm:$0x3] %vm2715_vm9, %v2682_v54 }
0x2cbf   :  { %v2712_v24 = vpop.permute.xlu1 %2711 }
0x2cc0   :  { %v2714_v59 = vsel %vm353_vm1, %v2709_v28, %v2712_v24 }
0x2cc1   :  { %2733 = vst.msk [vmem:[#allocation2 + $0x8] sm:$0xc0] %vm2724_vm8, %v2714_v59 }
0x2cc8   :  { %v2738_v50 = vld [vmem:[%s2737_s24] sm:$0x3] }
0x2cc9   :  { %v2743_v29 = vld [vmem:[%s2742_s25] sm:$0x3] }
0x2cca   :  { %v2745_v11 = vsel %vm2744_vm10, %v2738_v50, %v2743_v29 }
0x2ccb   :  { %2746 = vst.msk [vmem:[#allocation13] sm:$0x3] %vm2715_vm9, %v2745_v11 }
0x2ccc   :  { %3478 = shalt.err (!%p3475_p13)
}
0x2ccd   :  { %s3479_s30 = scalar_lea.hbm %s4262_s8, 32 }
0x2cce   :  { %p3480_p0 = scmp.ne.s32.totalorder %s4262_s8, %s3479_s30  ;;  %p3483_p1 = scmp.lt.u32.totalorder %s3479_s30, %s4262_s8 }
0x2cd0   :  { %p3485_p2 = pnand %p3483_p1, %p3480_p0 }
0x2cd2   :  { %3488 = shalt.err (!%p3485_p2)
}
0x2cd3   :  { %2756 = dma.vmem_to_hbm [thread:$0]  %s2754_s23, 32, %s4262_s8, [#allocation5]  }
0x2cd4   :  { %3497 = dma.done.wait [#allocation5], 32  }
0x2cd5   :  { %3498 = vsyncadd [#allocation5], 4294967264 }
0x2cd6   :  { %2760 = vsyncpa [#allocation4], 1 }
0x2cd7   :  { %2761 = vsyncpa [#allocation9], 1 }
0x2cd8   :  { %2762 = vsyncpa [#allocation12], 1 }
0x2cd9   :  { %2763 = vsyncpa [#allocation5], 1 }
0x2cda   :  { %2764 = vsyncpa [#allocation6], 1 }

</bundles_post_ra>
